<compile_context>
chip_gen: v5e
topology: v5e:2x2
jax: 0.10.0
libtpu: 0.0.40
codegen_flags: <defaults>
</compile_context>

<pallas_src>
import jax
import jax.numpy as jnp
from jax.experimental import pallas as pl
from jax.experimental.pallas import tpu as pltpu

BOARD_SIZE = 8
INPUT_SIZE = BOARD_SIZE * BOARD_SIZE            # 64
HIDDEN1 = 128
HIDDEN2 = 256
OUTPUT_SIZE = BOARD_SIZE ** 4                   # 4096

DEFAULT_TILE_B = 256                            # batch tile: 128 on v5e, 256 on v6e/v7x


# ---------------------------------------------------------------------------
# Shared in-kernel trunk: fc1 -> fc2 -> {value head, advantage_fc}.
# Packed-constant layout (cpack, (8, 256) f32):
#   row 0, cols 0:128 : b1        row 3 : wv2 (value head as a VPU row)
#   row 1             : b2        row 4 : ba1
#   row 2             : bv1       row 5 : column sums of wa2 (over actions)
#   row 6, col 0      : bv2       row 7, col 0 : sum(ba2)
# ---------------------------------------------------------------------------
def _trunk_compute(x_ref, w1_ref, w2_ref, wv1_ref, wa1_ref, cpack_ref):
    f32, bf16 = jnp.float32, jnp.bfloat16
    b1 = cpack_ref[0:1, 0:HIDDEN1]
    b2 = cpack_ref[1:2, :]
    bv1 = cpack_ref[2:3, :]
    wv2_row = cpack_ref[3:4, :]
    ba1 = cpack_ref[4:5, :]
    bv2 = cpack_ref[6:7, 0:1]

    x = x_ref[...]                                                     # (B, 64) f32
    h1 = jnp.dot(x.astype(bf16), w1_ref[...], preferred_element_type=f32) + b1
    h1 = jnp.maximum(h1, 0.0)                                          # (B, 128)
    h2 = jnp.dot(h1.astype(bf16), w2_ref[...], preferred_element_type=f32) + b2
    h2 = jnp.maximum(h2, 0.0)                                          # (B, 256)
    h2b = h2.astype(bf16)

    # value stream: 256 -> 1 head on the VPU (row multiply + lane reduce)
    vh = jnp.dot(h2b, wv1_ref[...], preferred_element_type=f32) + bv1
    vh = jnp.maximum(vh, 0.0)
    value = jnp.sum(vh * wv2_row, axis=-1, keepdims=True) + bv2        # (B, 1)

    # advantage stream hidden layer
    ah = jnp.dot(h2b, wa1_ref[...], preferred_element_type=f32) + ba1
    ah = jnp.maximum(ah, 0.0)                                          # (B, 256)
    return value, ah


# ---------------------------------------------------------------------------
# Path A: small batch, single fused step (no grid), exact global mean.
# ---------------------------------------------------------------------------
def _dqn_fused_kernel(x_ref, w1_ref, w2_ref, wv1_ref, wa1_ref, wa2_ref, ba2_ref,
                      cpack_ref, out_ref):
    f32 = jnp.float32
    value, ah = _trunk_compute(x_ref, w1_ref, w2_ref, wv1_ref, wa1_ref, cpack_ref)
    adv = jnp.dot(ah.astype(jnp.bfloat16), wa2_ref[...],
                  preferred_element_type=f32) + ba2_ref[...]           # (B, 4096)
    batch = x_ref.shape[0]
    adv_mean = jnp.sum(jnp.sum(adv, axis=1, keepdims=True),
                       axis=0, keepdims=True) * (1.0 / (batch * OUTPUT_SIZE))
    out_ref[...] = (value + (adv - adv_mean)).astype(out_ref.dtype)


# ---------------------------------------------------------------------------
# Path B stage 1: trunk + value + analytic global mean over the TRUE batch.
# Emits offset = value - adv_mean so later batch padding cannot corrupt it.
# ---------------------------------------------------------------------------
def _dqn_trunk_kernel(x_ref, w1_ref, w2_ref, wv1_ref, wa1_ref, cpack_ref,
                      ah_ref, offset_ref):
    f32 = jnp.float32
    value, ah = _trunk_compute(x_ref, w1_ref, w2_ref, wv1_ref, wa1_ref, cpack_ref)
    ah_bf = ah.astype(jnp.bfloat16)
    ah_ref[...] = ah_bf

    colsum = cpack_ref[5:6, :]                                         # (1, 256)
    ba2_sum = cpack_ref[7:8, 0:1]                                      # (1, 1)
    batch = x_ref.shape[0]
    prod = ah_bf.astype(f32) * colsum
    adv_sum = jnp.sum(jnp.sum(prod, axis=1, keepdims=True), axis=0, keepdims=True)
    adv_mean = (adv_sum + batch * ba2_sum) * (1.0 / (batch * OUTPUT_SIZE))
    offset_ref[...] = value - adv_mean                                 # (B, 1)


# ---------------------------------------------------------------------------
# Path B stage 2: batch-tiled advantage head, wa2 resident, lane-dense stores.
# ---------------------------------------------------------------------------
def _dqn_head_kernel(ah_ref, offset_ref, wa2_ref, ba2_ref, out_ref):
    adv = jnp.dot(ah_ref[...], wa2_ref[...],
                  preferred_element_type=jnp.float32) + ba2_ref[...]
    out_ref[...] = (offset_ref[...] + adv).astype(out_ref.dtype)


# ---------------------------------------------------------------------------
# Parameter preparation (bf16 matmul weights, packed constants).
# ---------------------------------------------------------------------------
def prepare_params(params):
    (w1, b1, w2, b2, wv1, bv1, wv2, bv2, wa1, ba1, wa2, ba2) = params
    f32, bf16 = jnp.float32, jnp.bfloat16
    w1_bf, w2_bf, wv1_bf, wa1_bf, wa2_bf = (
        w.astype(bf16) for w in (w1, w2, wv1, wa1, wa2))

    wa2_colsum = wa2_bf.astype(f32).sum(axis=1)                        # (256,)
    cpack = jnp.zeros((8, HIDDEN2), f32)
    cpack = cpack.at[0, :HIDDEN1].set(b1.reshape(-1))
    cpack = cpack.at[1].set(b2.reshape(-1))
    cpack = cpack.at[2].set(bv1.reshape(-1))
    cpack = cpack.at[3].set(wv2.reshape(-1))
    cpack = cpack.at[4].set(ba1.reshape(-1))
    cpack = cpack.at[5].set(wa2_colsum)
    cpack = cpack.at[6, 0].set(bv2.reshape(())[()])
    cpack = cpack.at[7, 0].set(jnp.sum(ba2))

    return (w1_bf, w2_bf, wv1_bf, wa1_bf, wa2_bf, ba2.astype(f32), cpack)


# ---------------------------------------------------------------------------
# Forward wrappers.
# ---------------------------------------------------------------------------
def _forward_fused(x, prepared, out_dtype):
    w1, w2, wv1, wa1, wa2, ba2, cpack = prepared
    B = x.shape[0]
    out_itemsize = jnp.dtype(out_dtype).itemsize

    weight_bytes = (w1.size + w2.size + wv1.size + wa1.size + wa2.size) * 2 \
        + (ba2.size + cpack.size) * 4
    act_bytes = B * (HIDDEN1 + 3 * HIDDEN2 + OUTPUT_SIZE) * 4
    io_bytes = B * INPUT_SIZE * 4 + B * OUTPUT_SIZE * out_itemsize
    vmem_limit = int(weight_bytes + act_bytes + io_bytes) + (4 << 20)

    flops = 2 * B * (INPUT_SIZE * HIDDEN1 + HIDDEN1 * HIDDEN2
                     + 2 * HIDDEN2 * HIDDEN2 + HIDDEN2 + HIDDEN2 * OUTPUT_SIZE)
    cost = pl.CostEstimate(flops=flops, transcendentals=0,
                           bytes_accessed=int(weight_bytes + io_bytes))

    return pl.pallas_call(
        _dqn_fused_kernel,
        out_shape=jax.ShapeDtypeStruct((B, OUTPUT_SIZE), out_dtype),
        compiler_params=pltpu.CompilerParams(vmem_limit_bytes=vmem_limit),
        cost_estimate=cost,
    )(x, w1, w2, wv1, wa1, wa2, ba2, cpack)


def _forward_two_stage(x, prepared, tile_b, out_dtype):
    w1, w2, wv1, wa1, wa2, ba2, cpack = prepared
    B = x.shape[0]

    # Stage 1: trunk + value + analytic global mean over the TRUE batch.
    # (For very large B this step could itself be batch-tiled; activations are
    #  only B*~5 KiB so it is fine for any realistic RL batch.)
    trunk_vmem = int((w1.size + w2.size + wv1.size + wa1.size) * 2
                     + cpack.size * 4
                     + B * (INPUT_SIZE + HIDDEN1 + 4 * HIDDEN2 + 2) * 4) + (2 << 20)
    ah, offset = pl.pallas_call(
        _dqn_trunk_kernel,
        out_shape=(jax.ShapeDtypeStruct((B, HIDDEN2), jnp.bfloat16),
                   jax.ShapeDtypeStruct((B, 1), jnp.float32)),
        compiler_params=pltpu.CompilerParams(vmem_limit_bytes=trunk_vmem),
    )(x, w1, w2, wv1, wa1, cpack)

    # Pad the batch AFTER the mean so padded rows are inert (sliced off below).
    n_tiles = pl.cdiv(B, tile_b)
    Bp = n_tiles * tile_b
    if Bp != B:
        ah = jnp.pad(ah, ((0, Bp - B), (0, 0)))
        offset = jnp.pad(offset, ((0, Bp - B), (0, 0)))

    out_itemsize = jnp.dtype(out_dtype).itemsize
    head_vmem = int(2 * (wa2.size * 2 + ba2.size * 4
                         + tile_b * HIDDEN2 * 2 + tile_b * 4
                         + tile_b * OUTPUT_SIZE * out_itemsize)) + (2 << 20)
    flops = 2 * Bp * HIDDEN2 * OUTPUT_SIZE
    bytes_accessed = int(wa2.size * 2 + ba2.size * 4 + ah.size * 2
                         + offset.size * 4 + Bp * OUTPUT_SIZE * out_itemsize)
    cost = pl.CostEstimate(flops=flops, transcendentals=0,
                           bytes_accessed=bytes_accessed)

    out = pl.pallas_call(
        _dqn_head_kernel,
        out_shape=jax.ShapeDtypeStruct((Bp, OUTPUT_SIZE), out_dtype),
        grid=(n_tiles,),
        in_specs=[
            pl.BlockSpec((tile_b, HIDDEN2), lambda i: (i, 0)),        # ah batch tile
            pl.BlockSpec((tile_b, 1), lambda i: (i, 0)),              # value - adv_mean
            pl.BlockSpec((HIDDEN2, OUTPUT_SIZE), lambda i: (0, 0)),   # wa2 resident
            pl.BlockSpec((1, OUTPUT_SIZE), lambda i: (0, 0)),         # ba2 resident
        ],
        out_specs=pl.BlockSpec((tile_b, OUTPUT_SIZE), lambda i: (i, 0)),
        compiler_params=pltpu.CompilerParams(
            dimension_semantics=("parallel",),
            vmem_limit_bytes=head_vmem),
        cost_estimate=cost,
    )(ah, offset, wa2, ba2)
    return out if Bp == B else out[:B]


def dueling_dqn_forward(x, prepared, *, tile_b=DEFAULT_TILE_B, out_dtype=jnp.float32):
    """DuelingDQN forward.  tile_b: batch tile for the advantage matmul when
    B > tile_b (use 128 on v5e, 256 on v6e/v7x).  out_dtype=jnp.bfloat16 halves
    output HBM writeback if downstream code tolerates bf16 Q-values."""
    B = x.shape[0]
    if B <= tile_b:
        return _forward_fused(x, prepared, out_dtype)
    return _forward_two_stage(x, prepared, tile_b, out_dtype)


# ---------------------------------------------------------------------------
# Deterministic init + pure-JAX references (module semantics).
# ---------------------------------------------------------------------------
def init_params(key):
    """PyTorch-style init. Weights stored transposed: (in, out)."""
    def linear(key, fan_in, fan_out):
        kw, kb = jax.random.split(key)
        bound = 1.0 / jnp.sqrt(fan_in)
        w = jax.random.uniform(kw, (fan_in, fan_out), jnp.float32, -bound, bound)
        b = jax.random.uniform(kb, (1, fan_out), jnp.float32, -bound, bound)
        return w, b

    keys = jax.random.split(key, 6)
    w1, b1 = linear(keys[0], INPUT_SIZE, HIDDEN1)
    w2, b2 = linear(keys[1], HIDDEN1, HIDDEN2)
    wv1, bv1 = linear(keys[2], HIDDEN2, HIDDEN2)
    wv2, bv2 = linear(keys[3], HIDDEN2, 1)
    wa1, ba1 = linear(keys[4], HIDDEN2, HIDDEN2)
    wa2, ba2 = linear(keys[5], HIDDEN2, OUTPUT_SIZE)
    return (w1, b1, w2, b2, wv1, bv1, wv2, bv2, wa1, ba1, wa2, ba2)


def reference_forward_fp32(x, params):
    (w1, b1, w2, b2, wv1, bv1, wv2, bv2, wa1, ba1, wa2, ba2) = params
    h1 = jnp.maximum(x @ w1 + b1, 0.0)
    h2 = jnp.maximum(h1 @ w2 + b2, 0.0)
    vh = jnp.maximum(h2 @ wv1 + bv1, 0.0)
    value = vh @ wv2 + bv2
    ah = jnp.maximum(h2 @ wa1 + ba1, 0.0)
    adv = ah @ wa2 + ba2
    return value + (adv - jnp.mean(adv))


def reference_forward_bf16(x, params):
    """Mirror of the kernel's mixed precision (bf16 matmul operands, f32 accum)."""
    (w1, b1, w2, b2, wv1, bv1, wv2, bv2, wa1, ba1, wa2, ba2) = params
    bf = lambda a: a.astype(jnp.bfloat16).astype(jnp.float32)
    h1 = jnp.maximum(bf(x) @ bf(w1) + b1, 0.0)
    h2 = jnp.maximum(bf(h1) @ bf(w2) + b2, 0.0)
    h2b = bf(h2)
    vh = jnp.maximum(h2b @ bf(wv1) + bv1, 0.0)
    value = vh @ wv2 + bv2
    ah = jnp.maximum(h2b @ bf(wa1) + ba1, 0.0)
    adv = bf(ah) @ bf(wa2) + ba2
    return value + (adv - jnp.mean(adv))


if __name__ == "__main__":
    key = jax.random.PRNGKey(0)
    kx, kp = jax.random.split(key)
    params = init_params(kp)
    prepared = prepare_params(params)

    # --- small batch: single fused grid-less step (everything resident) -----
    B1 = 8
    x1 = jax.random.normal(kx, (B1, INPUT_SIZE), jnp.float32)
    out1 = jax.block_until_ready(dueling_dqn_forward(x1, prepared))
    assert out1.shape == (B1, OUTPUT_SIZE) and out1.dtype == jnp.float32
    ref1_bf = reference_forward_bf16(x1, params)
    ref1_f32 = reference_forward_fp32(x1, params)
    assert jnp.allclose(out1, ref1_bf, atol=1e-3, rtol=1e-3), "fused: mismatch vs bf16 ref"
    assert jnp.allclose(out1, ref1_f32, atol=2e-2, rtol=2e-2), "fused: mismatch vs f32 ref"

    # --- optional bf16 output path ------------------------------------------
    out1_bf = jax.block_until_ready(
        dueling_dqn_forward(x1, prepared, out_dtype=jnp.bfloat16))
    assert out1_bf.dtype == jnp.bfloat16
    assert jnp.allclose(out1_bf.astype(jnp.float32), ref1_bf, atol=2e-2, rtol=2e-2), \
        "fused bf16-out: mismatch vs bf16 ref"

    # --- batch-tiled two-stage path, exercised at small shapes by shrinking
    #     tile_b; batch deliberately NOT a multiple of tile_b to hit padding --
    B2 = 20
    x2 = jax.random.normal(jax.random.fold_in(kx, 1), (B2, INPUT_SIZE), jnp.float32)
    out2 = jax.block_until_ready(dueling_dqn_forward(x2, prepared, tile_b=8))
    assert out2.shape == (B2, OUTPUT_SIZE)
    ref2_bf = reference_forward_bf16(x2, params)
    ref2_f32 = reference_forward_fp32(x2, params)
    assert jnp.allclose(out2, ref2_bf, atol=1e-3, rtol=1e-3), "two-stage: mismatch vs bf16 ref"
    # loose sanity check vs exact fp32 module semantics
    assert jnp.allclose(out2, ref2_f32, atol=3e-2, rtol=3e-2), "two-stage: mismatch vs f32 ref"

    print("KERNEL_OK")
</pallas_src>

<mosaic_0001>
module attributes {stable_mosaic.version = 11 : i64} {
  func.func @_dqn_fused_kernel(%arg0: memref<8x64xf32, #tpu.memory_space<vmem>>, %arg1: memref<64x128xbf16, #tpu.memory_space<vmem>>, %arg2: memref<128x256xbf16, #tpu.memory_space<vmem>>, %arg3: memref<256x256xbf16, #tpu.memory_space<vmem>>, %arg4: memref<256x256xbf16, #tpu.memory_space<vmem>>, %arg5: memref<256x4096xbf16, #tpu.memory_space<vmem>>, %arg6: memref<1x4096xf32, #tpu.memory_space<vmem>>, %arg7: memref<8x256xf32, #tpu.memory_space<vmem>>, %arg8: memref<8x4096xf32, #tpu.memory_space<vmem>>) attributes {dimension_semantics = [], scalar_prefetch = 0 : i64, scratch_operands = 0 : i64, tpu.core_type = #tpu.core_type<tc>} {
    %c0 = arith.constant 0 : index
    %c0_0 = arith.constant 0 : index
    %0 = vector.load %arg7[%c0, %c0_0] : memref<8x256xf32, #tpu.memory_space<vmem>>, vector<1x128xf32>
    %c1 = arith.constant 1 : index
    %c0_1 = arith.constant 0 : index
    %1 = vector.load %arg7[%c1, %c0_1] : memref<8x256xf32, #tpu.memory_space<vmem>>, vector<1x256xf32>
    %c2 = arith.constant 2 : index
    %c0_2 = arith.constant 0 : index
    %2 = vector.load %arg7[%c2, %c0_2] : memref<8x256xf32, #tpu.memory_space<vmem>>, vector<1x256xf32>
    %c3 = arith.constant 3 : index
    %c0_3 = arith.constant 0 : index
    %3 = vector.load %arg7[%c3, %c0_3] : memref<8x256xf32, #tpu.memory_space<vmem>>, vector<1x256xf32>
    %c4 = arith.constant 4 : index
    %c0_4 = arith.constant 0 : index
    %4 = vector.load %arg7[%c4, %c0_4] : memref<8x256xf32, #tpu.memory_space<vmem>>, vector<1x256xf32>
    %c6 = arith.constant 6 : index
    %c0_5 = arith.constant 0 : index
    %5 = vector.load %arg7[%c6, %c0_5] : memref<8x256xf32, #tpu.memory_space<vmem>>, vector<1x1xf32>
    %c0_6 = arith.constant 0 : index
    %c0_7 = arith.constant 0 : index
    %6 = vector.load %arg0[%c0_6, %c0_7] : memref<8x64xf32, #tpu.memory_space<vmem>>, vector<8x64xf32>
    %7 = arith.truncf %6 : vector<8x64xf32> to vector<8x64xbf16>
    %c0_8 = arith.constant 0 : index
    %c0_9 = arith.constant 0 : index
    %8 = vector.load %arg1[%c0_8, %c0_9] : memref<64x128xbf16, #tpu.memory_space<vmem>>, vector<64x128xbf16>
    %cst = arith.constant dense<0.000000e+00> : vector<8x128xf32>
    %9 = tpu.matmul %7, %8, %cst {dimension_numbers = #tpu.dot_dimension_numbers<[1], [0], [0], [1], [0, 0, 1, 1], [], []>} : vector<8x64xbf16>, vector<64x128xbf16>, vector<8x128xf32> -> vector<8x128xf32>
    %10 = vector.broadcast %0 : vector<1x128xf32> to vector<8x128xf32>
    %11 = arith.addf %9, %10 : vector<8x128xf32>
    %cst_10 = arith.constant 0.000000e+00 : f32
    %12 = vector.broadcast %cst_10 : f32 to vector<8x128xf32>
    %13 = arith.maximumf %11, %12 : vector<8x128xf32>
    %14 = arith.truncf %13 : vector<8x128xf32> to vector<8x128xbf16>
    %c0_11 = arith.constant 0 : index
    %c0_12 = arith.constant 0 : index
    %15 = vector.load %arg2[%c0_11, %c0_12] : memref<128x256xbf16, #tpu.memory_space<vmem>>, vector<128x256xbf16>
    %cst_13 = arith.constant dense<0.000000e+00> : vector<8x256xf32>
    %16 = tpu.matmul %14, %15, %cst_13 {dimension_numbers = #tpu.dot_dimension_numbers<[1], [0], [0], [1], [0, 0, 1, 1], [], []>} : vector<8x128xbf16>, vector<128x256xbf16>, vector<8x256xf32> -> vector<8x256xf32>
    %17 = vector.broadcast %1 : vector<1x256xf32> to vector<8x256xf32>
    %18 = arith.addf %16, %17 : vector<8x256xf32>
    %cst_14 = arith.constant 0.000000e+00 : f32
    %19 = vector.broadcast %cst_14 : f32 to vector<8x256xf32>
    %20 = arith.maximumf %18, %19 : vector<8x256xf32>
    %21 = arith.truncf %20 : vector<8x256xf32> to vector<8x256xbf16>
    %c0_15 = arith.constant 0 : index
    %c0_16 = arith.constant 0 : index
    %22 = vector.load %arg3[%c0_15, %c0_16] : memref<256x256xbf16, #tpu.memory_space<vmem>>, vector<256x256xbf16>
    %cst_17 = arith.constant dense<0.000000e+00> : vector<8x256xf32>
    %23 = tpu.matmul %21, %22, %cst_17 {dimension_numbers = #tpu.dot_dimension_numbers<[1], [0], [0], [1], [0, 0, 1, 1], [], []>} : vector<8x256xbf16>, vector<256x256xbf16>, vector<8x256xf32> -> vector<8x256xf32>
    %24 = vector.broadcast %2 : vector<1x256xf32> to vector<8x256xf32>
    %25 = arith.addf %23, %24 : vector<8x256xf32>
    %cst_18 = arith.constant 0.000000e+00 : f32
    %26 = vector.broadcast %cst_18 : f32 to vector<8x256xf32>
    %27 = arith.maximumf %25, %26 : vector<8x256xf32>
    %28 = vector.broadcast %3 : vector<1x256xf32> to vector<8x256xf32>
    %29 = arith.mulf %27, %28 : vector<8x256xf32>
    %cst_19 = arith.constant dense<0.000000e+00> : vector<8xf32>
    %30 = vector.multi_reduction <add>, %29, %cst_19 [1] : vector<8x256xf32> to vector<8xf32>
    %31 = vector.shape_cast %30 : vector<8xf32> to vector<8x1xf32>
    %32 = vector.broadcast %5 : vector<1x1xf32> to vector<8x1xf32>
    %33 = arith.addf %31, %32 : vector<8x1xf32>
    %c0_20 = arith.constant 0 : index
    %c0_21 = arith.constant 0 : index
    %34 = vector.load %arg4[%c0_20, %c0_21] : memref<256x256xbf16, #tpu.memory_space<vmem>>, vector<256x256xbf16>
    %cst_22 = arith.constant dense<0.000000e+00> : vector<8x256xf32>
    %35 = tpu.matmul %21, %34, %cst_22 {dimension_numbers = #tpu.dot_dimension_numbers<[1], [0], [0], [1], [0, 0, 1, 1], [], []>} : vector<8x256xbf16>, vector<256x256xbf16>, vector<8x256xf32> -> vector<8x256xf32>
    %36 = vector.broadcast %4 : vector<1x256xf32> to vector<8x256xf32>
    %37 = arith.addf %35, %36 : vector<8x256xf32>
    %cst_23 = arith.constant 0.000000e+00 : f32
    %38 = vector.broadcast %cst_23 : f32 to vector<8x256xf32>
    %39 = arith.maximumf %37, %38 : vector<8x256xf32>
    %40 = arith.truncf %39 : vector<8x256xf32> to vector<8x256xbf16>
    %c0_24 = arith.constant 0 : index
    %c0_25 = arith.constant 0 : index
    %41 = vector.load %arg5[%c0_24, %c0_25] : memref<256x4096xbf16, #tpu.memory_space<vmem>>, vector<256x4096xbf16>
    %cst_26 = arith.constant dense<0.000000e+00> : vector<8x4096xf32>
    %42 = tpu.matmul %40, %41, %cst_26 {dimension_numbers = #tpu.dot_dimension_numbers<[1], [0], [0], [1], [0, 0, 1, 1], [], []>} : vector<8x256xbf16>, vector<256x4096xbf16>, vector<8x4096xf32> -> vector<8x4096xf32>
    %c0_27 = arith.constant 0 : index
    %c0_28 = arith.constant 0 : index
    %43 = vector.load %arg6[%c0_27, %c0_28] : memref<1x4096xf32, #tpu.memory_space<vmem>>, vector<1x4096xf32>
    %44 = vector.broadcast %43 : vector<1x4096xf32> to vector<8x4096xf32>
    %45 = arith.addf %42, %44 : vector<8x4096xf32>
    %cst_29 = arith.constant dense<0.000000e+00> : vector<8xf32>
    %46 = vector.multi_reduction <add>, %45, %cst_29 [1] : vector<8x4096xf32> to vector<8xf32>
    %47 = vector.shape_cast %46 : vector<8xf32> to vector<8x1xf32>
    %cst_30 = arith.constant dense<0.000000e+00> : vector<1xf32>
    %48 = vector.multi_reduction <add>, %47, %cst_30 [0] : vector<8x1xf32> to vector<1xf32>
    %49 = vector.shape_cast %48 : vector<1xf32> to vector<1x1xf32>
    %cst_31 = arith.constant 3.05175781E-5 : f32
    %50 = vector.broadcast %cst_31 : f32 to vector<1x1xf32>
    %51 = arith.mulf %49, %50 : vector<1x1xf32>
    %52 = vector.broadcast %51 : vector<1x1xf32> to vector<8x4096xf32>
    %53 = arith.subf %45, %52 : vector<8x4096xf32>
    %54 = vector.broadcast %33 : vector<8x1xf32> to vector<8x4096xf32>
    %55 = arith.addf %54, %53 : vector<8x4096xf32>
    %c0_32 = arith.constant 0 : index
    %c0_33 = arith.constant 0 : index
    %56 = vector.load %arg8[%c0_32, %c0_33] : memref<8x4096xf32, #tpu.memory_space<vmem>>, vector<8x4096xf32>
    tpu.vector_store %arg8[%c0_32, %c0_33], %55 {strides = array<i32>} : memref<8x4096xf32, #tpu.memory_space<vmem>>, vector<8x4096xf32>,
    return
  }
}

</mosaic_0001>

<bundles_post_ra>
// kernel: tpu_custom_call.1
= control target key start
LH: loop header
LB: loop body
LE: loop exit
PB: predicated region body
PF: predicated region fallthrough
CT: control target
= control target key end

     0   :  { %13 = vsyncpa [#allocation3], 0  ;;  %s8636_s0 = inlined_call_operand.hbm [shape: f32[8,64], index: 0, kind: input, shape index: {}]   ;;  %s8637_s1 = inlined_call_operand.hbm [shape: bf16[64,128], index: 1, kind: input, shape index: {}]   ;;  %s8638_s2 = inlined_call_operand.hbm [shape: bf16[128,256], index: 2, kind: input, shape index: {}]   ;;  %s8639_s3 = inlined_call_operand.hbm [shape: bf16[256,256], index: 3, kind: input, shape index: {}]   ;;  %s8640_s4 = inlined_call_operand.hbm [shape: bf16[256,256], index: 4, kind: input, shape index: {}]   ;;  %s8641_s5 = inlined_call_operand.hbm [shape: bf16[256,4096], index: 5, kind: input, shape index: {}]   ;;  %s8642_s6 = inlined_call_operand.hbm [shape: f32[1,4096], index: 6, kind: input, shape index: {}]   ;;  %s8643_s7 = inlined_call_operand.hbm [shape: f32[8,256], index: 7, kind: input, shape index: {}]   ;;  %s8644_s8 = inlined_call_operand.hbm [shape: f32[8,4096], index: 8, kind: output, shape index: {}]  }
   0x1   :  { %14 = vsyncpa [#allocation6], 0 }
   0x2   :  { %15 = vsyncpa [#allocation9], 0 }
   0x3   :  { %16 = vsyncpa [#allocation12], 0 }
   0x4   :  { %17 = vsyncpa [#allocation15], 0  ;;  %s34_s29 = sshll.u32 %s8637_s1, 4  ;;  %s35_s29 = int_to_ptr.hbm [resolvable:$true] %s34_s29 }
   0x5   :  { %18 = vsyncpa [#allocation4], 0  ;;  %s8223_s30 = smov [#allocation5]   ;;  %s8224_s10 = smov 64  }
   0x6   :  { %s36_s9 = sshll.u32 %s8223_s30, 4  ;;  %s8225_s11 = smov 4   ;;  %s37_s9 = int_to_ptr.vmem [resolvable:$true] %s36_s9 }
   0x7   :  { %42 = dma.hbm_to_vmem [thread:$0]  %s35_s29, 512, %s37_s9, [#allocation6], %s8224_s10, %s8224_s10, %s8225_s11  }
   0x8   :  { %s60_s14 = sshll.u32 %s8639_s3, 4  ;;  %s8226_s15 = smov [#allocation8]   ;;  %s61_s14 = int_to_ptr.hbm [resolvable:$true] %s60_s14 }
   0x9   :  { %s62_s16 = sshll.u32 %s8226_s15, 4  ;;  %s86_s19 = sshll.u32 %s8641_s5, 4  ;;  %s63_s16 = int_to_ptr.vmem [resolvable:$true] %s62_s16  ;;  %s87_s19 = int_to_ptr.hbm [resolvable:$true] %s86_s19 }
   0xa   :  { %s8227_s1 = smov 128   ;;  %s8228_s20 = smov 8  }
   0xb   :  { %68 = dma.hbm_to_vmem [thread:$0]  %s61_s14, 4096, %s63_s16, [#allocation9], %s8227_s1, %s8227_s1, %s8228_s20  }
   0xc   :  { %s8229_s21 = smov [#allocation11]   ;;  %s24_s3 = sshll.u32 %s8636_s0, 4  ;;  %s25_s3 = int_to_ptr.hbm [resolvable:$true] %s24_s3 }
   0xd   :  { %s88_s22 = sshll.u32 %s8229_s21, 4  ;;  %s8230_s25 = smov 2048   ;;  %s89_s22 = int_to_ptr.vmem [resolvable:$true] %s88_s22 }
   0xe   :  { %94 = dma.hbm_to_vmem [thread:$0]  %s87_s19, 65536, %s89_s22, [#allocation12], %s8230_s25, %s8230_s25, %s8227_s1  }
   0xf   :  { %s47_s27 = sshll.u32 %s8638_s2, 4  ;;  %s8231_s28 = smov [#allocation2]   ;;  %s48_s27 = int_to_ptr.hbm [resolvable:$true] %s47_s27 }
  0x10   :  { %s26_s29 = sshll.u32 %s8231_s28, 4  ;;  %s8232_s30 = smov [#allocation7]   ;;  %s27_s29 = int_to_ptr.vmem [resolvable:$true] %s26_s29 }
  0x11   :  { %29 = dma.hbm_to_vmem [thread:$0]  %s25_s3, 128, %s27_s29, [#allocation3]  }
  0x12   :  { %s49_s9 = sshll.u32 %s8232_s30, 4  ;;  %s73_s0 = sshll.u32 %s8640_s4, 4  ;;  %s50_s9 = int_to_ptr.vmem [resolvable:$true] %s49_s9  ;;  %s74_s0 = int_to_ptr.hbm [resolvable:$true] %s73_s0 }
  0x13   :  { %55 = dma.hbm_to_vmem [thread:$0]  %s48_s27, 2048, %s50_s9, [#allocation6], %s8227_s1, %s8227_s1, %s8228_s20  }
  0x14   :  { %s100_s2 = sshll.u32 %s8642_s6, 4  ;;  %s8233_s14 = smov [#allocation10]   ;;  %s101_s2 = int_to_ptr.hbm [resolvable:$true] %s100_s2 }
  0x15   :  { %s75_s15 = sshll.u32 %s8233_s14, 4  ;;  %s8234_s16 = smov [#allocation13]   ;;  %s76_s15 = int_to_ptr.vmem [resolvable:$true] %s75_s15 }
  0x16   :  { %81 = dma.hbm_to_vmem [thread:$0]  %s74_s0, 4096, %s76_s15, [#allocation9], %s8227_s1, %s8227_s1, %s8228_s20  }
  0x17   :  { %s102_s4 = sshll.u32 %s8234_s16, 4  ;;  %s111_s19 = sshll.u32 %s8643_s7, 4  ;;  %s103_s4 = int_to_ptr.vmem [resolvable:$true] %s102_s4  ;;  %s112_s19 = int_to_ptr.hbm [resolvable:$true] %s111_s19 }
  0x18   :  { %105 = dma.hbm_to_vmem [thread:$0]  %s101_s2, 512, %s103_s4, [#allocation12]  }
  0x19   :  { %s8235_s21 = smov [#allocation14]  }
  0x1a   :  { %s113_s22 = sshll.u32 %s8235_s21, 4  ;;  %s114_s22 = int_to_ptr.vmem [resolvable:$true] %s113_s22 }
  0x1b   :  { %116 = dma.hbm_to_vmem [thread:$0]  %s112_s19, 256, %s114_s22, [#allocation15]  }
  0x1c   :  { %8211 = dma.done.wait [#allocation3], 128  }
  0x1d   :  { %8212 = vsyncadd [#allocation3], 4294967168 }
  0x1e   :  { %8213 = dma.done.wait [#allocation6], 2560  }
  0x1f   :  { %8214 = vsyncadd [#allocation6], 4294964736 }
  0x20   :  { %8215 = dma.done.wait [#allocation9], 8192  }
  0x21   :  { %8216 = vsyncadd [#allocation9], 4294959104 }
  0x22   :  { %8217 = dma.done.wait [#allocation12], 66048  }
  0x23   :  { %8218 = vsyncadd [#allocation12], 4294901248 }
  0x24   :  { %8219 = dma.done.wait [#allocation15], 256  }
  0x25   :  { %8220 = vsyncadd [#allocation15], 4294967040  ;;  %v7385_v0 = vld [vmem:[#allocation5 + $0x18] sm:$0xff]  ;;  %v7384_v1 = vld [vmem:[#allocation5 + $0x10] sm:$0xff]  ;;  %vm194_vm0 = vcmask 523264   ;;  %s8237_s6 = smov [#allocation16]  }
  0x26   :  { %v5072_v2 = vld [vmem:[#allocation7 + $0x70] sm:$0xf]  ;;  %202 = vmatpush.bf16.msra.mxu0 %v7385_v0  ;;  %v7401_v3 = vld [vmem:[#allocation7 + $0x74] sm:$0xf0]  ;;  %v7400_v4 = vld [vmem:[#allocation7 + $0x74] sm:$0xf] }
  0x27   :  { %v5074_v5 = vld [vmem:[#allocation7 + $0x78] sm:$0xf0]  ;;  %v5073_v6 = vor.u32 %v7401_v3, %v5072_v2  ;;  %v5064_v8 = vld [vmem:[#allocation7 + $0x60] sm:$0xf]  ;;  %v7399_v9 = vld [vmem:[#allocation7 + $0x64] sm:$0xf0] }
  0x28   :  { %v5077_v7 = vor.u32 %v7400_v4, %v5074_v5  ;;  %v7398_v10 = vld [vmem:[#allocation7 + $0x64] sm:$0xf]  ;;  %v5066_v11 = vld [vmem:[#allocation7 + $0x68] sm:$0xf0]  ;;  %v5065_v13 = vor.u32 %v7399_v9, %v5064_v8  ;;  %v5056_v15 = vld [vmem:[#allocation7 + $0x50] sm:$0xf] }
  0x29   :  { %v7383_v12 = vld [vmem:[#allocation5 + $0x8] sm:$0xff]  ;;  %314 = vmatpush.bf16.msra.mxu1 %v5073_v6  ;;  %v5069_v14 = vor.u32 %v7398_v10, %v5066_v11  ;;  %v7397_v16 = vld [vmem:[#allocation7 + $0x54] sm:$0xf0]  ;;  %v7396_v17 = vld [vmem:[#allocation7 + $0x54] sm:$0xf]  ;;  %s4981_s7 = sshll.u32 %s8237_s6, 4  ;;  %s4982_s7 = int_to_ptr.vmem [resolvable:$true] %s4981_s7 }
  0x2a   :  { %327 = vmatpush.bf16.msra.mxu2 %v5077_v7  ;;  %203 = vmatpush.bf16.msra.mxu0 %v7384_v1  ;;  %v5058_v18 = vld [vmem:[#allocation7 + $0x58] sm:$0xf0]  ;;  %v7382_v19 = vld [vmem:[#allocation5] sm:$0xff]  ;;  %v5057_v20 = vor.u32 %v7397_v16, %v5056_v15  ;;  %v7395_v24 = vld [vmem:[#allocation7 + $0x44] sm:$0xf0]  ;;  %s4983_s23 = sshll.u32 %s8644_s8, 4  ;;  %s4984_s23 = int_to_ptr.hbm [resolvable:$true] %s4983_s23 }
  0x2b   :  { %v5061_v21 = vor.u32 %v7396_v17, %v5058_v18  ;;  %v160_v22 = vld [vmem:[#allocation2] sm:$0xff]  ;;  %v5048_v23 = vld [vmem:[#allocation7 + $0x40] sm:$0xf]  ;;  %v7394_v25 = vld [vmem:[#allocation7 + $0x44] sm:$0xf] }
  0x2c   :  { %v5050_v26 = vld [vmem:[#allocation7 + $0x48] sm:$0xf0]  ;;  %v161_v27 = vpack.c.bf16 %v160_v22, %v160_v22  ;;  %v5049_v28 = vor.u32 %v7395_v24, %v5048_v23  ;;  %v5040_v30 = vld [vmem:[#allocation7 + $0x30] sm:$0xf]  ;;  %v7393_v31 = vld [vmem:[#allocation7 + $0x34] sm:$0xf0] }
  0x2d   :  { %315 = vmatpush.bf16.msra.mxu1 %v5065_v13  ;;  %v5053_v29 = vor.u32 %v7394_v25, %v5050_v26  ;;  %v7392_v32 = vld [vmem:[#allocation7 + $0x34] sm:$0xf]  ;;  %v5042_v33 = vld [vmem:[#allocation7 + $0x38] sm:$0xf0]  ;;  %v5041_v34 = vor.u32 %v7393_v31, %v5040_v30  ;;  %v5032_v36 = vld [vmem:[#allocation7 + $0x20] sm:$0xf] }
  0x2e   :  { %328 = vmatpush.bf16.msra.mxu2 %v5069_v14  ;;  %204 = vmatpush.bf16.msra.mxu0 %v7383_v12  ;;  %v5045_v35 = vor.u32 %v7392_v32, %v5042_v33  ;;  %v7391_v37 = vld [vmem:[#allocation7 + $0x24] sm:$0xf0]  ;;  %v7390_v38 = vld [vmem:[#allocation7 + $0x24] sm:$0xf]  ;;  %v5034_v39 = vld [vmem:[#allocation7 + $0x28] sm:$0xf0] }
  0x2f   :  { %v5033_v40 = vor.u32 %v7391_v37, %v5032_v36  ;;  %v5037_v41 = vor.u32 %v7390_v38, %v5034_v39  ;;  %v5024_v42 = vld [vmem:[#allocation7 + $0x10] sm:$0xf]  ;;  %v7389_v43 = vld [vmem:[#allocation7 + $0x14] sm:$0xf0]  ;;  %v7388_v44 = vld [vmem:[#allocation7 + $0x14] sm:$0xf] }
  0x30   :  { %v5025_v45 = vor.u32 %v7389_v43, %v5024_v42  ;;  %v5026_v46 = vld [vmem:[#allocation7 + $0x18] sm:$0xf0]  ;;  %v5016_v48 = vld [vmem:[#allocation7] sm:$0xf]  ;;  %v7387_v49 = vld [vmem:[#allocation7 + $0x4] sm:$0xf0] }
  0x31   :  { %316 = vmatpush.bf16.msra.mxu1 %v5057_v20  ;;  %v5029_v47 = vor.u32 %v7388_v44, %v5026_v46  ;;  %v7386_v50 = vld [vmem:[#allocation7 + $0x4] sm:$0xf]  ;;  %v5017_v51 = vor.u32 %v7387_v49, %v5016_v48  ;;  %v5018_v52 = vld [vmem:[#allocation7 + $0x8] sm:$0xf0]  ;;  %v5136_v54 = vld [vmem:[#allocation8 + $0x70] sm:$0xf] }
  0x32   :  { %329 = vmatpush.bf16.msra.mxu2 %v5061_v21  ;;  %205 = vmatpush.bf16.msra.mxu0 %v7382_v19  ;;  %v5021_v53 = vor.u32 %v7386_v50, %v5018_v52  ;;  %v7417_v55 = vld [vmem:[#allocation8 + $0x74] sm:$0xf0]  ;;  %v7416_v56 = vld [vmem:[#allocation8 + $0x74] sm:$0xf]  ;;  %v5138_v58 = vld [vmem:[#allocation8 + $0x78] sm:$0xf0] }
  0x33   :  { %v5137_v57 = vor.u32 %v7417_v55, %v5136_v54  ;;  %v5128_v59 = vld [vmem:[#allocation8 + $0x60] sm:$0xf]  ;;  %v7415_v60 = vld [vmem:[#allocation8 + $0x64] sm:$0xf0]  ;;  %v5141_v61 = vor.u32 %v7416_v56, %v5138_v58  ;;  %v7414_v62 = vld [vmem:[#allocation8 + $0x64] sm:$0xf] }
  0x34   :  { %v5130_v63 = vld [vmem:[#allocation8 + $0x68] sm:$0xf0]  ;;  %v5200_v0 = vld [vmem:[#allocation8 + $0xf0] sm:$0xf]  ;;  %v5129_v1 = vor.u32 %v7415_v60, %v5128_v59  ;;  %v7433_v2 = vld [vmem:[#allocation8 + $0xf4] sm:$0xf0] }
  0x35   :  { %5013 = vmatmul.msk.bf16.vlgmr.msra.gmra.mxu0 %vm194_vm0, %v161_v27  ;;  %317 = vmatpush.bf16.msra.mxu1 %v5049_v28  ;;  %v7432_v3 = vld [vmem:[#allocation8 + $0xf4] sm:$0xf]  ;;  %v5202_v4 = vld [vmem:[#allocation8 + $0xf8] sm:$0xf0]  ;;  %v5133_v5 = vor.u32 %v7414_v62, %v5130_v63  ;;  %v5201_v6 = vor.u32 %v7433_v2, %v5200_v0  ;;  %v5120_v8 = vld [vmem:[#allocation8 + $0x50] sm:$0xf] }
  0x36   :  { %330 = vmatpush.bf16.msra.mxu2 %v5053_v29  ;;  %541 = vmatpush.bf16.msra.mxu3 %v5137_v57  ;;  %v5205_v7 = vor.u32 %v7432_v3, %v5202_v4  ;;  %v7413_v9 = vld [vmem:[#allocation8 + $0x54] sm:$0xf0]  ;;  %v7412_v10 = vld [vmem:[#allocation8 + $0x54] sm:$0xf]  ;;  %v5122_v11 = vld [vmem:[#allocation8 + $0x58] sm:$0xf0] }
  0x37   :  { %v5192_v12 = vld [vmem:[#allocation8 + $0xe0] sm:$0xf]  ;;  %v7431_v13 = vld [vmem:[#allocation8 + $0xe4] sm:$0xf0]  ;;  %554 = vmatpush.bf16.msrb.mxu0 %v5201_v6  ;;  %v7430_v15 = vld [vmem:[#allocation8 + $0xe4] sm:$0xf]  ;;  %v5121_v17 = vor.u32 %v7413_v9, %v5120_v8  ;;  %v5125_v21 = vor.u32 %v7412_v10, %v5122_v11 }
  0x38   :  { %v5193_v14 = vor.u32 %v7431_v13, %v5192_v12  ;;  %v5194_v16 = vld [vmem:[#allocation8 + $0xe8] sm:$0xf0]  ;;  %v5112_v19 = vld [vmem:[#allocation8 + $0x40] sm:$0xf]  ;;  %v7411_v20 = vld [vmem:[#allocation8 + $0x44] sm:$0xf0] }
  0x39   :  { %318 = vmatpush.bf16.msra.mxu1 %v5041_v34  ;;  %v5197_v18 = vor.u32 %v7430_v15, %v5194_v16  ;;  %v5184_v22 = vld [vmem:[#allocation8 + $0xd0] sm:$0xf]  ;;  %v7429_v23 = vld [vmem:[#allocation8 + $0xd4] sm:$0xf0]  ;;  %v7428_v24 = vld [vmem:[#allocation8 + $0xd4] sm:$0xf]  ;;  %v5113_v31 = vor.u32 %v7411_v20, %v5112_v19 }
  0x3a   :  { %331 = vmatpush.bf16.msra.mxu2 %v5045_v35  ;;  %542 = vmatpush.bf16.msra.mxu3 %v5129_v1  ;;  %v7410_v25 = vld [vmem:[#allocation8 + $0x44] sm:$0xf]  ;;  %v5114_v26 = vld [vmem:[#allocation8 + $0x48] sm:$0xf0]  ;;  %v5186_v27 = vld [vmem:[#allocation8 + $0xd8] sm:$0xf0]  ;;  %v5185_v28 = vor.u32 %v7429_v23, %v5184_v22 }
  0x3b   :  { %555 = vmatpush.bf16.msrb.mxu0 %v5193_v14  ;;  %v5189_v29 = vor.u32 %v7428_v24, %v5186_v27  ;;  %v5176_v30 = vld [vmem:[#allocation8 + $0xc0] sm:$0xf]  ;;  %v7427_v32 = vld [vmem:[#allocation8 + $0xc4] sm:$0xf0]  ;;  %v7426_v33 = vld [vmem:[#allocation8 + $0xc4] sm:$0xf]  ;;  %v5117_v35 = vor.u32 %v7410_v25, %v5114_v26 }
  0x3c   :  { %v5178_v34 = vld [vmem:[#allocation8 + $0xc8] sm:$0xf0]  ;;  %v5104_v36 = vld [vmem:[#allocation8 + $0x30] sm:$0xf]  ;;  %v7409_v37 = vld [vmem:[#allocation8 + $0x34] sm:$0xf0] }
  0x3d   :  { %319 = vmatpush.bf16.msra.mxu1 %v5033_v40  ;;  %v7408_v38 = vld [vmem:[#allocation8 + $0x34] sm:$0xf]  ;;  %v5106_v39 = vld [vmem:[#allocation8 + $0x38] sm:$0xf0]  ;;  %v5177_v40 = vor.u32 %v7427_v32, %v5176_v30  ;;  %v5168_v42 = vld [vmem:[#allocation8 + $0xb0] sm:$0xf]  ;;  %v5105_v43 = vor.u32 %v7409_v37, %v5104_v36 }
  0x3e   :  { %332 = vmatpush.bf16.msra.mxu2 %v5037_v41  ;;  %543 = vmatpush.bf16.msra.mxu3 %v5121_v17  ;;  %v5181_v41 = vor.u32 %v7426_v33, %v5178_v34  ;;  %v7425_v44 = vld [vmem:[#allocation8 + $0xb4] sm:$0xf0]  ;;  %v5170_v46 = vld [vmem:[#allocation8 + $0xb8] sm:$0xf0]  ;;  %v5096_v48 = vld [vmem:[#allocation8 + $0x20] sm:$0xf] }
  0x3f   :  { %556 = vmatpush.bf16.msrb.mxu0 %v5185_v28  ;;  %v7407_v49 = vld [vmem:[#allocation8 + $0x24] sm:$0xf0]  ;;  %v7406_v50 = vld [vmem:[#allocation8 + $0x24] sm:$0xf]  ;;  %v5169_v52 = vor.u32 %v7425_v44, %v5168_v42  ;;  %v5160_v54 = vld [vmem:[#allocation8 + $0xa0] sm:$0xf] }
  0x40   :  { %v5097_v55 = vor.u32 %v7407_v49, %v5096_v48  ;;  %v7423_v56 = vld [vmem:[#allocation8 + $0xa4] sm:$0xf0]  ;;  %v7422_v57 = vld [vmem:[#allocation8 + $0xa4] sm:$0xf]  ;;  %v5162_v58 = vld [vmem:[#allocation8 + $0xa8] sm:$0xf0] }
  0x41   :  { %320 = vmatpush.bf16.msra.mxu1 %v5025_v45  ;;  %v7424_v45 = vld [vmem:[#allocation8 + $0xb4] sm:$0xf]  ;;  %v5088_v60 = vld [vmem:[#allocation8 + $0x10] sm:$0xf]  ;;  %v5090_v63 = vld [vmem:[#allocation8 + $0x18] sm:$0xf0]  ;;  %v5161_v1 = vor.u32 %v7423_v56, %v5160_v54  ;;  %v5165_v2 = vor.u32 %v7422_v57, %v5162_v58 }
  0x42   :  { %333 = vmatpush.bf16.msra.mxu2 %v5029_v47  ;;  %544 = vmatpush.bf16.msra.mxu3 %v5113_v31  ;;  %v5109_v47 = vor.u32 %v7408_v38, %v5106_v39  ;;  %v7404_v62 = vld [vmem:[#allocation8 + $0x14] sm:$0xf]  ;;  %v150_v0 = vld [vmem:[#allocation14] ss:$0 sm:$0xff]  ;;  %v5152_v3 = vld [vmem:[#allocation8 + $0x90] sm:$0xf] }
  0x43   :  { %557 = vmatpush.bf16.msrb.mxu0 %v5177_v40  ;;  %v7403_v6 = vld [vmem:[#allocation8 + $0x4] sm:$0xf0]  ;;  %v7420_v8 = vld [vmem:[#allocation8 + $0x94] sm:$0xf]  ;;  %v5154_v9 = vld [vmem:[#allocation8 + $0x98] sm:$0xf0]  ;;  %v5093_v11 = vor.u32 %v7404_v62, %v5090_v63 }
  0x44   :  { %v7402_v12 = vld [vmem:[#allocation8 + $0x4] sm:$0xf]  ;;  %v5082_v13 = vld [vmem:[#allocation8 + $0x8] sm:$0xf0]  ;;  %v5264_v14 = vld [vmem:[#allocation10 + $0x70] sm:$0xf]  ;;  %v5157_v20 = vor.u32 %v7420_v8, %v5154_v9 }
  0x45   :  { %321 = vmatpush.bf16.msra.mxu1 %v5017_v51  ;;  %v5098_v51 = vld [vmem:[#allocation8 + $0x28] sm:$0xf0]  ;;  %v7449_v16 = vld [vmem:[#allocation10 + $0x74] sm:$0xf0]  ;;  %v7448_v17 = vld [vmem:[#allocation10 + $0x74] sm:$0xf]  ;;  %v5085_v28 = vor.u32 %v7402_v12, %v5082_v13 }
  0x46   :  { %334 = vmatpush.bf16.msra.mxu2 %v5021_v53  ;;  %v5173_v53 = vor.u32 %v7424_v45, %v5170_v46  ;;  %545 = vmatpush.bf16.msra.mxu3 %v5105_v43  ;;  %v5101_v59 = vor.u32 %v7406_v50, %v5098_v51  ;;  %v7419_v22 = vld [vmem:[#allocation8 + $0x84] sm:$0xf0]  ;;  %v7418_v23 = vld [vmem:[#allocation8 + $0x84] sm:$0xf]  ;;  %v5146_v25 = vld [vmem:[#allocation8 + $0x88] sm:$0xf0]  ;;  %v5265_v33 = vor.u32 %v7449_v16, %v5264_v14 }
  0x47   :  { %558 = vmatpush.bf16.msrb.mxu0 %v5169_v52  ;;  %v5328_v26 = vld [vmem:[#allocation10 + $0xf0] sm:$0xf]  ;;  %v7464_v30 = vld [vmem:[#allocation10 + $0xf4] sm:$0xf]  ;;  %v5330_v31 = vld [vmem:[#allocation10 + $0xf8] sm:$0xf0]  ;;  %v5149_v40 = vor.u32 %v7418_v23, %v5146_v25 }
  0x48   :  { %v7447_v36 = vld [vmem:[#allocation10 + $0x64] sm:$0xf0]  ;;  %v7446_v37 = vld [vmem:[#allocation10 + $0x64] sm:$0xf]  ;;  %v5258_v38 = vld [vmem:[#allocation10 + $0x68] sm:$0xf0]  ;;  %v5333_v42 = vor.u32 %v7464_v30, %v5330_v31 }
  0x49   :  { %567 = vmatpush.bf16.msrb.mxu1 %v5141_v61  ;;  %v7405_v61 = vld [vmem:[#allocation8 + $0x14] sm:$0xf0]  ;;  %v5261_v45 = vor.u32 %v7446_v37, %v5258_v38  ;;  %v5248_v46 = vld [vmem:[#allocation10 + $0x50] sm:$0xf]  ;;  %v7444_v48 = vld [vmem:[#allocation10 + $0x54] sm:$0xf] }
  0x4a   :  { %580 = vmatpush.bf16.msrb.mxu2 %v5205_v7  ;;  %546 = vmatpush.bf16.msra.mxu3 %v5097_v55  ;;  %v5089_v4 = vor.u32 %v7405_v61, %v5088_v60  ;;  %v7421_v7 = vld [vmem:[#allocation8 + $0x94] sm:$0xf0]  ;;  %v5250_v50 = vld [vmem:[#allocation10 + $0x58] sm:$0xf0]  ;;  %v5320_v52 = vld [vmem:[#allocation10 + $0xe0] sm:$0xf] }
  0x4b   :  { %559 = vmatpush.bf16.msrb.mxu0 %v5161_v1  ;;  %v5153_v19 = vor.u32 %v7421_v7, %v5152_v3  ;;  %v5253_v51 = vor.u32 %v7444_v48, %v5250_v50  ;;  %v7462_v54 = vld [vmem:[#allocation10 + $0xe4] sm:$0xf]  ;;  %v5322_v56 = vld [vmem:[#allocation10 + $0xe8] sm:$0xf0]  ;;  %v5240_v58 = vld [vmem:[#allocation10 + $0x40] sm:$0xf] }
  0x4c   :  { %v5325_v57 = vor.u32 %v7462_v54, %v5322_v56  ;;  %v7442_v60 = vld [vmem:[#allocation10 + $0x44] sm:$0xf]  ;;  %v5242_v62 = vld [vmem:[#allocation10 + $0x48] sm:$0xf0]  ;;  %v7461_v1 = vld [vmem:[#allocation10 + $0xd4] sm:$0xf0] }
  0x4d   :  { %568 = vmatpush.bf16.msrb.mxu1 %v5133_v5  ;;  %v5080_v5 = vld [vmem:[#allocation8] sm:$0xf]  ;;  %v5245_v63 = vor.u32 %v7442_v60, %v5242_v62  ;;  %v7441_v7 = vld [vmem:[#allocation10 + $0x34] sm:$0xf0]  ;;  %v7440_v9 = vld [vmem:[#allocation10 + $0x34] sm:$0xf] }
  0x4e   :  { %581 = vmatpush.bf16.msrb.mxu2 %v5197_v18  ;;  %v5266_v18 = vld [vmem:[#allocation10 + $0x78] sm:$0xf0]  ;;  %547 = vmatpush.bf16.msra.mxu3 %v5089_v4  ;;  %v5081_v27 = vor.u32 %v7403_v6, %v5080_v5  ;;  %v5232_v6 = vld [vmem:[#allocation10 + $0x30] sm:$0xf]  ;;  %v5304_v12 = vld [vmem:[#allocation10 + $0xc0] sm:$0xf] }
  0x4f   :  { %v5269_v34 = vor.u32 %v7448_v17, %v5266_v18  ;;  %560 = vmatpush.bf16.msrb.mxu0 %v5153_v19  ;;  %v5314_v4 = vld [vmem:[#allocation10 + $0xd8] sm:$0xf0]  ;;  %v5233_v8 = vor.u32 %v7441_v7, %v5232_v6  ;;  %v7459_v13 = vld [vmem:[#allocation10 + $0xc4] sm:$0xf0]  ;;  %v7458_v14 = vld [vmem:[#allocation10 + $0xc4] sm:$0xf] }
  0x50   :  { %v5306_v16 = vld [vmem:[#allocation10 + $0xc8] sm:$0xf0]  ;;  %v5224_v18 = vld [vmem:[#allocation10 + $0x20] sm:$0xf]  ;;  %v7439_v19 = vld [vmem:[#allocation10 + $0x24] sm:$0xf0] }
  0x51   :  { %569 = vmatpush.bf16.msrb.mxu1 %v5125_v21  ;;  %v5144_v21 = vld [vmem:[#allocation8 + $0x80] sm:$0xf]  ;;  %v5309_v17 = vor.u32 %v7458_v14, %v5306_v16  ;;  %v7457_v25 = vld [vmem:[#allocation10 + $0xb4] sm:$0xf0]  ;;  %v5216_v30 = vld [vmem:[#allocation10 + $0x10] sm:$0xf] }
  0x52   :  { %582 = vmatpush.bf16.msrb.mxu2 %v5189_v29  ;;  %v7465_v29 = vld [vmem:[#allocation10 + $0xf4] sm:$0xf0]  ;;  %v5145_v39 = vor.u32 %v7419_v22, %v5144_v21  ;;  %548 = vmatpush.bf16.msra.mxu3 %v5081_v27  ;;  %v5225_v21 = vor.u32 %v7439_v19, %v5224_v18  ;;  %v5226_v22 = vld [vmem:[#allocation10 + $0x28] sm:$0xf0]  ;;  %v5280_v48 = vld [vmem:[#allocation10 + $0x90] sm:$0xf] }
  0x53   :  { %v7437_v31 = vld [vmem:[#allocation10 + $0x14] sm:$0xf0]  ;;  %v7452_v50 = vld [vmem:[#allocation10 + $0x94] sm:$0xf]  ;;  %v5272_v54 = vld [vmem:[#allocation10 + $0x80] sm:$0xf] }
  0x54   :  { %561 = vmatpush.bf16.msrb.mxu0 %v5145_v39  ;;  %v7454_v39 = vld [vmem:[#allocation10 + $0xa4] sm:$0xf]  ;;  %v152_v60 = vld [vmem:[#allocation14 + $0x1] ss:$8 sm:$0x3] }
  0x55   :  { %570 = vmatpush.bf16.msrb.mxu1 %v5117_v35  ;;  %v5256_v35 = vld [vmem:[#allocation10 + $0x60] sm:$0xf]  ;;  %v7450_v56 = vld [vmem:[#allocation10 + $0x84] sm:$0xf] }
  0x56   :  { %583 = vmatpush.bf16.msrb.mxu2 %v5181_v41  ;;  %v5329_v41 = vor.u32 %v7465_v29, %v5328_v26  ;;  %803 = vmatpush.bf16.msrb.mxu3 %v5265_v33  ;;  %v5257_v44 = vor.u32 %v7447_v36, %v5256_v35  ;;  %v7456_v26 = vld [vmem:[#allocation10 + $0xb4] sm:$0xf]  ;;  %v5217_v33 = vor.u32 %v7437_v31, %v5216_v30  ;;  %v5288_v35 = vld [vmem:[#allocation10 + $0xa0] sm:$0xf]  ;;  %v7455_v36 = vld [vmem:[#allocation10 + $0xa4] sm:$0xf0] }
  0x57   :  { %v5289_v38 = vor.u32 %v7455_v36, %v5288_v35  ;;  %v7256_v14 = vld [vmem:[#allocation11 + $0xf00] sm:$0xf]  ;;  %v7258_v18 = vld [vmem:[#allocation11 + $0xf80] sm:$0xf0] }
  0x58   :  { %816 = vmatpush.bf16.msra.mxu0 %v5329_v41  ;;  %v5208_v41 = vld [vmem:[#allocation10] sm:$0xf] }
  0x59   :  { %571 = vmatpush.bf16.msrb.mxu1 %v5109_v47  ;;  %v7445_v47 = vld [vmem:[#allocation10 + $0x54] sm:$0xf0]  ;;  %v7962_v16 = vld [vmem:[#allocation11 + $0xf7c] sm:$0xf0] }
  0x5a   :  { %584 = vmatpush.bf16.msrb.mxu2 %v5173_v53  ;;  %804 = vmatpush.bf16.msrb.mxu3 %v5257_v44  ;;  %v5249_v49 = vor.u32 %v7445_v47, %v5248_v46  ;;  %v7463_v53 = vld [vmem:[#allocation10 + $0xe4] sm:$0xf0]  ;;  %v7434_v44 = vld [vmem:[#allocation10 + $0x4] sm:$0xf]  ;;  %v7930_v31 = vld [vmem:[#allocation11 + $0xe7c] sm:$0xf0] }
  0x5b   :  { %v5321_v55 = vor.u32 %v7463_v53, %v5320_v52  ;;  %v5282_v52 = vld [vmem:[#allocation10 + $0x98] sm:$0xf0]  ;;  %v5848_v36 = vld [vmem:[#allocation11 + $0x400] sm:$0xf] }
  0x5c   :  { %v5285_v53 = vor.u32 %v7452_v50, %v5282_v52  ;;  %v7578_v50 = vld [vmem:[#allocation11 + $0x37c] sm:$0xf0]  ;;  %v5722_v52 = vld [vmem:[#allocation11 + $0x380] sm:$0xf0] }
  0x5d   :  { %572 = vmatpush.bf16.msrb.mxu1 %v5101_v59  ;;  %v7443_v59 = vld [vmem:[#allocation10 + $0x44] sm:$0xf0]  ;;  %817 = vmatpush.bf16.msra.mxu0 %v5321_v55 }
  0x5e   :  { %585 = vmatpush.bf16.msrb.mxu2 %v5165_v2  ;;  %805 = vmatpush.bf16.msrb.mxu3 %v5249_v49  ;;  %v5241_v61 = vor.u32 %v7443_v59, %v5240_v58  ;;  %v7460_v2 = vld [vmem:[#allocation10 + $0xd4] sm:$0xf]  ;;  %v7453_v49 = vld [vmem:[#allocation10 + $0x94] sm:$0xf0]  ;;  %v7451_v55 = vld [vmem:[#allocation10 + $0x84] sm:$0xf0] }
  0x5f   :  { %v5317_v5 = vor.u32 %v7460_v2, %v5314_v4  ;;  %v5274_v58 = vld [vmem:[#allocation10 + $0x88] sm:$0xf0]  ;;  %v7690_v2 = vld [vmem:[#allocation11 + $0x704] sm:$0xf] }
  0x60   :  { %v5277_v59 = vor.u32 %v7450_v56, %v5274_v58  ;;  %v7866_v56 = vld [vmem:[#allocation11 + $0xc7c] sm:$0xf0]  ;;  %v6874_v58 = vld [vmem:[#allocation11 + $0xc80] sm:$0xf0] }
  0x61   :  { %573 = vmatpush.bf16.msrb.mxu1 %v5093_v11 }
  0x62   :  { %586 = vmatpush.bf16.msrb.mxu2 %v5157_v20  ;;  %806 = vmatpush.bf16.msrb.mxu3 %v5241_v61  ;;  %v7438_v20 = vld [vmem:[#allocation10 + $0x24] sm:$0xf]  ;;  %v230_v61 = vperm.slane %v152_v60, 0 }
  0x63   :  { %v5229_v23 = vor.u32 %v7438_v20, %v5226_v22  ;;  %v5976_v22 = vld [vmem:[#allocation11 + $0x500] sm:$0xf] }
  0x65   :  { %574 = vmatpush.bf16.msrb.mxu1 %v5085_v28  ;;  %v5298_v28 = vld [vmem:[#allocation10 + $0xb8] sm:$0xf0] }
  0x66   :  { %587 = vmatpush.bf16.msrb.mxu2 %v5149_v40  ;;  %807 = vmatpush.bf16.msrb.mxu3 %v5233_v8  ;;  %v5301_v29 = vor.u32 %v7456_v26, %v5298_v28  ;;  %v5290_v40 = vld [vmem:[#allocation10 + $0xa8] sm:$0xf0]  ;;  %v6104_v8 = vld [vmem:[#allocation11 + $0x600] sm:$0xf]  ;;  %v5978_v26 = vld [vmem:[#allocation11 + $0x580] sm:$0xf0] }
  0x6a   :  { %808 = vmatpush.bf16.msrb.mxu3 %v5225_v21 }
  0x6e   :  { %809 = vmatpush.bf16.msrb.mxu3 %v5217_v33  ;;  %v7130_v33 = vld [vmem:[#allocation11 + $0xe80] sm:$0xf0] }
  0xb2   :  { %v207_v10 = vpop.f32.mrf.mxu0 }
  0xb3   :  { %v208_v15 = vadd.f32 %v207_v10, %v150_v0  ;;  %v5312_v0 = vld [vmem:[#allocation10 + $0xd0] sm:$0xf]  ;;  %v5234_v10 = vld [vmem:[#allocation10 + $0x38] sm:$0xf0] }
  0xb4   :  { %v5313_v3 = vor.u32 %v7461_v1, %v5312_v0  ;;  %v5237_v11 = vor.u32 %v7440_v9, %v5234_v10  ;;  %v7706_v1 = vld [vmem:[#allocation11 + $0x77c] sm:$0xf0] }
  0xb5   :  { %v211_v24 = vmax.f32 %v208_v15, 0.0  ;;  %v5305_v15 = vor.u32 %v7459_v13, %v5304_v12  ;;  %v7674_v10 = vld [vmem:[#allocation11 + $0x67c] sm:$0xf0]  ;;  %v6106_v12 = vld [vmem:[#allocation11 + $0x680] sm:$0xf0] }
  0xb6   :  { %818 = vmatpush.bf16.msra.mxu0 %v5313_v3  ;;  %v6234_v3 = vld [vmem:[#allocation11 + $0x780] sm:$0xf0]  ;;  %v6105_v20 = vor.u32 %v7674_v10, %v6104_v8  ;;  %v5464_v10 = vld [vmem:[#allocation11 + $0x100] sm:$0xf] }
  0xb7   :  { %v212_v32 = vpack.c.bf16 %v211_v24, %v211_v24  ;;  %v5296_v24 = vld [vmem:[#allocation10 + $0xb0] sm:$0xf]  ;;  %v6237_v7 = vor.u32 %v7690_v2, %v6234_v3  ;;  %v6744_v3 = vld [vmem:[#allocation11 + $0xb00] sm:$0xf] }
  0xb8   :  { %v5297_v27 = vor.u32 %v7457_v25, %v5296_v24  ;;  %v7626_v25 = vld [vmem:[#allocation11 + $0x504] sm:$0xf] }
  0xb9   :  { %322 = vmatmul.bf16.vlgmr.msra.gmra.mxu1 %v212_v32  ;;  %335 = vmatmul.bf16.vlgmr.msra.gmra.mxu2 %v212_v32  ;;  %v7436_v32 = vld [vmem:[#allocation10 + $0x14] sm:$0xf]  ;;  %v5981_v35 = vor.u32 %v7626_v25, %v5978_v26  ;;  %v6488_v25 = vld [vmem:[#allocation11 + $0x900] sm:$0xf] }
  0xba   :  { %v209_v43 = vpop.f32.mrf.mxu0  ;;  %829 = vmatpush.bf16.msra.mxu1 %v5269_v34  ;;  %842 = vmatpush.bf16.msra.mxu2 %v5333_v42  ;;  %v5218_v34 = vld [vmem:[#allocation10 + $0x18] sm:$0xf0]  ;;  %v5293_v42 = vor.u32 %v7454_v39, %v5290_v40  ;;  %v5850_v39 = vld [vmem:[#allocation11 + $0x480] sm:$0xf0] }
  0xbb   :  { %819 = vmatpush.bf16.msra.mxu0 %v5305_v15  ;;  %v5221_v37 = vor.u32 %v7436_v32, %v5218_v34  ;;  %v7435_v43 = vld [vmem:[#allocation10 + $0x4] sm:$0xf0]  ;;  %v7914_v32 = vld [vmem:[#allocation11 + $0xe04] sm:$0xf] }
  0xbc   :  { %v5209_v46 = vor.u32 %v7435_v43, %v5208_v41  ;;  %v7000_v43 = vld [vmem:[#allocation11 + $0xd00] sm:$0xf] }
  0xbe   :  { %830 = vmatpush.bf16.msra.mxu1 %v5261_v45  ;;  %843 = vmatpush.bf16.msra.mxu2 %v5325_v57  ;;  %v5210_v45 = vld [vmem:[#allocation10 + $0x8] sm:$0xf0]  ;;  %v5273_v57 = vor.u32 %v7451_v55, %v5272_v54  ;;  %v6872_v55 = vld [vmem:[#allocation11 + $0xc00] sm:$0xf] }
  0xbf   :  { %820 = vmatpush.bf16.msra.mxu0 %v5297_v27  ;;  %v5213_v47 = vor.u32 %v7434_v44, %v5210_v45  ;;  %810 = vmatpush.bf16.msrb.mxu3 %v5209_v46  ;;  %v7257_v27 = vor.u32 %v7962_v16, %v7256_v14  ;;  %v7898_v44 = vld [vmem:[#allocation11 + $0xd7c] sm:$0xf0]  ;;  %v7882_v45 = vld [vmem:[#allocation11 + $0xd04] sm:$0xf] }
  0xc0   :  { %v7002_v46 = vld [vmem:[#allocation11 + $0xd80] sm:$0xf0]  ;;  %v6616_v16 = vld [vmem:[#allocation11 + $0xa00] sm:$0xf] }
  0xc1   :  { %v7005_v54 = vor.u32 %v7882_v45, %v7002_v46  ;;  %v6362_v45 = vld [vmem:[#allocation11 + $0x880] sm:$0xf0]  ;;  %v6112_v46 = vld [vmem:[#allocation11 + $0x608] sm:$0xf] }
  0xc2   :  { %831 = vmatpush.bf16.msra.mxu1 %v5253_v51  ;;  %844 = vmatpush.bf16.msra.mxu2 %v5317_v5  ;;  %v5281_v51 = vor.u32 %v7453_v49, %v5280_v48  ;;  %v231_v5 = vperm.slane %v152_v60, 1  ;;  %v5720_v49 = vld [vmem:[#allocation11 + $0x300] sm:$0xf] }
  0xc3   :  { %821 = vmatpush.bf16.msra.mxu0 %v5289_v38  ;;  %v7594_v38 = vld [vmem:[#allocation11 + $0x404] sm:$0xf] }
  0xc4   :  { %v5853_v48 = vor.u32 %v7594_v38, %v5850_v39  ;;  %v6242_v38 = vld [vmem:[#allocation11 + $0x788] sm:$0xf0] }
  0xc6   :  { %832 = vmatpush.bf16.msra.mxu1 %v5245_v63  ;;  %845 = vmatpush.bf16.msra.mxu2 %v5309_v17  ;;  %v6232_v63 = vld [vmem:[#allocation11 + $0x700] sm:$0xf]  ;;  %v7946_v17 = vld [vmem:[#allocation11 + $0xf04] sm:$0xf] }
  0xc7   :  { %822 = vmatpush.bf16.msra.mxu0 %v5281_v51  ;;  %v6233_v6 = vor.u32 %v7706_v1, %v6232_v63  ;;  %v7261_v28 = vor.u32 %v7946_v17, %v7258_v18  ;;  %v7562_v51 = vld [vmem:[#allocation11 + $0x304] sm:$0xf]  ;;  %v6873_v1 = vor.u32 %v7866_v56, %v6872_v55  ;;  %v7802_v17 = vld [vmem:[#allocation11 + $0xa7c] sm:$0xf0]  ;;  %v7947_v55 = vld [vmem:[#allocation11 + $0xf0c] sm:$0xf] }
  0xc8   :  { %v5725_v60 = vor.u32 %v7562_v51, %v5722_v52  ;;  %v7530_v63 = vld [vmem:[#allocation11 + $0x204] sm:$0xf] }
  0xc9   :  { %v7786_v18 = vld [vmem:[#allocation11 + $0xa04] sm:$0xf] }
  0xca   :  { %833 = vmatpush.bf16.msra.mxu1 %v5237_v11  ;;  %846 = vmatpush.bf16.msra.mxu2 %v5301_v29  ;;  %v7658_v11 = vld [vmem:[#allocation11 + $0x604] sm:$0xf]  ;;  %v7128_v29 = vld [vmem:[#allocation11 + $0xe00] sm:$0xf] }
  0xcb   :  { %823 = vmatpush.bf16.msra.mxu0 %v5273_v57  ;;  %v6109_v21 = vor.u32 %v7658_v11, %v6106_v12  ;;  %v7129_v41 = vor.u32 %v7930_v31, %v7128_v29  ;;  %v7850_v57 = vld [vmem:[#allocation11 + $0xc04] sm:$0xf]  ;;  %v7514_v11 = vld [vmem:[#allocation11 + $0x17c] sm:$0xf0] }
  0xcc   :  { %v6877_v2 = vor.u32 %v7850_v57, %v6874_v58  ;;  %v7498_v12 = vld [vmem:[#allocation11 + $0x104] sm:$0xf]  ;;  %v7266_v57 = vld [vmem:[#allocation11 + $0xf88] sm:$0xf0] }
  0xcd   :  { %v5338_v29 = vld [vmem:[#allocation11 + $0x80] sm:$0xf0]  ;;  %v7269_v58 = vor.u32 %v7947_v55, %v7266_v57  ;;  %v5344_v55 = vld [vmem:[#allocation11 + $0x8] sm:$0xf] }
  0xce   :  { %834 = vmatpush.bf16.msra.mxu1 %v5229_v23  ;;  %847 = vmatpush.bf16.msra.mxu2 %v5293_v42  ;;  %v7642_v23 = vld [vmem:[#allocation11 + $0x57c] sm:$0xf0]  ;;  %v7133_v42 = vor.u32 %v7914_v32, %v7130_v33  ;;  %v7754_v33 = vld [vmem:[#allocation11 + $0x904] sm:$0xf]  ;;  %v6496_v57 = vld [vmem:[#allocation11 + $0x908] sm:$0xf] }
  0xcf   :  { %v5977_v34 = vor.u32 %v7642_v23, %v5976_v22  ;;  %v5336_v23 = vld [vmem:[#allocation11] sm:$0xf] }
  0xd2   :  { %835 = vmatpush.bf16.msra.mxu1 %v5221_v37  ;;  %848 = vmatpush.bf16.msra.mxu2 %v5285_v53  ;;  %v7610_v37 = vld [vmem:[#allocation11 + $0x47c] sm:$0xf0]  ;;  %v7001_v53 = vor.u32 %v7898_v44, %v7000_v43  ;;  %v7722_v43 = vld [vmem:[#allocation11 + $0x804] sm:$0xf] }
  0xd6   :  { %836 = vmatpush.bf16.msra.mxu1 %v5213_v47  ;;  %849 = vmatpush.bf16.msra.mxu2 %v5277_v59  ;;  %v5849_v47 = vor.u32 %v7610_v37, %v5848_v36  ;;  %v5721_v59 = vor.u32 %v7578_v50, %v5720_v49  ;;  %v7707_v36 = vld [vmem:[#allocation11 + $0x784] sm:$0xf0]  ;;  %v7691_v37 = vld [vmem:[#allocation11 + $0x70c] sm:$0xf] }
  0xd7   :  { %v7264_v49 = vld [vmem:[#allocation11 + $0xf08] sm:$0xf] }
  0xd8   :  { %v7963_v50 = vld [vmem:[#allocation11 + $0xf84] sm:$0xf0] }
  0xd9   :  { %v7265_v52 = vor.u32 %v7963_v50, %v7264_v49  ;;  %v5474_v49 = vld [vmem:[#allocation11 + $0x188] sm:$0xf0] }
 0x136   :  { %v323_v62 = vpop.f32.mrf.mxu1 }
 0x137   :  { %v324_v0 = vadd.f32 %v323_v62, %v230_v61  ;;  %v5592_v61 = vld [vmem:[#allocation11 + $0x200] sm:$0xf] }
 0x138   :  { %v7546_v62 = vld [vmem:[#allocation11 + $0x27c] sm:$0xf0] }
 0x139   :  { %v340_v4 = vmax.f32 %v324_v0, 0.0  ;;  %v5594_v0 = vld [vmem:[#allocation11 + $0x280] sm:$0xf0] }
 0x13a   :  { %v5597_v8 = vor.u32 %v7530_v63, %v5594_v0  ;;  %v7931_v63 = vld [vmem:[#allocation11 + $0xe84] sm:$0xf0]  ;;  %v7627_v0 = vld [vmem:[#allocation11 + $0x50c] sm:$0xf] }
 0x13b   :  { %v8317_v9 = vpack.c.bf16 %v340_v4, %v340_v4  ;;  %v7834_v4 = vld [vmem:[#allocation11 + $0xb7c] sm:$0xf0] }
 0x13c   :  { %v336_v13 = vpop.f32.mrf.mxu2  ;;  %v6745_v14 = vor.u32 %v7834_v4, %v6744_v3  ;;  %v7915_v4 = vld [vmem:[#allocation11 + $0xe0c] sm:$0xf] }
 0x13d   :  { %v337_v15 = vadd.f32 %v336_v13, %v231_v5  ;;  %549 = vmatmul.bf16.vlgmr.msra.gmra.mxu3 %v8317_v9  ;;  %575 = vmatmul.bf16.vlgmr.msrb.gmra.mxu1 %v8317_v9  ;;  %v7818_v5 = vld [vmem:[#allocation11 + $0xb04] sm:$0xf] }
 0x13e   :  { %v325_v19 = vpop.f32.mrf.mxu1  ;;  %4003 = vmatpush.bf16.msra.mxu3 %v6233_v6  ;;  %4029 = vmatpush.bf16.msrb.mxu1 %v6237_v7  ;;  %v6746_v6 = vld [vmem:[#allocation11 + $0xb80] sm:$0xf0]  ;;  %v5593_v7 = vor.u32 %v7546_v62, %v5592_v61  ;;  %v7136_v61 = vld [vmem:[#allocation11 + $0xe08] sm:$0xf] }
 0x13f   :  { %v341_v24 = vmax.f32 %v337_v15, 0.0  ;;  %v5466_v13 = vld [vmem:[#allocation11 + $0x180] sm:$0xf0]  ;;  %v6749_v15 = vor.u32 %v7818_v5, %v6746_v6  ;;  %v7138_v5 = vld [vmem:[#allocation11 + $0xe88] sm:$0xf0] }
 0x140   :  { %v6618_v19 = vld [vmem:[#allocation11 + $0xa80] sm:$0xf0]  ;;  %v7141_v6 = vor.u32 %v7915_v4, %v7138_v5  ;;  %v6368_v4 = vld [vmem:[#allocation11 + $0x808] sm:$0xf] }
 0x141   :  { %v8321_v30 = vpack.c.bf16 %v341_v24, %v341_v24  ;;  %v6621_v22 = vor.u32 %v7786_v18, %v6618_v19  ;;  %v7482_v24 = vld [vmem:[#allocation11 + $0x7c] sm:$0xf0]  ;;  %v7010_v18 = vld [vmem:[#allocation11 + $0xd88] sm:$0xf0]  ;;  %v7739_v5 = vld [vmem:[#allocation11 + $0x884] sm:$0xf0] }
 0x142   :  { %4004 = vmatpush.bf16.msra.mxu3 %v6105_v20  ;;  %4030 = vmatpush.bf16.msrb.mxu1 %v6109_v21  ;;  %v5469_v20 = vor.u32 %v7498_v12, %v5466_v13  ;;  %v6617_v21 = vor.u32 %v7802_v17, %v6616_v16  ;;  %v5337_v26 = vor.u32 %v7482_v24, %v5336_v23  ;;  %v7899_v12 = vld [vmem:[#allocation11 + $0xd84] sm:$0xf0]  ;;  %v7595_v13 = vld [vmem:[#allocation11 + $0x40c] sm:$0xf] }
 0x143   :  { %562 = vmatmul.bf16.vlgmr.msrb.gmra.mxu0 %v8321_v30  ;;  %588 = vmatmul.bf16.vlgmr.msrb.gmra.mxu2 %v8321_v30  ;;  %v7883_v17 = vld [vmem:[#allocation11 + $0xd0c] sm:$0xf]  ;;  %v7867_v23 = vld [vmem:[#allocation11 + $0xc84] sm:$0xf0] }
 0x144   :  { %v338_v40 = vpop.f32.mrf.mxu2  ;;  %4016 = vmatpush.bf16.msrb.mxu0 %v7257_v27  ;;  %4042 = vmatpush.bf16.msrb.mxu2 %v7261_v28  ;;  %v7770_v27 = vld [vmem:[#allocation11 + $0x97c] sm:$0xf0]  ;;  %v7466_v28 = vld [vmem:[#allocation11 + $0x4] sm:$0xf]  ;;  %v7013_v19 = vor.u32 %v7883_v17, %v7010_v18  ;;  %v7563_v24 = vld [vmem:[#allocation11 + $0x30c] sm:$0xf] }
 0x145   :  { %v6489_v31 = vor.u32 %v7770_v27, %v6488_v25  ;;  %v5341_v32 = vor.u32 %v7466_v28, %v5338_v29  ;;  %v6245_v40 = vor.u32 %v7691_v37, %v6242_v38  ;;  %v7851_v27 = vld [vmem:[#allocation11 + $0xc0c] sm:$0xf] }
 0x146   :  { %4005 = vmatpush.bf16.msra.mxu3 %v5977_v34  ;;  %4031 = vmatpush.bf16.msrb.mxu1 %v5981_v35  ;;  %v6490_v34 = vld [vmem:[#allocation11 + $0x980] sm:$0xf0]  ;;  %v6882_v28 = vld [vmem:[#allocation11 + $0xc88] sm:$0xf0] }
 0x147   :  { %v6493_v35 = vor.u32 %v7754_v33, %v6490_v34  ;;  %v7547_v33 = vld [vmem:[#allocation11 + $0x284] sm:$0xf0]  ;;  %v5602_v37 = vld [vmem:[#allocation11 + $0x288] sm:$0xf0] }
 0x148   :  { %4017 = vmatpush.bf16.msrb.mxu0 %v7129_v41  ;;  %4043 = vmatpush.bf16.msrb.mxu2 %v7133_v42  ;;  %v6360_v41 = vld [vmem:[#allocation11 + $0x800] sm:$0xf]  ;;  %v6752_v34 = vld [vmem:[#allocation11 + $0xb08] sm:$0xf] }
 0x149   :  { %v7738_v42 = vld [vmem:[#allocation11 + $0x87c] sm:$0xf0] }
 0x14a   :  { %4006 = vmatpush.bf16.msra.mxu3 %v5849_v47  ;;  %4032 = vmatpush.bf16.msrb.mxu1 %v5853_v48  ;;  %v6361_v44 = vor.u32 %v7738_v42, %v6360_v41  ;;  %v6365_v47 = vor.u32 %v7722_v43, %v6362_v45  ;;  %v7675_v48 = vld [vmem:[#allocation11 + $0x684] sm:$0xf0]  ;;  %v6754_v41 = vld [vmem:[#allocation11 + $0xb88] sm:$0xf0] }
 0x14b   :  { %v6113_v51 = vor.u32 %v7675_v48, %v6112_v46  ;;  %v5472_v43 = vld [vmem:[#allocation11 + $0x108] sm:$0xf]  ;;  %v7499_v48 = vld [vmem:[#allocation11 + $0x10c] sm:$0xf] }
 0x14c   :  { %4018 = vmatpush.bf16.msrb.mxu0 %v7001_v53  ;;  %4044 = vmatpush.bf16.msrb.mxu2 %v7005_v54  ;;  %v7659_v53 = vld [vmem:[#allocation11 + $0x60c] sm:$0xf]  ;;  %v6624_v45 = vld [vmem:[#allocation11 + $0xa08] sm:$0xf] }
 0x14d   :  { %811 = vmatmul.bf16.vlgmr.msrb.gmra.mxu3 %v8317_v9  ;;  %837 = vmatmul.bf16.vlgmr.msra.gmra.mxu1 %v8317_v9  ;;  %v5465_v9 = vor.u32 %v7514_v11, %v5464_v10  ;;  %v6114_v54 = vld [vmem:[#allocation11 + $0x688] sm:$0xf0]  ;;  %v7008_v10 = vld [vmem:[#allocation11 + $0xd08] sm:$0xf] }
 0x14e   :  { %4007 = vmatpush.bf16.msra.mxu3 %v5721_v59  ;;  %4033 = vmatpush.bf16.msrb.mxu1 %v5725_v60  ;;  %v6117_v56 = vor.u32 %v7659_v53, %v6114_v54  ;;  %v5984_v59 = vld [vmem:[#allocation11 + $0x508] sm:$0xf]  ;;  %v6626_v53 = vld [vmem:[#allocation11 + $0xa88] sm:$0xf0] }
 0x14f   :  { %v7643_v60 = vld [vmem:[#allocation11 + $0x584] sm:$0xf0] }
 0x150   :  { %4019 = vmatpush.bf16.msrb.mxu0 %v6873_v1  ;;  %4045 = vmatpush.bf16.msrb.mxu2 %v6877_v2  ;;  %v5985_v62 = vor.u32 %v7643_v60, %v5984_v59  ;;  %v5986_v1 = vld [vmem:[#allocation11 + $0x588] sm:$0xf0]  ;;  %v7137_v2 = vor.u32 %v7931_v63, %v7136_v61  ;;  %v7771_v59 = vld [vmem:[#allocation11 + $0x984] sm:$0xf0] }
 0x151   :  { %v5989_v3 = vor.u32 %v7627_v0, %v5986_v1  ;;  %v7467_v60 = vld [vmem:[#allocation11 + $0xc] sm:$0xf] }
 0x152   :  { %4008 = vmatpush.bf16.msra.mxu3 %v5593_v7  ;;  %4034 = vmatpush.bf16.msrb.mxu1 %v5597_v8  ;;  %v5856_v7 = vld [vmem:[#allocation11 + $0x408] sm:$0xf]  ;;  %v5346_v61 = vld [vmem:[#allocation11 + $0x88] sm:$0xf0] }
 0x153   :  { %824 = vmatmul.bf16.vlgmr.msra.gmra.mxu0 %v8321_v30  ;;  %850 = vmatmul.bf16.vlgmr.msra.gmra.mxu2 %v8321_v30  ;;  %v6240_v30 = vld [vmem:[#allocation11 + $0x708] sm:$0xf]  ;;  %v5349_v63 = vor.u32 %v7467_v60, %v5346_v61  ;;  %v7755_v0 = vld [vmem:[#allocation11 + $0x90c] sm:$0xf]  ;;  %v7948_v60 = vld [vmem:[#allocation11 + $0xf14] sm:$0xf] }
 0x154   :  { %4020 = vmatpush.bf16.msrb.mxu0 %v6745_v14  ;;  %4046 = vmatpush.bf16.msrb.mxu2 %v6749_v15  ;;  %v6241_v39 = vor.u32 %v7707_v36, %v6240_v30  ;;  %v7611_v8 = vld [vmem:[#allocation11 + $0x484] sm:$0xf0]  ;;  %v5858_v14 = vld [vmem:[#allocation11 + $0x488] sm:$0xf0]  ;;  %v7009_v15 = vor.u32 %v7899_v12, %v7008_v10  ;;  %v7274_v61 = vld [vmem:[#allocation11 + $0xf90] sm:$0xf0] }
 0x155   :  { %v5857_v11 = vor.u32 %v7611_v8, %v5856_v7  ;;  %v5861_v16 = vor.u32 %v7595_v13, %v5858_v14  ;;  %v7531_v36 = vld [vmem:[#allocation11 + $0x20c] sm:$0xf]  ;;  %v6369_v7 = vor.u32 %v7739_v5, %v6368_v4  ;;  %v154_v10 = vld [vmem:[#allocation14 + $0x2] ss:$8 sm:$0x3]  ;;  %v7277_v5 = vor.u32 %v7948_v60, %v7274_v61 }
 0x156   :  { %4009 = vmatpush.bf16.msra.mxu3 %v5465_v9  ;;  %4035 = vmatpush.bf16.msrb.mxu1 %v5469_v20  ;;  %v5728_v9 = vld [vmem:[#allocation11 + $0x308] sm:$0xf]  ;;  %v6498_v1 = vld [vmem:[#allocation11 + $0x988] sm:$0xf0]  ;;  %v377_v12 = vperm.slane %v154_v10, 0 }
 0x157   :  { %v7579_v20 = vld [vmem:[#allocation11 + $0x384] sm:$0xf0]  ;;  %v6370_v8 = vld [vmem:[#allocation11 + $0x888] sm:$0xf0]  ;;  %v7788_v60 = vld [vmem:[#allocation11 + $0xa14] sm:$0xf] }
 0x158   :  { %4021 = vmatpush.bf16.msrb.mxu0 %v6617_v21  ;;  %4047 = vmatpush.bf16.msrb.mxu2 %v6621_v22  ;;  %v5729_v21 = vor.u32 %v7579_v20, %v5728_v9  ;;  %v6880_v22 = vld [vmem:[#allocation11 + $0xc08] sm:$0xf]  ;;  %v6634_v61 = vld [vmem:[#allocation11 + $0xa90] sm:$0xf0] }
 0x159   :  { %v6881_v25 = vor.u32 %v7867_v23, %v6880_v22 }
 0x15a   :  { %4010 = vmatpush.bf16.msra.mxu3 %v5337_v26  ;;  %4036 = vmatpush.bf16.msrb.mxu1 %v5341_v32  ;;  %v5730_v26 = vld [vmem:[#allocation11 + $0x388] sm:$0xf0]  ;;  %v5600_v32 = vld [vmem:[#allocation11 + $0x208] sm:$0xf] }
 0x15b   :  { %v5733_v29 = vor.u32 %v7563_v24, %v5730_v26  ;;  %v5601_v30 = vor.u32 %v7547_v33, %v5600_v32  ;;  %v158_v32 = vld [vmem:[#allocation14 + $0x4] ss:$8 sm:$0x3] }
 0x15c   :  { %4022 = vmatpush.bf16.msrb.mxu0 %v6489_v31  ;;  %4048 = vmatpush.bf16.msrb.mxu2 %v6493_v35  ;;  %v6885_v31 = vor.u32 %v7851_v27, %v6882_v28  ;;  %v7835_v35 = vld [vmem:[#allocation11 + $0xb84] sm:$0xf0] }
 0x15d   :  { %v6753_v38 = vor.u32 %v7835_v35, %v6752_v34  ;;  %v639_v34 = vperm.slane %v158_v32, 0 }
 0x15e   :  { %4055 = vmatpush.bf16.msrb.mxu3 %v6241_v39  ;;  %4081 = vmatpush.bf16.msra.mxu1 %v6245_v40  ;;  %v5605_v39 = vor.u32 %v7531_v36, %v5602_v37  ;;  %v7819_v40 = vld [vmem:[#allocation11 + $0xb0c] sm:$0xf]  ;;  %v640_v37 = vperm.slane %v158_v32, 1  ;;  %v6888_v32 = vld [vmem:[#allocation11 + $0xc10] sm:$0xf] }
 0x15f   :  { %v6757_v42 = vor.u32 %v7819_v40, %v6754_v41  ;;  %v6248_v40 = vld [vmem:[#allocation11 + $0x710] sm:$0xf] }
 0x160   :  { %4023 = vmatpush.bf16.msrb.mxu0 %v6361_v44  ;;  %4049 = vmatpush.bf16.msrb.mxu2 %v6365_v47  ;;  %v7515_v44 = vld [vmem:[#allocation11 + $0x184] sm:$0xf0] }
 0x161   :  { %v5473_v46 = vor.u32 %v7515_v44, %v5472_v43  ;;  %v7803_v47 = vld [vmem:[#allocation11 + $0xa84] sm:$0xf0]  ;;  %v7692_v43 = vld [vmem:[#allocation11 + $0x714] sm:$0xf] }
 0x162   :  { %4056 = vmatpush.bf16.msrb.mxu3 %v6113_v51  ;;  %4082 = vmatpush.bf16.msra.mxu1 %v6117_v56  ;;  %v6625_v50 = vor.u32 %v7803_v47, %v6624_v45  ;;  %v5477_v51 = vor.u32 %v7499_v48, %v5474_v49  ;;  %v7483_v56 = vld [vmem:[#allocation11 + $0x84] sm:$0xf0]  ;;  %v6250_v44 = vld [vmem:[#allocation11 + $0x790] sm:$0xf0] }
 0x163   :  { %v6253_v49 = vor.u32 %v7692_v43, %v6250_v44  ;;  %v6760_v43 = vld [vmem:[#allocation11 + $0xb10] sm:$0xf] }
 0x164   :  { %4068 = vmatpush.bf16.msra.mxu0 %v7265_v52  ;;  %4094 = vmatpush.bf16.msra.mxu2 %v7269_v58  ;;  %v7787_v52 = vld [vmem:[#allocation11 + $0xa0c] sm:$0xf]  ;;  %v5345_v58 = vor.u32 %v7483_v56, %v5344_v55  ;;  %v7964_v55 = vld [vmem:[#allocation11 + $0xf8c] sm:$0xf0]  ;;  %v7660_v56 = vld [vmem:[#allocation11 + $0x614] sm:$0xf] }
 0x165   :  { %v6629_v54 = vor.u32 %v7787_v52, %v6626_v53  ;;  %v7836_v44 = vld [vmem:[#allocation11 + $0xb8c] sm:$0xf0] }
 0x166   :  { %4057 = vmatpush.bf16.msrb.mxu3 %v5985_v62  ;;  %4083 = vmatpush.bf16.msra.mxu1 %v5989_v3  ;;  %v6497_v62 = vor.u32 %v7771_v59, %v6496_v57  ;;  %v6122_v59 = vld [vmem:[#allocation11 + $0x690] sm:$0xf0] }
 0x167   :  { %v6125_v4 = vor.u32 %v7660_v56, %v6122_v59  ;;  %v6632_v56 = vld [vmem:[#allocation11 + $0xa10] sm:$0xf]  ;;  %v5482_v59 = vld [vmem:[#allocation11 + $0x190] sm:$0xf0] }
 0x168   :  { %4069 = vmatpush.bf16.msra.mxu0 %v7137_v2  ;;  %4095 = vmatpush.bf16.msra.mxu2 %v7141_v6  ;;  %v6501_v2 = vor.u32 %v7755_v0, %v6498_v1  ;;  %v7723_v6 = vld [vmem:[#allocation11 + $0x80c] sm:$0xf]  ;;  %v5992_v1 = vld [vmem:[#allocation11 + $0x510] sm:$0xf] }
 0x16a   :  { %4058 = vmatpush.bf16.msrb.mxu3 %v5857_v11  ;;  %4084 = vmatpush.bf16.msra.mxu1 %v5861_v16  ;;  %v6373_v11 = vor.u32 %v7723_v6, %v6370_v8  ;;  %v7144_v6 = vld [vmem:[#allocation11 + $0xe10] sm:$0xf]  ;;  %v7628_v8 = vld [vmem:[#allocation11 + $0x514] sm:$0xf] }
 0x16c   :  { %4070 = vmatpush.bf16.msra.mxu0 %v7009_v15  ;;  %4096 = vmatpush.bf16.msra.mxu2 %v7013_v19  ;;  %v378_v15 = vperm.slane %v154_v10, 1  ;;  %v156_v19 = vld [vmem:[#allocation14 + $0x3] ss:$8 sm:$0x3]  ;;  %v5994_v10 = vld [vmem:[#allocation11 + $0x590] sm:$0xf0] }
 0x16d   :  { %v596_v23 = vperm.slane %v156_v19, 0  ;;  %v597_v24 = vperm.slane %v156_v19, 1 }
 0x16e   :  { %4059 = vmatpush.bf16.msrb.mxu3 %v5729_v21  ;;  %4085 = vmatpush.bf16.msra.mxu1 %v5733_v29 }
 0x170   :  { %4071 = vmatpush.bf16.msra.mxu0 %v6881_v25  ;;  %4097 = vmatpush.bf16.msra.mxu2 %v6885_v31 }
 0x172   :  { %4060 = vmatpush.bf16.msrb.mxu3 %v5601_v30  ;;  %4086 = vmatpush.bf16.msra.mxu1 %v5605_v39 }
 0x174   :  { %4072 = vmatpush.bf16.msra.mxu0 %v6753_v38  ;;  %4098 = vmatpush.bf16.msra.mxu2 %v6757_v42  ;;  %v7708_v42 = vld [vmem:[#allocation11 + $0x78c] sm:$0xf0] }
 0x175   :  { %v6249_v48 = vor.u32 %v7708_v42, %v6248_v40  ;;  %v7548_v40 = vld [vmem:[#allocation11 + $0x28c] sm:$0xf0] }
 0x176   :  { %4061 = vmatpush.bf16.msrb.mxu3 %v5473_v46  ;;  %4087 = vmatpush.bf16.msra.mxu1 %v5477_v51  ;;  %v7676_v51 = vld [vmem:[#allocation11 + $0x68c] sm:$0xf0] }
 0x178   :  { %4073 = vmatpush.bf16.msra.mxu0 %v6625_v50  ;;  %4099 = vmatpush.bf16.msra.mxu2 %v6629_v54  ;;  %v6120_v50 = vld [vmem:[#allocation11 + $0x610] sm:$0xf] }
 0x179   :  { %v7272_v54 = vld [vmem:[#allocation11 + $0xf10] sm:$0xf] }
 0x17a   :  { %4062 = vmatpush.bf16.msrb.mxu3 %v5345_v58  ;;  %4088 = vmatpush.bf16.msra.mxu1 %v5349_v63  ;;  %v6121_v63 = vor.u32 %v7676_v51, %v6120_v50  ;;  %v7273_v0 = vor.u32 %v7964_v55, %v7272_v54  ;;  %v6761_v50 = vor.u32 %v7836_v44, %v6760_v43  ;;  %v5480_v51 = vld [vmem:[#allocation11 + $0x110] sm:$0xf]  ;;  %v7629_v43 = vld [vmem:[#allocation11 + $0x51c] sm:$0xf] }
 0x17b   :  { %v6002_v44 = vld [vmem:[#allocation11 + $0x598] sm:$0xf0] }
 0x17c   :  { %4074 = vmatpush.bf16.msra.mxu0 %v6497_v62  ;;  %4100 = vmatpush.bf16.msra.mxu2 %v6501_v2  ;;  %v7644_v2 = vld [vmem:[#allocation11 + $0x58c] sm:$0xf0] }
 0x180   :  { %4075 = vmatpush.bf16.msra.mxu0 %v6369_v7  ;;  %4101 = vmatpush.bf16.msra.mxu2 %v6373_v11  ;;  %v7932_v7 = vld [vmem:[#allocation11 + $0xe8c] sm:$0xf0]  ;;  %v7916_v11 = vld [vmem:[#allocation11 + $0xe14] sm:$0xf] }
 0x1ba   :  { %v576_v3 = vpop.f32.mrf.mxu1 }
 0x1bb   :  { %v577_v9 = vadd.f32 %v576_v3, %v378_v15  ;;  %v7145_v15 = vor.u32 %v7932_v7, %v7144_v6  ;;  %v7772_v6 = vld [vmem:[#allocation11 + $0x98c] sm:$0xf0]  ;;  %v7468_v7 = vld [vmem:[#allocation11 + $0x14] sm:$0xf] }
 0x1c0   :  { %v550_v13 = vpop.f32.mrf.mxu3  ;;  %v563_v14 = vpop.f32.mrf.mxu0 }
 0x1c1   :  { %v551_v16 = vadd.f32 %v550_v13, %v377_v12  ;;  %v7146_v12 = vld [vmem:[#allocation11 + $0xe90] sm:$0xf0] }
 0x1c2   :  { %v578_v17 = vpop.f32.mrf.mxu1  ;;  %v7149_v19 = vor.u32 %v7916_v11, %v7146_v12  ;;  %v6506_v11 = vld [vmem:[#allocation11 + $0x990] sm:$0xf0]  ;;  %v6256_v12 = vld [vmem:[#allocation11 + $0x718] sm:$0xf] }
 0x1c3   :  { %v564_v18 = vadd.f32 %v563_v14, %v551_v16  ;;  %v5993_v14 = vor.u32 %v7644_v2, %v5992_v1  ;;  %v5864_v16 = vld [vmem:[#allocation11 + $0x410] sm:$0xf] }
 0x1c4   :  { %v7612_v17 = vld [vmem:[#allocation11 + $0x48c] sm:$0xf0] }
 0x1c5   :  { %v593_v21 = vmax.f32 %v564_v18, 0.0  ;;  %v5997_v18 = vor.u32 %v7628_v8, %v5994_v10  ;;  %v7484_v1 = vld [vmem:[#allocation11 + $0x8c] sm:$0xf0]  ;;  %v5354_v8 = vld [vmem:[#allocation11 + $0x90] sm:$0xf0] }
 0x1c6   :  { %v589_v20 = vpop.f32.mrf.mxu2  ;;  %v6504_v2 = vld [vmem:[#allocation11 + $0x910] sm:$0xf]  ;;  %v7756_v10 = vld [vmem:[#allocation11 + $0x914] sm:$0xf] }
 0x1c7   :  { %v590_v22 = vadd.f32 %v589_v20, %v577_v9  ;;  %v600_v29 = vmul.f32 %v596_v23, %v593_v21  ;;  %v7016_v9 = vld [vmem:[#allocation11 + $0xd10] sm:$0xf]  ;;  %v7596_v21 = vld [vmem:[#allocation11 + $0x414] sm:$0xf] }
 0x1c8   :  { %v552_v25 = vpop.f32.mrf.mxu3  ;;  %v565_v26 = vpop.f32.mrf.mxu0  ;;  %v7900_v20 = vld [vmem:[#allocation11 + $0xd8c] sm:$0xf0]  ;;  %v7884_v23 = vld [vmem:[#allocation11 + $0xd14] sm:$0xf] }
 0x1c9   :  { %v594_v27 = vmax.f32 %v590_v22, 0.0  ;;  %v5866_v22 = vld [vmem:[#allocation11 + $0x490] sm:$0xf0]  ;;  %v5865_v25 = vor.u32 %v7612_v17, %v5864_v16  ;;  %v7017_v26 = vor.u32 %v7900_v20, %v7016_v9  ;;  %v6505_v17 = vor.u32 %v7772_v6, %v6504_v2  ;;  %v7740_v20 = vld [vmem:[#allocation11 + $0x88c] sm:$0xf0] }
 0x1ca   :  { %v838_v28 = vpop.f32.mrf.mxu1  ;;  %v6509_v9 = vor.u32 %v7756_v10, %v6506_v11  ;;  %v5746_v6 = vld [vmem:[#allocation11 + $0x398] sm:$0xf0] }
 0x1cb   :  { %v601_v31 = vmul.f32 %v597_v24, %v594_v27  ;;  %v839_v45 = vadd.f32 %v838_v28, %v640_v37  ;;  %v7018_v24 = vld [vmem:[#allocation11 + $0xd90] sm:$0xf0]  ;;  %v5736_v27 = vld [vmem:[#allocation11 + $0x310] sm:$0xf] }
 0x1cc   :  { %v7580_v28 = vld [vmem:[#allocation11 + $0x38c] sm:$0xf0] }
 0x1cd   :  { %v602_v33 = vadd.f32 %v601_v31, %v600_v29  ;;  %v5869_v29 = vor.u32 %v7596_v21, %v5866_v22  ;;  %v7021_v31 = vor.u32 %v7884_v23, %v7018_v24  ;;  %v5737_v37 = vor.u32 %v7580_v28, %v5736_v27  ;;  %v7724_v21 = vld [vmem:[#allocation11 + $0x814] sm:$0xf]  ;;  %v7965_v27 = vld [vmem:[#allocation11 + $0xf94] sm:$0xf0] }
 0x1ce   :  { %v591_v30 = vpop.f32.mrf.mxu2  ;;  %v6378_v22 = vld [vmem:[#allocation11 + $0x890] sm:$0xf0]  ;;  %v7677_v28 = vld [vmem:[#allocation11 + $0x694] sm:$0xf0] }
 0x1cf   :  { %603 = vadd.xlane.f32.xlu0 %v602_v33  ;;  %v7868_v33 = vld [vmem:[#allocation11 + $0xc8c] sm:$0xf0]  ;;  %v5738_v30 = vld [vmem:[#allocation11 + $0x390] sm:$0xf0] }
 0x1d0   :  { %v812_v35 = vpop.f32.mrf.mxu3  ;;  %v825_v36 = vpop.f32.mrf.mxu0 }
 0x1d1   :  { %v813_v38 = vadd.f32 %v812_v35, %v639_v34  ;;  %v7564_v34 = vld [vmem:[#allocation11 + $0x314] sm:$0xf] }
 0x1d2   :  { %v840_v39 = vpop.f32.mrf.mxu1  ;;  %v7852_v35 = vld [vmem:[#allocation11 + $0xc14] sm:$0xf] }
 0x1d3   :  { %v826_v41 = vadd.f32 %v825_v36, %v813_v38  ;;  %v6890_v36 = vld [vmem:[#allocation11 + $0xc90] sm:$0xf0]  ;;  %v6889_v38 = vor.u32 %v7868_v33, %v6888_v32  ;;  %v5608_v39 = vld [vmem:[#allocation11 + $0x210] sm:$0xf]  ;;  %v7949_v33 = vld [vmem:[#allocation11 + $0xf1c] sm:$0xf] }
 0x1d4   :  { %v6893_v42 = vor.u32 %v7852_v35, %v6890_v36 }
 0x1d5   :  { %v855_v46 = vmax.f32 %v826_v41, 0.0  ;;  %v5741_v41 = vor.u32 %v7564_v34, %v5738_v30  ;;  %v7282_v34 = vld [vmem:[#allocation11 + $0xf98] sm:$0xf0]  ;;  %v6381_v30 = vor.u32 %v7724_v21, %v6378_v22 }
 0x1d6   :  { %v851_v47 = vpop.f32.mrf.mxu2 }
 0x1d7   :  { %v8329_v52 = vpack.c.bf16 %v855_v46, %v855_v46  ;;  %v852_v53 = vadd.f32 %v851_v47, %v839_v45  ;;  %v7532_v45 = vld [vmem:[#allocation11 + $0x214] sm:$0xf] }
 0x1d8   :  { %v814_v57 = vpop.f32.mrf.mxu3  ;;  %v827_v58 = vpop.f32.mrf.mxu0  ;;  %v5610_v46 = vld [vmem:[#allocation11 + $0x290] sm:$0xf0] }
 0x1d9   :  { %v856_v62 = vmax.f32 %v852_v53, 0.0  ;;  %4011 = vmatmul.bf16.vlgmr.msra.gmra.mxu3 %v8329_v52  ;;  %4037 = vmatmul.bf16.vlgmr.msrb.gmra.mxu1 %v8329_v52  ;;  %v7820_v47 = vld [vmem:[#allocation11 + $0xb14] sm:$0xf]  ;;  %v7516_v53 = vld [vmem:[#allocation11 + $0x18c] sm:$0xf0]  ;;  %v5613_v54 = vor.u32 %v7532_v45, %v5610_v46 }
 0x1da   :  { %4107 = vmatpush.bf16.msra.mxu3 %v6249_v48  ;;  %4133 = vmatpush.bf16.msrb.mxu1 %v6253_v49  ;;  %v6762_v48 = vld [vmem:[#allocation11 + $0xb90] sm:$0xf0]  ;;  %v5609_v49 = vor.u32 %v7548_v40, %v5608_v39  ;;  %v7804_v57 = vld [vmem:[#allocation11 + $0xa8c] sm:$0xf0]  ;;  %v7152_v39 = vld [vmem:[#allocation11 + $0xe18] sm:$0xf] }
 0x1db   :  { %v8333_v3 = vpack.c.bf16 %v856_v62, %v856_v62  ;;  %v6765_v55 = vor.u32 %v7820_v47, %v6762_v48  ;;  %v7500_v58 = vld [vmem:[#allocation11 + $0x114] sm:$0xf]  ;;  %v5481_v62 = vor.u32 %v7516_v53, %v5480_v51  ;;  %v7933_v40 = vld [vmem:[#allocation11 + $0xe94] sm:$0xf0]  ;;  %v7917_v45 = vld [vmem:[#allocation11 + $0xe1c] sm:$0xf] }
 0x1dc   :  { %v7154_v46 = vld [vmem:[#allocation11 + $0xe98] sm:$0xf0]  ;;  %v7153_v47 = vor.u32 %v7933_v40, %v7152_v39  ;;  %v7024_v51 = vld [vmem:[#allocation11 + $0xd18] sm:$0xf] }
 0x1dd   :  { %4024 = vmatmul.bf16.vlgmr.msrb.gmra.mxu0 %v8333_v3  ;;  %4050 = vmatmul.bf16.vlgmr.msrb.gmra.mxu2 %v8333_v3  ;;  %v7901_v53 = vld [vmem:[#allocation11 + $0xd94] sm:$0xf0] }
 0x1de   :  { %4108 = vmatpush.bf16.msra.mxu3 %v6121_v63  ;;  %4120 = vmatpush.bf16.msrb.mxu0 %v7273_v0  ;;  %v853_v13 = vpop.f32.mrf.mxu2  ;;  %v6633_v63 = vor.u32 %v7804_v57, %v6632_v56  ;;  %v5352_v0 = vld [vmem:[#allocation11 + $0x10] sm:$0xf]  ;;  %v7597_v56 = vld [vmem:[#allocation11 + $0x41c] sm:$0xf]  ;;  %v7773_v39 = vld [vmem:[#allocation11 + $0x994] sm:$0xf0] }
 0x1df   :  { %4134 = vmatpush.bf16.msrb.mxu1 %v6125_v4  ;;  %4146 = vmatpush.bf16.msrb.mxu2 %v7277_v5  ;;  %v5485_v4 = vor.u32 %v7500_v58, %v5482_v59  ;;  %v6637_v5 = vor.u32 %v7788_v60, %v6634_v61  ;;  %v7709_v13 = vld [vmem:[#allocation11 + $0x794] sm:$0xf0]  ;;  %v5353_v16 = vor.u32 %v7484_v1, %v5352_v0  ;;  %v5874_v57 = vld [vmem:[#allocation11 + $0x498] sm:$0xf0] }
 0x1e0   :  { %v6257_v23 = vor.u32 %v7709_v13, %v6256_v12  ;;  %v7885_v58 = vld [vmem:[#allocation11 + $0xd1c] sm:$0xf]  ;;  %v7025_v60 = vor.u32 %v7901_v53, %v7024_v51  ;;  %v6896_v0 = vld [vmem:[#allocation11 + $0xc18] sm:$0xf] }
 0x1e1   :  { %v7026_v59 = vld [vmem:[#allocation11 + $0xd98] sm:$0xf0]  ;;  %v7869_v1 = vld [vmem:[#allocation11 + $0xc94] sm:$0xf0] }
 0x1e2   :  { %4109 = vmatpush.bf16.msra.mxu3 %v5993_v14  ;;  %4121 = vmatpush.bf16.msrb.mxu0 %v7145_v15  ;;  %v7693_v14 = vld [vmem:[#allocation11 + $0x71c] sm:$0xf]  ;;  %v7029_v2 = vor.u32 %v7885_v58, %v7026_v59  ;;  %v6897_v10 = vor.u32 %v7869_v1, %v6896_v0  ;;  %v5616_v13 = vld [vmem:[#allocation11 + $0x218] sm:$0xf]  ;;  %v7662_v0 = vld [vmem:[#allocation11 + $0x624] sm:$0xf] }
 0x1e3   :  { %4135 = vmatpush.bf16.msrb.mxu1 %v5997_v18  ;;  %4147 = vmatpush.bf16.msrb.mxu2 %v7149_v19  ;;  %v6258_v15 = vld [vmem:[#allocation11 + $0x798] sm:$0xf0]  ;;  %v6376_v18 = vld [vmem:[#allocation11 + $0x810] sm:$0xf]  ;;  %v5357_v19 = vor.u32 %v7468_v7, %v5354_v8  ;;  %v6384_v53 = vld [vmem:[#allocation11 + $0x818] sm:$0xf] }
 0x1e4   :  { %v6261_v24 = vor.u32 %v7693_v14, %v6258_v15  ;;  %v6377_v32 = vor.u32 %v7740_v20, %v6376_v18  ;;  %v7853_v7 = vld [vmem:[#allocation11 + $0xc1c] sm:$0xf]  ;;  %v6768_v14 = vld [vmem:[#allocation11 + $0xb18] sm:$0xf]  ;;  %v6138_v1 = vld [vmem:[#allocation11 + $0x6a0] sm:$0xf0] }
 0x1e5   :  { %v6898_v8 = vld [vmem:[#allocation11 + $0xc98] sm:$0xf0]  ;;  %v7837_v15 = vld [vmem:[#allocation11 + $0xb94] sm:$0xf0] }
 0x1e6   :  { %4110 = vmatpush.bf16.msra.mxu3 %v5865_v25  ;;  %4122 = vmatpush.bf16.msrb.mxu0 %v7017_v26  ;;  %v6128_v25 = vld [vmem:[#allocation11 + $0x618] sm:$0xf]  ;;  %v7533_v18 = vld [vmem:[#allocation11 + $0x21c] sm:$0xf]  ;;  %v6769_v21 = vor.u32 %v7837_v15, %v6768_v14  ;;  %v7934_v15 = vld [vmem:[#allocation11 + $0xe9c] sm:$0xf0] }
 0x1e7   :  { %4136 = vmatpush.bf16.msrb.mxu1 %v5869_v29  ;;  %4148 = vmatpush.bf16.msrb.mxu2 %v7021_v31  ;;  %v7280_v26 = vld [vmem:[#allocation11 + $0xf18] sm:$0xf]  ;;  %v7661_v29 = vld [vmem:[#allocation11 + $0x61c] sm:$0xf]  ;;  %v6129_v36 = vor.u32 %v7677_v28, %v6128_v25 }
 0x1e8   :  { %v6130_v31 = vld [vmem:[#allocation11 + $0x698] sm:$0xf0]  ;;  %v7281_v35 = vor.u32 %v7965_v27, %v7280_v26  ;;  %v6640_v25 = vld [vmem:[#allocation11 + $0xa18] sm:$0xf] }
 0x1e9   :  { %4063 = vmatmul.bf16.vlgmr.msrb.gmra.mxu3 %v8329_v52  ;;  %4089 = vmatmul.bf16.vlgmr.msra.gmra.mxu1 %v8329_v52  ;;  %v6770_v20 = vld [vmem:[#allocation11 + $0xb98] sm:$0xf0]  ;;  %v7805_v26 = vld [vmem:[#allocation11 + $0xa94] sm:$0xf0] }
 0x1ea   :  { %4111 = vmatpush.bf16.msra.mxu3 %v5737_v37  ;;  %4123 = vmatpush.bf16.msrb.mxu0 %v6889_v38  ;;  %v6133_v37 = vor.u32 %v7661_v29, %v6130_v31  ;;  %v6000_v38 = vld [vmem:[#allocation11 + $0x518] sm:$0xf]  ;;  %v7501_v29 = vld [vmem:[#allocation11 + $0x11c] sm:$0xf] }
 0x1eb   :  { %4137 = vmatpush.bf16.msrb.mxu1 %v5741_v41  ;;  %4149 = vmatpush.bf16.msrb.mxu2 %v6893_v42  ;;  %v7285_v41 = vor.u32 %v7949_v33, %v7282_v34  ;;  %v7645_v42 = vld [vmem:[#allocation11 + $0x594] sm:$0xf0]  ;;  %v5490_v31 = vld [vmem:[#allocation11 + $0x198] sm:$0xf0]  ;;  %v6641_v34 = vor.u32 %v7805_v26, %v6640_v25  ;;  %v7902_v26 = vld [vmem:[#allocation11 + $0xd9c] sm:$0xf0] }
 0x1ec   :  { %v6001_v48 = vor.u32 %v7645_v42, %v6000_v38  ;;  %v7517_v28 = vld [vmem:[#allocation11 + $0x194] sm:$0xf0]  ;;  %v6642_v33 = vld [vmem:[#allocation11 + $0xa98] sm:$0xf0] }
 0x1ed   :  { %4076 = vmatmul.bf16.vlgmr.msra.gmra.mxu0 %v8333_v3  ;;  %4102 = vmatmul.bf16.vlgmr.msra.gmra.mxu2 %v8333_v3  ;;  %v6512_v38 = vld [vmem:[#allocation11 + $0x918] sm:$0xf]  ;;  %v5362_v42 = vld [vmem:[#allocation11 + $0x98] sm:$0xf0] }
 0x1ee   :  { %4112 = vmatpush.bf16.msra.mxu3 %v5609_v49  ;;  %4124 = vmatpush.bf16.msrb.mxu0 %v6761_v50  ;;  %v6005_v49 = vor.u32 %v7629_v43, %v6002_v44  ;;  %v5872_v50 = vld [vmem:[#allocation11 + $0x418] sm:$0xf]  ;;  %v7757_v43 = vld [vmem:[#allocation11 + $0x91c] sm:$0xf] }
 0x1ef   :  { %4138 = vmatpush.bf16.msrb.mxu1 %v5613_v54  ;;  %4150 = vmatpush.bf16.msrb.mxu2 %v6765_v55  ;;  %v7157_v54 = vor.u32 %v7917_v45, %v7154_v46  ;;  %v7613_v55 = vld [vmem:[#allocation11 + $0x494] sm:$0xf0]  ;;  %v6514_v44 = vld [vmem:[#allocation11 + $0x998] sm:$0xf0]  ;;  %v6264_v45 = vld [vmem:[#allocation11 + $0x720] sm:$0xf] }
 0x1f0   :  { %v5873_v61 = vor.u32 %v7613_v55, %v5872_v50  ;;  %v7710_v46 = vld [vmem:[#allocation11 + $0x79c] sm:$0xf0]  ;;  %v6386_v58 = vld [vmem:[#allocation11 + $0x898] sm:$0xf0] }
 0x1f1   :  { %v6265_v55 = vor.u32 %v7710_v46, %v6264_v45  ;;  %v5624_v46 = vld [vmem:[#allocation11 + $0x220] sm:$0xf] }
 0x1f2   :  { %4113 = vmatpush.bf16.msra.mxu3 %v5481_v62  ;;  %4125 = vmatpush.bf16.msrb.mxu0 %v6633_v63  ;;  %v5877_v62 = vor.u32 %v7597_v56, %v5874_v57  ;;  %v5744_v63 = vld [vmem:[#allocation11 + $0x318] sm:$0xf]  ;;  %v7725_v57 = vld [vmem:[#allocation11 + $0x81c] sm:$0xf] }
 0x1f3   :  { %4139 = vmatpush.bf16.msrb.mxu1 %v5485_v4  ;;  %4151 = vmatpush.bf16.msrb.mxu2 %v6637_v5  ;;  %v7581_v4 = vld [vmem:[#allocation11 + $0x394] sm:$0xf0]  ;;  %v7565_v5 = vld [vmem:[#allocation11 + $0x31c] sm:$0xf] }
 0x1f4   :  { %v5745_v11 = vor.u32 %v7581_v4, %v5744_v63  ;;  %v5749_v12 = vor.u32 %v7565_v5, %v5746_v6  ;;  %v7741_v56 = vld [vmem:[#allocation11 + $0x894] sm:$0xf0]  ;;  %v7966_v63 = vld [vmem:[#allocation11 + $0xf9c] sm:$0xf0]  ;;  %v7950_v4 = vld [vmem:[#allocation11 + $0xf24] sm:$0xf]  ;;  %v6389_v6 = vor.u32 %v7725_v57, %v6386_v58 }
 0x1f5   :  { %v7290_v5 = vld [vmem:[#allocation11 + $0xfa0] sm:$0xf0] }
 0x1f6   :  { %4114 = vmatpush.bf16.msra.mxu3 %v5353_v16  ;;  %4126 = vmatpush.bf16.msrb.mxu0 %v6505_v17  ;;  %v6901_v16 = vor.u32 %v7853_v7, %v6898_v8  ;;  %v7549_v17 = vld [vmem:[#allocation11 + $0x294] sm:$0xf0]  ;;  %v7293_v14 = vor.u32 %v7950_v4, %v7290_v5  ;;  %v7790_v4 = vld [vmem:[#allocation11 + $0xa24] sm:$0xf] }
 0x1f7   :  { %4140 = vmatpush.bf16.msrb.mxu1 %v5357_v19  ;;  %4152 = vmatpush.bf16.msrb.mxu2 %v6509_v9  ;;  %v5618_v19 = vld [vmem:[#allocation11 + $0x298] sm:$0xf0]  ;;  %v5617_v22 = vor.u32 %v7549_v17, %v5616_v13  ;;  %v7160_v13 = vld [vmem:[#allocation11 + $0xe20] sm:$0xf]  ;;  %v6010_v17 = vld [vmem:[#allocation11 + $0x5a0] sm:$0xf0] }
 0x1f8   :  { %v7821_v9 = vld [vmem:[#allocation11 + $0xb1c] sm:$0xf]  ;;  %v6650_v5 = vld [vmem:[#allocation11 + $0xaa0] sm:$0xf0] }
 0x1f9   :  { %4115 = vmatmul.bf16.vlgmr.msra.gmra.mxu3 %v8329_v52  ;;  %v6773_v27 = vor.u32 %v7821_v9, %v6770_v20  ;;  %v7161_v20 = vor.u32 %v7934_v15, %v7160_v13  ;;  %v7774_v13 = vld [vmem:[#allocation11 + $0x99c] sm:$0xf0]  ;;  %v7470_v15 = vld [vmem:[#allocation11 + $0x24] sm:$0xf] }
 0x1fa   :  { %4159 = vmatpush.bf16.msrb.mxu3 %v6257_v23  ;;  %4127 = vmatpush.bf16.msrb.mxu0 %v6377_v32  ;;  %v5621_v23 = vor.u32 %v7533_v18, %v5618_v19  ;;  %v7789_v32 = vld [vmem:[#allocation11 + $0xa1c] sm:$0xf]  ;;  %v7918_v18 = vld [vmem:[#allocation11 + $0xe24] sm:$0xf] }
 0x1fb   :  { %4185 = vmatpush.bf16.msra.mxu1 %v6261_v24  ;;  %4153 = vmatpush.bf16.msrb.mxu2 %v6381_v30  ;;  %v5488_v24 = vld [vmem:[#allocation11 + $0x118] sm:$0xf]  ;;  %v6645_v40 = vor.u32 %v7789_v32, %v6642_v33  ;;  %v7162_v19 = vld [vmem:[#allocation11 + $0xea0] sm:$0xf0] }
 0x1fc   :  { %4141 = vmatmul.bf16.vlgmr.msrb.gmra.mxu1 %v8329_v52  ;;  %v5360_v30 = vld [vmem:[#allocation11 + $0x18] sm:$0xf]  ;;  %v7165_v25 = vor.u32 %v7918_v18, %v7162_v19  ;;  %v6522_v18 = vld [vmem:[#allocation11 + $0x9a0] sm:$0xf0]  ;;  %v6272_v19 = vld [vmem:[#allocation11 + $0x728] sm:$0xf] }
 0x1fd   :  { %4128 = vmatmul.bf16.vlgmr.msrb.gmra.mxu0 %v8333_v3 }
 0x1fe   :  { %4172 = vmatpush.bf16.msra.mxu0 %v7281_v35  ;;  %4160 = vmatpush.bf16.msrb.mxu3 %v6129_v36  ;;  %v5489_v35 = vor.u32 %v7517_v28, %v5488_v24  ;;  %v5493_v36 = vor.u32 %v7501_v29, %v5490_v31  ;;  %v7032_v24 = vld [vmem:[#allocation11 + $0xd20] sm:$0xf]  ;;  %v5882_v28 = vld [vmem:[#allocation11 + $0x4a0] sm:$0xf0] }
 0x1ff   :  { %4186 = vmatpush.bf16.msra.mxu1 %v6133_v37  ;;  %4198 = vmatpush.bf16.msra.mxu2 %v7285_v41  ;;  %v7485_v37 = vld [vmem:[#allocation11 + $0x94] sm:$0xf0]  ;;  %v7469_v41 = vld [vmem:[#allocation11 + $0x1c] sm:$0xf]  ;;  %v7886_v29 = vld [vmem:[#allocation11 + $0xd24] sm:$0xf]  ;;  %v7033_v33 = vor.u32 %v7902_v26, %v7032_v24 }
 0x200   :  { %4154 = vmatmul.bf16.vlgmr.msrb.gmra.mxu2 %v8333_v3  ;;  %v5361_v50 = vor.u32 %v7485_v37, %v5360_v30  ;;  %v5365_v51 = vor.u32 %v7469_v41, %v5362_v42  ;;  %v7034_v31 = vld [vmem:[#allocation11 + $0xda0] sm:$0xf0]  ;;  %v5752_v30 = vld [vmem:[#allocation11 + $0x320] sm:$0xf] }
 0x201   :  { %v7037_v37 = vor.u32 %v7886_v29, %v7034_v31  ;;  %v7854_v41 = vld [vmem:[#allocation11 + $0xc24] sm:$0xf] }
 0x202   :  { %4173 = vmatpush.bf16.msra.mxu0 %v7153_v47  ;;  %4161 = vmatpush.bf16.msrb.mxu3 %v6001_v48  ;;  %v6513_v47 = vor.u32 %v7773_v39, %v6512_v38  ;;  %v7694_v48 = vld [vmem:[#allocation11 + $0x724] sm:$0xf]  ;;  %v7870_v38 = vld [vmem:[#allocation11 + $0xc9c] sm:$0xf0] }
 0x203   :  { %4187 = vmatpush.bf16.msra.mxu1 %v6005_v49  ;;  %4199 = vmatpush.bf16.msra.mxu2 %v7157_v54  ;;  %v6266_v49 = vld [vmem:[#allocation11 + $0x7a0] sm:$0xf0]  ;;  %v6517_v54 = vor.u32 %v7757_v43, %v6514_v44 }
 0x204   :  { %v6269_v59 = vor.u32 %v7694_v48, %v6266_v49  ;;  %v7566_v39 = vld [vmem:[#allocation11 + $0x324] sm:$0xf]  ;;  %v6776_v48 = vld [vmem:[#allocation11 + $0xb20] sm:$0xf] }
 0x205   :  { %v6906_v42 = vld [vmem:[#allocation11 + $0xca0] sm:$0xf0] }
 0x206   :  { %4174 = vmatpush.bf16.msra.mxu0 %v7025_v60  ;;  %4162 = vmatpush.bf16.msrb.mxu3 %v5873_v61  ;;  %v6136_v60 = vld [vmem:[#allocation11 + $0x620] sm:$0xf]  ;;  %v6909_v49 = vor.u32 %v7854_v41, %v6906_v42  ;;  %v7726_v29 = vld [vmem:[#allocation11 + $0x824] sm:$0xf] }
 0x207   :  { %4188 = vmatpush.bf16.msra.mxu1 %v5877_v62  ;;  %4200 = vmatpush.bf16.msra.mxu2 %v7029_v2  ;;  %v7678_v61 = vld [vmem:[#allocation11 + $0x69c] sm:$0xf0]  ;;  %v6385_v2 = vor.u32 %v7741_v56, %v6384_v53  ;;  %v5626_v53 = vld [vmem:[#allocation11 + $0x2a0] sm:$0xf0] }
 0x208   :  { %v7288_v62 = vld [vmem:[#allocation11 + $0xf20] sm:$0xf]  ;;  %v6137_v7 = vor.u32 %v7678_v61, %v6136_v60  ;;  %v6394_v31 = vld [vmem:[#allocation11 + $0x8a0] sm:$0xf0] }
 0x209   :  { %v7289_v8 = vor.u32 %v7966_v63, %v7288_v62  ;;  %v7518_v60 = vld [vmem:[#allocation11 + $0x19c] sm:$0xf0]  ;;  %v6397_v41 = vor.u32 %v7726_v29, %v6394_v31  ;;  %v6786_v29 = vld [vmem:[#allocation11 + $0xba8] sm:$0xf0] }
 0x20a   :  { %4175 = vmatpush.bf16.msra.mxu0 %v6897_v10  ;;  %4163 = vmatpush.bf16.msrb.mxu3 %v5745_v11  ;;  %v6141_v10 = vor.u32 %v7662_v0, %v6138_v1  ;;  %v6008_v11 = vld [vmem:[#allocation11 + $0x520] sm:$0xf]  ;;  %v7502_v0 = vld [vmem:[#allocation11 + $0x124] sm:$0xf] }
 0x20b   :  { %4189 = vmatpush.bf16.msra.mxu1 %v5749_v12  ;;  %4201 = vmatpush.bf16.msra.mxu2 %v6901_v16  ;;  %v7646_v12 = vld [vmem:[#allocation11 + $0x59c] sm:$0xf0]  ;;  %v7630_v16 = vld [vmem:[#allocation11 + $0x524] sm:$0xf] }
 0x20c   :  { %v6009_v9 = vor.u32 %v7646_v12, %v6008_v11  ;;  %v6648_v61 = vld [vmem:[#allocation11 + $0xa20] sm:$0xf]  ;;  %v5498_v1 = vld [vmem:[#allocation11 + $0x1a0] sm:$0xf0] }
 0x20d   :  { %v7806_v63 = vld [vmem:[#allocation11 + $0xa9c] sm:$0xf0] }
 0x20e   :  { %4176 = vmatpush.bf16.msra.mxu0 %v6769_v21  ;;  %4164 = vmatpush.bf16.msrb.mxu3 %v5617_v22  ;;  %v6013_v21 = vor.u32 %v7630_v16, %v6010_v17  ;;  %v5880_v22 = vld [vmem:[#allocation11 + $0x420] sm:$0xf]  ;;  %v5370_v16 = vld [vmem:[#allocation11 + $0xa0] sm:$0xf0] }
 0x20f   :  { %4190 = vmatpush.bf16.msra.mxu1 %v5621_v23  ;;  %4202 = vmatpush.bf16.msra.mxu2 %v6773_v27  ;;  %v7614_v23 = vld [vmem:[#allocation11 + $0x49c] sm:$0xf0]  ;;  %v7598_v27 = vld [vmem:[#allocation11 + $0x424] sm:$0xf]  ;;  %v5373_v24 = vor.u32 %v7470_v15, %v5370_v16  ;;  %v7855_v15 = vld [vmem:[#allocation11 + $0xc2c] sm:$0xf] }
 0x210   :  { %v5881_v32 = vor.u32 %v7614_v23, %v5880_v22  ;;  %v7486_v11 = vld [vmem:[#allocation11 + $0x9c] sm:$0xf0]  ;;  %v7758_v17 = vld [vmem:[#allocation11 + $0x924] sm:$0xf]  ;;  %v6274_v22 = vld [vmem:[#allocation11 + $0x7a8] sm:$0xf0] }
 0x211   :  { %v6520_v12 = vld [vmem:[#allocation11 + $0x920] sm:$0xf]  ;;  %v6525_v26 = vor.u32 %v7758_v17, %v6522_v18  ;;  %v6914_v16 = vld [vmem:[#allocation11 + $0xca8] sm:$0xf0]  ;;  %v159_v18 = vld [vmem:[#allocation14 + $0x6] ss:$0 sm:$0xff] }
 0x212   :  { %4177 = vmatpush.bf16.msra.mxu0 %v6641_v34  ;;  %4165 = vmatpush.bf16.msrb.mxu3 %v5489_v35  ;;  %v5885_v34 = vor.u32 %v7598_v27, %v5882_v28  ;;  %v7582_v35 = vld [vmem:[#allocation11 + $0x39c] sm:$0xf0]  ;;  %v6521_v23 = vor.u32 %v7774_v13, %v6520_v12  ;;  %v7871_v12 = vld [vmem:[#allocation11 + $0xca4] sm:$0xf0]  ;;  %v7567_v13 = vld [vmem:[#allocation11 + $0x32c] sm:$0xf] }
 0x213   :  { %4191 = vmatpush.bf16.msra.mxu1 %v5493_v36  ;;  %4203 = vmatpush.bf16.msra.mxu2 %v6645_v40  ;;  %v6904_v36 = vld [vmem:[#allocation11 + $0xc20] sm:$0xf]  ;;  %v5754_v40 = vld [vmem:[#allocation11 + $0x3a0] sm:$0xf0]  ;;  %v5753_v43 = vor.u32 %v7582_v35, %v5752_v30  ;;  %v7296_v30 = vld [vmem:[#allocation11 + $0xf28] sm:$0xf] }
 0x214   :  { %v6905_v44 = vor.u32 %v7870_v38, %v6904_v36  ;;  %v5757_v45 = vor.u32 %v7566_v39, %v5754_v40  ;;  %v7742_v28 = vld [vmem:[#allocation11 + $0x89c] sm:$0xf0]  ;;  %v7967_v35 = vld [vmem:[#allocation11 + $0xfa4] sm:$0xf0]  ;;  %v7663_v36 = vld [vmem:[#allocation11 + $0x62c] sm:$0xf] }
 0x215   :  { %v7951_v39 = vld [vmem:[#allocation11 + $0xf2c] sm:$0xf] }
 0x216   :  { %4178 = vmatpush.bf16.msra.mxu0 %v6513_v47  ;;  %4166 = vmatpush.bf16.msrb.mxu3 %v5361_v50  ;;  %v7550_v47 = vld [vmem:[#allocation11 + $0x29c] sm:$0xf0]  ;;  %v7298_v40 = vld [vmem:[#allocation11 + $0xfa8] sm:$0xf0] }
 0x217   :  { %4192 = vmatpush.bf16.msra.mxu1 %v5365_v51  ;;  %4204 = vmatpush.bf16.msra.mxu2 %v6517_v54  ;;  %v7838_v50 = vld [vmem:[#allocation11 + $0xb9c] sm:$0xf0]  ;;  %v7534_v51 = vld [vmem:[#allocation11 + $0x224] sm:$0xf]  ;;  %v5625_v56 = vor.u32 %v7550_v47, %v5624_v46  ;;  %v7647_v46 = vld [vmem:[#allocation11 + $0x5a4] sm:$0xf0] }
 0x218   :  { %v7822_v54 = vld [vmem:[#allocation11 + $0xb24] sm:$0xf]  ;;  %v6777_v57 = vor.u32 %v7838_v50, %v6776_v48  ;;  %v5629_v58 = vor.u32 %v7534_v51, %v5626_v53  ;;  %v7168_v47 = vld [vmem:[#allocation11 + $0xe28] sm:$0xf]  ;;  %v7301_v48 = vor.u32 %v7951_v39, %v7298_v40  ;;  %v7631_v50 = vld [vmem:[#allocation11 + $0x52c] sm:$0xf] }
 0x219   :  { %4167 = vmatmul.bf16.vlgmr.msrb.gmra.mxu3 %v8329_v52  ;;  %v6018_v51 = vld [vmem:[#allocation11 + $0x5a8] sm:$0xf0] }
 0x21a   :  { %4211 = vmatpush.bf16.msra.mxu3 %v6265_v55  ;;  %4193 = vmatmul.bf16.vlgmr.msra.gmra.mxu1 %v8329_v52  ;;  %v6778_v55 = vld [vmem:[#allocation11 + $0xba0] sm:$0xf0]  ;;  %v7919_v53 = vld [vmem:[#allocation11 + $0xe2c] sm:$0xf] }
 0x21b   :  { %4237 = vmatpush.bf16.msrb.mxu1 %v6269_v59  ;;  %4179 = vmatpush.bf16.msra.mxu0 %v6385_v2  ;;  %v5496_v59 = vld [vmem:[#allocation11 + $0x120] sm:$0xf]  ;;  %v6781_v62 = vor.u32 %v7822_v54, %v6778_v55  ;;  %v8236_v2 = vmov 0   ;;  %v7170_v54 = vld [vmem:[#allocation11 + $0xea8] sm:$0xf0] }
 0x21c   :  { %4205 = vmatpush.bf16.msra.mxu2 %v6389_v6  ;;  %7993 = vset.pattern.permute.xlu1 %v8236_v2  ;;  %v5497_v6 = vor.u32 %v7518_v60, %v5496_v59  ;;  %v7615_v59 = vld [vmem:[#allocation11 + $0x4a4] sm:$0xf0]  ;;  %v7503_v39 = vld [vmem:[#allocation11 + $0x12c] sm:$0xf] }
 0x21d   :  { %7994 = vset.pattern.permute.xlu0 %v8236_v2  ;;  %v7040_v60 = vld [vmem:[#allocation11 + $0xd28] sm:$0xf]  ;;  %v7042_v2 = vld [vmem:[#allocation11 + $0xda8] sm:$0xf0] }
 0x21e   :  { %4212 = vmatpush.bf16.msra.mxu3 %v6137_v7  ;;  %4180 = vmatmul.bf16.vlgmr.msra.gmra.mxu0 %v8333_v3  ;;  %v5368_v7 = vld [vmem:[#allocation11 + $0x20] sm:$0xf]  ;;  %v5506_v40 = vld [vmem:[#allocation11 + $0x1a8] sm:$0xf0] }
 0x21f   :  { %4224 = vmatpush.bf16.msrb.mxu0 %v7289_v8  ;;  %4238 = vmatpush.bf16.msrb.mxu1 %v6141_v10  ;;  %v6649_v8 = vor.u32 %v7806_v63, %v6648_v61  ;;  %v5501_v10 = vor.u32 %v7502_v0, %v5498_v1  ;;  %v7173_v61 = vor.u32 %v7919_v53, %v7170_v54  ;;  %v7599_v63 = vld [vmem:[#allocation11 + $0x42c] sm:$0xf] }
 0x220   :  { %4250 = vmatpush.bf16.msrb.mxu2 %v7293_v14  ;;  %v6653_v14 = vor.u32 %v7790_v4, %v6650_v5  ;;  %v5890_v0 = vld [vmem:[#allocation11 + $0x4a8] sm:$0xf0] }
 0x221   :  { %4206 = vmatmul.bf16.vlgmr.msra.gmra.mxu2 %v8333_v3  ;;  %v7887_v1 = vld [vmem:[#allocation11 + $0xd2c] sm:$0xf] }
 0x222   :  { %4213 = vmatpush.bf16.msra.mxu3 %v6009_v9  ;;  %v7711_v9 = vld [vmem:[#allocation11 + $0x7a4] sm:$0xf0]  ;;  %v5378_v53 = vld [vmem:[#allocation11 + $0xa8] sm:$0xf0] }
 0x223   :  { %4225 = vmatpush.bf16.msrb.mxu0 %v7161_v20  ;;  %4239 = vmatpush.bf16.msrb.mxu1 %v6013_v21  ;;  %v5369_v20 = vor.u32 %v7486_v11, %v5368_v7  ;;  %v7695_v21 = vld [vmem:[#allocation11 + $0x72c] sm:$0xf]  ;;  %v6273_v27 = vor.u32 %v7711_v9, %v6272_v19  ;;  %v5760_v7 = vld [vmem:[#allocation11 + $0x328] sm:$0xf]  ;;  %v7045_v11 = vor.u32 %v7887_v1, %v7042_v2 }
 0x224   :  { %4251 = vmatpush.bf16.msrb.mxu2 %v7165_v25  ;;  %v6392_v25 = vld [vmem:[#allocation11 + $0x820] sm:$0xf]  ;;  %v7759_v54 = vld [vmem:[#allocation11 + $0x92c] sm:$0xf]  ;;  %v7743_v2 = vld [vmem:[#allocation11 + $0x8a4] sm:$0xf0] }
 0x225   :  { %v6393_v38 = vor.u32 %v7742_v28, %v6392_v25  ;;  %v7535_v25 = vld [vmem:[#allocation11 + $0x22c] sm:$0xf] }
 0x226   :  { %4214 = vmatpush.bf16.msra.mxu3 %v5881_v32  ;;  %v6277_v32 = vor.u32 %v7695_v21, %v6274_v22  ;;  %v7551_v21 = vld [vmem:[#allocation11 + $0x2a4] sm:$0xf0]  ;;  %v7823_v28 = vld [vmem:[#allocation11 + $0xb2c] sm:$0xf] }
 0x227   :  { %4226 = vmatpush.bf16.msrb.mxu0 %v7033_v33  ;;  %4240 = vmatpush.bf16.msrb.mxu1 %v5885_v34  ;;  %v6144_v33 = vld [vmem:[#allocation11 + $0x628] sm:$0xf] }
 0x228   :  { %4252 = vmatpush.bf16.msrb.mxu2 %v7037_v37  ;;  %v7679_v34 = vld [vmem:[#allocation11 + $0x6a4] sm:$0xf0]  ;;  %v6146_v37 = vld [vmem:[#allocation11 + $0x6a8] sm:$0xf0] }
 0x229   :  { %v6145_v42 = vor.u32 %v7679_v34, %v6144_v33  ;;  %v6784_v22 = vld [vmem:[#allocation11 + $0xb28] sm:$0xf] }
 0x22a   :  { %4215 = vmatpush.bf16.msra.mxu3 %v5753_v43  ;;  %v7297_v43 = vor.u32 %v7967_v35, %v7296_v30  ;;  %v5504_v30 = vld [vmem:[#allocation11 + $0x128] sm:$0xf] }
 0x22b   :  { %4227 = vmatpush.bf16.msrb.mxu0 %v6905_v44  ;;  %4241 = vmatpush.bf16.msrb.mxu1 %v5757_v45  ;;  %v6149_v44 = vor.u32 %v7663_v36, %v6146_v37  ;;  %v6016_v45 = vld [vmem:[#allocation11 + $0x528] sm:$0xf]  ;;  %v6789_v37 = vor.u32 %v7823_v28, %v6786_v29  ;;  %v7178_v28 = vld [vmem:[#allocation11 + $0xeb0] sm:$0xf0] }
 0x22c   :  { %4253 = vmatpush.bf16.msrb.mxu2 %v6909_v49  ;;  %v7935_v49 = vld [vmem:[#allocation11 + $0xea4] sm:$0xf0]  ;;  %v6017_v55 = vor.u32 %v7647_v46, %v6016_v45  ;;  %v5509_v46 = vor.u32 %v7503_v39, %v5506_v40  ;;  %v7600_v39 = vld [vmem:[#allocation11 + $0x434] sm:$0xf] }
 0x22d   :  { %v7519_v35 = vld [vmem:[#allocation11 + $0x1a4] sm:$0xf0]  ;;  %v5898_v40 = vld [vmem:[#allocation11 + $0x4b0] sm:$0xf0] }
 0x22e   :  { %4216 = vmatpush.bf16.msra.mxu3 %v5625_v56  ;;  %v7169_v56 = vor.u32 %v7935_v49, %v7168_v47  ;;  %v6656_v36 = vld [vmem:[#allocation11 + $0xa28] sm:$0xf] }
 0x22f   :  { %4228 = vmatpush.bf16.msrb.mxu0 %v6777_v57  ;;  %4242 = vmatpush.bf16.msrb.mxu1 %v5629_v58  ;;  %v6021_v57 = vor.u32 %v7631_v50, %v6018_v51  ;;  %v5888_v58 = vld [vmem:[#allocation11 + $0x428] sm:$0xf]  ;;  %v7471_v51 = vld [vmem:[#allocation11 + $0x2c] sm:$0xf] }
 0x230   :  { %4254 = vmatpush.bf16.msrb.mxu2 %v6781_v62  ;;  %v7903_v62 = vld [vmem:[#allocation11 + $0xda4] sm:$0xf0]  ;;  %v5889_v4 = vor.u32 %v7615_v59, %v5888_v58  ;;  %v7696_v59 = vld [vmem:[#allocation11 + $0x734] sm:$0xf] }
 0x231   :  { %v7041_v5 = vor.u32 %v7903_v62, %v7040_v60  ;;  %v7487_v47 = vld [vmem:[#allocation11 + $0xa4] sm:$0xf0]  ;;  %v6282_v60 = vld [vmem:[#allocation11 + $0x7b0] sm:$0xf0]  ;;  %v5381_v62 = vor.u32 %v7471_v51, %v5378_v53  ;;  %v6920_v51 = vld [vmem:[#allocation11 + $0xc30] sm:$0xf] }
 0x232   :  { %4217 = vmatpush.bf16.msra.mxu3 %v5497_v6  ;;  %v5893_v6 = vor.u32 %v7599_v63, %v5890_v0  ;;  %v7775_v49 = vld [vmem:[#allocation11 + $0x9a4] sm:$0xf0] }
 0x233   :  { %4229 = vmatpush.bf16.msrb.mxu0 %v6649_v8  ;;  %4243 = vmatpush.bf16.msrb.mxu1 %v5501_v10  ;;  %v7583_v8 = vld [vmem:[#allocation11 + $0x3a4] sm:$0xf0] }
 0x234   :  { %4255 = vmatpush.bf16.msrb.mxu2 %v6653_v14  ;;  %v6912_v10 = vld [vmem:[#allocation11 + $0xc28] sm:$0xf]  ;;  %v5762_v14 = vld [vmem:[#allocation11 + $0x3a8] sm:$0xf0]  ;;  %v5761_v17 = vor.u32 %v7583_v8, %v5760_v7  ;;  %v6152_v7 = vld [vmem:[#allocation11 + $0x630] sm:$0xf] }
 0x235   :  { %v6913_v19 = vor.u32 %v7871_v12, %v6912_v10  ;;  %v5765_v9 = vor.u32 %v7567_v13, %v5762_v14  ;;  %v6400_v63 = vld [vmem:[#allocation11 + $0x828] sm:$0xf]  ;;  %v7680_v8 = vld [vmem:[#allocation11 + $0x6ac] sm:$0xf0]  ;;  %v7664_v12 = vld [vmem:[#allocation11 + $0x634] sm:$0xf] }
 0x236   :  { %4218 = vmatpush.bf16.msra.mxu3 %v5369_v20  ;;  %v5632_v20 = vld [vmem:[#allocation11 + $0x228] sm:$0xf]  ;;  %v7304_v10 = vld [vmem:[#allocation11 + $0xf30] sm:$0xf]  ;;  %v6154_v13 = vld [vmem:[#allocation11 + $0x6b0] sm:$0xf0]  ;;  %v6401_v14 = vor.u32 %v7743_v2, %v6400_v63 }
 0x237   :  { %4230 = vmatpush.bf16.msrb.mxu0 %v6521_v23  ;;  %4244 = vmatpush.bf16.msrb.mxu1 %v5373_v24  ;;  %v6917_v23 = vor.u32 %v7855_v15, %v6914_v16  ;;  %v7839_v24 = vld [vmem:[#allocation11 + $0xba4] sm:$0xf0]  ;;  %v7952_v15 = vld [vmem:[#allocation11 + $0xf34] sm:$0xf]  ;;  %v7552_v2 = vld [vmem:[#allocation11 + $0x2ac] sm:$0xf0] }
 0x238   :  { %4256 = vmatpush.bf16.msrb.mxu2 %v6525_v26  ;;  %v5634_v26 = vld [vmem:[#allocation11 + $0x2a8] sm:$0xf0]  ;;  %v6785_v33 = vor.u32 %v7839_v24, %v6784_v22  ;;  %v7306_v16 = vld [vmem:[#allocation11 + $0xfb0] sm:$0xf0]  ;;  %v7176_v22 = vld [vmem:[#allocation11 + $0xe30] sm:$0xf] }
 0x239   :  { %4219 = vmatmul.bf16.vlgmr.msra.gmra.mxu3 %v8329_v52  ;;  %v5637_v34 = vor.u32 %v7535_v25, %v5634_v26  ;;  %v7936_v24 = vld [vmem:[#allocation11 + $0xeac] sm:$0xf0]  ;;  %v7632_v25 = vld [vmem:[#allocation11 + $0x534] sm:$0xf] }
 0x23a   :  { %4263 = vmatpush.bf16.msrb.mxu3 %v6273_v27  ;;  %4245 = vmatmul.bf16.vlgmr.msrb.gmra.mxu1 %v8329_v52  ;;  %v6026_v26 = vld [vmem:[#allocation11 + $0x5b0] sm:$0xf0] }
 0x23b   :  { %4289 = vmatpush.bf16.msra.mxu1 %v6277_v32  ;;  %4231 = vmatpush.bf16.msrb.mxu0 %v6393_v38  ;;  %v5633_v32 = vor.u32 %v7551_v21, %v5632_v20  ;;  %v7807_v38 = vld [vmem:[#allocation11 + $0xaa4] sm:$0xf0]  ;;  %v6024_v20 = vld [vmem:[#allocation11 + $0x530] sm:$0xf] }
 0x23c   :  { %4257 = vmatpush.bf16.msrb.mxu2 %v6397_v41  ;;  %v7791_v41 = vld [vmem:[#allocation11 + $0xa2c] sm:$0xf]  ;;  %v6657_v45 = vor.u32 %v7807_v38, %v6656_v36  ;;  %v7648_v21 = vld [vmem:[#allocation11 + $0x5ac] sm:$0xf0] }
 0x23d   :  { %v6025_v29 = vor.u32 %v7648_v21, %v6024_v20  ;;  %v7048_v36 = vld [vmem:[#allocation11 + $0xd30] sm:$0xf] }
 0x23e   :  { %4264 = vmatpush.bf16.msrb.mxu3 %v6145_v42  ;;  %4232 = vmatmul.bf16.vlgmr.msrb.gmra.mxu0 %v8333_v3  ;;  %v6658_v42 = vld [vmem:[#allocation11 + $0xaa8] sm:$0xf0]  ;;  %v7904_v38 = vld [vmem:[#allocation11 + $0xdac] sm:$0xf0] }
 0x23f   :  { %4276 = vmatpush.bf16.msra.mxu0 %v7297_v43  ;;  %4290 = vmatpush.bf16.msra.mxu1 %v6149_v44  ;;  %v5505_v43 = vor.u32 %v7519_v35, %v5504_v30  ;;  %v5376_v44 = vld [vmem:[#allocation11 + $0x28] sm:$0xf]  ;;  %v6661_v50 = vor.u32 %v7791_v41, %v6658_v42  ;;  %v5896_v30 = vld [vmem:[#allocation11 + $0x430] sm:$0xf]  ;;  %v7888_v41 = vld [vmem:[#allocation11 + $0xd34] sm:$0xf] }
 0x240   :  { %4302 = vmatpush.bf16.msra.mxu2 %v7301_v48  ;;  %v6528_v48 = vld [vmem:[#allocation11 + $0x928] sm:$0xf]  ;;  %v5377_v58 = vor.u32 %v7487_v47, %v5376_v44  ;;  %v7616_v35 = vld [vmem:[#allocation11 + $0x4ac] sm:$0xf0]  ;;  %v7050_v42 = vld [vmem:[#allocation11 + $0xdb0] sm:$0xf0]  ;;  %v5901_v47 = vor.u32 %v7600_v39, %v5898_v40 }
 0x241   :  { %4258 = vmatmul.bf16.vlgmr.msrb.gmra.mxu2 %v8333_v3  ;;  %v5897_v44 = vor.u32 %v7616_v35, %v5896_v30  ;;  %v7053_v53 = vor.u32 %v7888_v41, %v7050_v42  ;;  %v7520_v20 = vld [vmem:[#allocation11 + $0x1ac] sm:$0xf0]  ;;  %v7472_v39 = vld [vmem:[#allocation11 + $0x34] sm:$0xf] }
 0x242   :  { %4265 = vmatpush.bf16.msrb.mxu3 %v6017_v55  ;;  %v604_v27 = vpop.xlane.xlu0 %603  ;;  %v6530_v55 = vld [vmem:[#allocation11 + $0x9a8] sm:$0xf0]  ;;  %v6664_v21 = vld [vmem:[#allocation11 + $0xa30] sm:$0xf]  ;;  %v5386_v40 = vld [vmem:[#allocation11 + $0xb0] sm:$0xf0] }
 0x243   :  { %4277 = vmatpush.bf16.msra.mxu0 %v7169_v56  ;;  %4291 = vmatpush.bf16.msra.mxu1 %v6021_v57  ;;  %v605_v31 = vadd.f32 %v604_v27, %v159_v18  ;;  %v6280_v56 = vld [vmem:[#allocation11 + $0x730] sm:$0xf]  ;;  %v6533_v0 = vor.u32 %v7759_v54, %v6530_v55  ;;  %v6153_v18 = vor.u32 %v7680_v8, %v6152_v7  ;;  %v7920_v27 = vld [vmem:[#allocation11 + $0xe34] sm:$0xf] }
 0x244   :  { %4303 = vmatpush.bf16.msra.mxu2 %v7173_v61  ;;  %v7712_v57 = vld [vmem:[#allocation11 + $0x7ac] sm:$0xf0]  ;;  %v6529_v61 = vor.u32 %v7775_v49, %v6528_v48  ;;  %v7568_v55 = vld [vmem:[#allocation11 + $0x334] sm:$0xf] }
 0x245   :  { %4909 = vperm.xlu1 %7993, %v605_v31   ;;  %v6281_v1 = vor.u32 %v7712_v57, %v6280_v56  ;;  %v8355_v31 = vld [vmem:[#allocation13] sm:$0xff]  ;;  %v5768_v49 = vld [vmem:[#allocation11 + $0x330] sm:$0xf]  ;;  %v5770_v56 = vld [vmem:[#allocation11 + $0x3b0] sm:$0xf0] }
 0x246   :  { %4266 = vmatpush.bf16.msrb.mxu3 %v5889_v4  ;;  %v7727_v4 = vld [vmem:[#allocation11 + $0x82c] sm:$0xf]  ;;  %v7872_v54 = vld [vmem:[#allocation11 + $0xcac] sm:$0xf0]  ;;  %v5773_v63 = vor.u32 %v7568_v55, %v5770_v56  ;;  %v7760_v41 = vld [vmem:[#allocation11 + $0x934] sm:$0xf] }
 0x247   :  { %4278 = vmatpush.bf16.msra.mxu0 %v7041_v5  ;;  %4292 = vmatpush.bf16.msra.mxu1 %v5893_v6  ;;  %v6402_v5 = vld [vmem:[#allocation11 + $0x8a8] sm:$0xf0]  ;;  %v6285_v6 = vor.u32 %v7696_v59, %v6282_v60  ;;  %v6922_v59 = vld [vmem:[#allocation11 + $0xcb0] sm:$0xf0]  ;;  %v7840_v8 = vld [vmem:[#allocation11 + $0xbac] sm:$0xf0] }
 0x248   :  { %4304 = vmatpush.bf16.msra.mxu2 %v7045_v11  ;;  %v7968_v11 = vld [vmem:[#allocation11 + $0xfac] sm:$0xf0] }
 0x249   :  { %v7488_v35 = vld [vmem:[#allocation11 + $0xac] sm:$0xf0] }
 0x24a   :  { %4267 = vmatpush.bf16.msrb.mxu3 %v5761_v17  ;;  %v6405_v17 = vor.u32 %v7727_v4, %v6402_v5  ;;  %v6792_v4 = vld [vmem:[#allocation11 + $0xb30] sm:$0xf] }
 0x24b   :  { %4279 = vmatpush.bf16.msra.mxu0 %v6913_v19  ;;  %4293 = vmatpush.bf16.msra.mxu1 %v5765_v9  ;;  %v7305_v19 = vor.u32 %v7968_v11, %v7304_v10  ;;  %v6157_v9 = vor.u32 %v7664_v12, %v6154_v13  ;;  %v7536_v10 = vld [vmem:[#allocation11 + $0x234] sm:$0xf]  ;;  %v6408_v55 = vld [vmem:[#allocation11 + $0x830] sm:$0xf] }
 0x24c   :  { %4305 = vmatpush.bf16.msra.mxu2 %v6917_v23  ;;  %v7309_v23 = vor.u32 %v7952_v15, %v7306_v16  ;;  %v5642_v11 = vld [vmem:[#allocation11 + $0x2b0] sm:$0xf0] }
 0x24d   :  { %v7824_v13 = vld [vmem:[#allocation11 + $0xb34] sm:$0xf] }
 0x24e   :  { %4268 = vmatpush.bf16.msrb.mxu3 %v5633_v32  ;;  %v7177_v32 = vor.u32 %v7936_v24, %v7176_v22  ;;  %v7504_v24 = vld [vmem:[#allocation11 + $0x134] sm:$0xf] }
 0x24f   :  { %4280 = vmatpush.bf16.msra.mxu0 %v6785_v33  ;;  %4294 = vmatpush.bf16.msra.mxu1 %v5637_v34  ;;  %v6029_v33 = vor.u32 %v7632_v25, %v6026_v26  ;;  %v5514_v25 = vld [vmem:[#allocation11 + $0x1b0] sm:$0xf0] }
 0x250   :  { %4306 = vmatpush.bf16.msra.mxu2 %v6789_v37  ;;  %v7181_v37 = vor.u32 %v7920_v27, %v7178_v28  ;;  %v7792_v27 = vld [vmem:[#allocation11 + $0xa34] sm:$0xf] }
 0x251   :  { %v6666_v28 = vld [vmem:[#allocation11 + $0xab0] sm:$0xf0] }
 0x252   :  { %4269 = vmatpush.bf16.msrb.mxu3 %v5505_v43  ;;  %v1380_v43 = vperm.slane %v8355_v31, 1 }
 0x253   :  { %4281 = vmatpush.bf16.msra.mxu0 %v6657_v45  ;;  %4295 = vmatpush.bf16.msra.mxu1 %v5509_v46  ;;  %v1379_v45 = vperm.slane %v8355_v31, 0  ;;  %v7049_v46 = vor.u32 %v7904_v38, %v7048_v36  ;;  %v6536_v36 = vld [vmem:[#allocation11 + $0x930] sm:$0xf]  ;;  %v6669_v38 = vor.u32 %v7792_v27, %v6666_v28  ;;  %v6034_v27 = vld [vmem:[#allocation11 + $0x5b8] sm:$0xf0] }
 0x254   :  { %4307 = vmatpush.bf16.msra.mxu2 %v6661_v50  ;;  %v7584_v50 = vld [vmem:[#allocation11 + $0x3ac] sm:$0xf0] }
 0x256   :  { %4270 = vmatpush.bf16.msrb.mxu3 %v5377_v58  ;;  %v4038_v34 = vpop.f32.mrf.mxu1  ;;  %v7856_v58 = vld [vmem:[#allocation11 + $0xc34] sm:$0xf] }
 0x257   :  { %4282 = vmatpush.bf16.msra.mxu0 %v6529_v61  ;;  %4296 = vmatpush.bf16.msra.mxu1 %v5381_v62  ;;  %v5769_v61 = vor.u32 %v7584_v50, %v5768_v49  ;;  %v6921_v62 = vor.u32 %v7872_v54, %v6920_v51  ;;  %v4039_v5 = vadd.f32 %v4038_v34, %v1380_v43  ;;  %v6538_v43 = vld [vmem:[#allocation11 + $0x9b0] sm:$0xf0]  ;;  %v1381_v49 = vperm.slane %v8355_v31, 2 }
 0x258   :  { %4308 = vmatpush.bf16.msra.mxu2 %v6533_v0  ;;  %v6925_v7 = vor.u32 %v7856_v58, %v6922_v59  ;;  %v5517_v34 = vor.u32 %v7504_v24, %v5514_v25  ;;  %v1382_v50 = vperm.slane %v8355_v31, 3  ;;  %v6541_v56 = vor.u32 %v7760_v41, %v6538_v43  ;;  %v7744_v58 = vld [vmem:[#allocation11 + $0x8ac] sm:$0xf0]  ;;  %v7728_v59 = vld [vmem:[#allocation11 + $0x834] sm:$0xf] }
 0x259   :  { %4271 = vmatmul.bf16.vlgmr.msrb.gmra.mxu3 %v8329_v52  ;;  %v7937_v25 = vld [vmem:[#allocation11 + $0xeb4] sm:$0xf0]  ;;  %v7601_v41 = vld [vmem:[#allocation11 + $0x43c] sm:$0xf] }
 0x25a   :  { %4315 = vmatpush.bf16.msra.mxu3 %v6281_v1  ;;  %4297 = vmatmul.bf16.vlgmr.msra.gmra.mxu1 %v8329_v52  ;;  %v4025_v48 = vpop.f32.mrf.mxu0  ;;  %v5640_v1 = vld [vmem:[#allocation11 + $0x230] sm:$0xf]  ;;  %v7889_v43 = vld [vmem:[#allocation11 + $0xd3c] sm:$0xf] }
 0x25b   :  { %4341 = vmatpush.bf16.msrb.mxu1 %v6285_v6  ;;  %4283 = vmatpush.bf16.msra.mxu0 %v6401_v14  ;;  %v6794_v14 = vld [vmem:[#allocation11 + $0xbb0] sm:$0xf0]  ;;  %v5641_v16 = vor.u32 %v7552_v2, %v5640_v1  ;;  %v7312_v1 = vld [vmem:[#allocation11 + $0xf38] sm:$0xf] }
 0x25c   :  { %4309 = vmatpush.bf16.msra.mxu2 %v6405_v17  ;;  %v4012_v57 = vpop.f32.mrf.mxu3  ;;  %v6793_v17 = vor.u32 %v7840_v8, %v6792_v4  ;;  %v6797_v22 = vor.u32 %v7824_v13, %v6794_v14  ;;  %v7969_v4 = vld [vmem:[#allocation11 + $0xfb4] sm:$0xf0]  ;;  %v6409_v8 = vor.u32 %v7744_v58, %v6408_v55  ;;  %v7314_v13 = vld [vmem:[#allocation11 + $0xfb8] sm:$0xf0]  ;;  %v1383_v58 = vperm.slane %v8355_v31, 4 }
 0x25d   :  { %v4013_v60 = vadd.f32 %v4012_v57, %v1379_v45  ;;  %v7713_v45 = vld [vmem:[#allocation11 + $0x7b4] sm:$0xf0] }
 0x25e   :  { %4316 = vmatpush.bf16.msra.mxu3 %v6153_v18  ;;  %4284 = vmatmul.bf16.vlgmr.msra.gmra.mxu0 %v8333_v3  ;;  %v4040_v0 = vpop.f32.mrf.mxu1  ;;  %v5645_v18 = vor.u32 %v7536_v10, %v5642_v11 }
 0x25f   :  { %4328 = vmatpush.bf16.msrb.mxu0 %v7305_v19  ;;  %4342 = vmatpush.bf16.msrb.mxu1 %v6157_v9  ;;  %v8361_v6 = vadd.f32 %v4025_v48, %v4013_v60  ;;  %v5512_v9 = vld [vmem:[#allocation11 + $0x130] sm:$0xf]  ;;  %v6290_v48 = vld [vmem:[#allocation11 + $0x7b8] sm:$0xf0]  ;;  %v6410_v60 = vld [vmem:[#allocation11 + $0x8b0] sm:$0xf0] }
 0x260   :  { %4354 = vmatpush.bf16.msrb.mxu2 %v7309_v23  ;;  %v4051_v12 = vpop.f32.mrf.mxu2  ;;  %v7808_v23 = vld [vmem:[#allocation11 + $0xaac] sm:$0xf0]  ;;  %v7681_v0 = vld [vmem:[#allocation11 + $0x6b4] sm:$0xf0]  ;;  %v6413_v10 = vor.u32 %v7728_v59, %v6410_v60  ;;  %v7857_v60 = vld [vmem:[#allocation11 + $0xc3c] sm:$0xf] }
 0x261   :  { %4310 = vmatmul.bf16.vlgmr.msra.gmra.mxu2 %v8333_v3  ;;  %v8363_v15 = vadd.f32 %v4051_v12, %v4039_v5  ;;  %v7665_v5 = vld [vmem:[#allocation11 + $0x63c] sm:$0xf] }
 0x262   :  { %4317 = vmatpush.bf16.msra.mxu3 %v6025_v29  ;;  %v4027_v19 = vpop.f32.mrf.mxu0  ;;  %v5513_v29 = vor.u32 %v7520_v20, %v5512_v9  ;;  %v7953_v12 = vld [vmem:[#allocation11 + $0xf3c] sm:$0xf]  ;;  %v6032_v20 = vld [vmem:[#allocation11 + $0x538] sm:$0xf] }
 0x263   :  { %4329 = vmatpush.bf16.msrb.mxu0 %v7177_v32  ;;  %4343 = vmatpush.bf16.msrb.mxu1 %v6029_v33  ;;  %v5384_v32 = vld [vmem:[#allocation11 + $0x30] sm:$0xf]  ;;  %v6665_v33 = vor.u32 %v7808_v23, %v6664_v21  ;;  %v7649_v21 = vld [vmem:[#allocation11 + $0x5b4] sm:$0xf0]  ;;  %v7317_v23 = vor.u32 %v7953_v12, %v7314_v13  ;;  %v7537_v12 = vld [vmem:[#allocation11 + $0x23c] sm:$0xf] }
 0x264   :  { %4355 = vmatpush.bf16.msrb.mxu2 %v7181_v37  ;;  %v4014_v26 = vpop.f32.mrf.mxu3  ;;  %v7776_v37 = vld [vmem:[#allocation11 + $0x9ac] sm:$0xf0]  ;;  %v5650_v13 = vld [vmem:[#allocation11 + $0x2b8] sm:$0xf0] }
 0x265   :  { %v6537_v51 = vor.u32 %v7776_v37, %v6536_v36  ;;  %v7633_v26 = vld [vmem:[#allocation11 + $0x53c] sm:$0xf]  ;;  %v5904_v36 = vld [vmem:[#allocation11 + $0x438] sm:$0xf] }
 0x266   :  { %4318 = vmatpush.bf16.msra.mxu3 %v5897_v44  ;;  %v4090_v30 = vpop.f32.mrf.mxu1  ;;  %v6288_v44 = vld [vmem:[#allocation11 + $0x738] sm:$0xf] }
 0x267   :  { %4330 = vmatpush.bf16.msrb.mxu0 %v7049_v46  ;;  %4344 = vmatpush.bf16.msrb.mxu1 %v5901_v47  ;;  %v5385_v46 = vor.u32 %v7488_v35, %v5384_v32  ;;  %v7697_v47 = vld [vmem:[#allocation11 + $0x73c] sm:$0xf]  ;;  %v6289_v57 = vor.u32 %v7713_v45, %v6288_v44  ;;  %v4091_v14 = vadd.f32 %v4090_v30, %v1382_v50  ;;  %v7617_v37 = vld [vmem:[#allocation11 + $0x4b4] sm:$0xf0] }
 0x268   :  { %4356 = vmatpush.bf16.msrb.mxu2 %v7053_v53  ;;  %v4053_v42 = vpop.f32.mrf.mxu2  ;;  %v5389_v53 = vor.u32 %v7472_v39, %v5386_v40  ;;  %v7186_v32 = vld [vmem:[#allocation11 + $0xeb8] sm:$0xf0]  ;;  %v6037_v30 = vor.u32 %v7633_v26, %v6034_v27  ;;  %v7905_v40 = vld [vmem:[#allocation11 + $0xdb4] sm:$0xf0] }
 0x269   :  { %v5906_v42 = vld [vmem:[#allocation11 + $0x4b8] sm:$0xf0]  ;;  %v6672_v26 = vld [vmem:[#allocation11 + $0xa38] sm:$0xf] }
 0x26a   :  { %4319 = vmatpush.bf16.msra.mxu3 %v5769_v61  ;;  %v4077_v54 = vpop.f32.mrf.mxu0  ;;  %v6293_v61 = vor.u32 %v7697_v47, %v6290_v48  ;;  %v7058_v44 = vld [vmem:[#allocation11 + $0xdb8] sm:$0xf0]  ;;  %v5776_v47 = vld [vmem:[#allocation11 + $0x338] sm:$0xf] }
 0x26b   :  { %4331 = vmatpush.bf16.msrb.mxu0 %v6921_v62  ;;  %4345 = vmatpush.bf16.msrb.mxu1 %v5773_v63  ;;  %v6160_v63 = vld [vmem:[#allocation11 + $0x638] sm:$0xf]  ;;  %v7061_v55 = vor.u32 %v7889_v43, %v7058_v44 }
 0x26c   :  { %4357 = vmatpush.bf16.msrb.mxu2 %v6925_v7  ;;  %v4064_v62 = vpop.f32.mrf.mxu3  ;;  %v6162_v7 = vld [vmem:[#allocation11 + $0x6b8] sm:$0xf0]  ;;  %v6544_v43 = vld [vmem:[#allocation11 + $0x938] sm:$0xf] }
 0x26d   :  { %v4065_v2 = vadd.f32 %v4064_v62, %v1381_v49  ;;  %v6165_v19 = vor.u32 %v7665_v5, %v6162_v7  ;;  %v5909_v49 = vor.u32 %v7601_v41, %v5906_v42  ;;  %v1384_v62 = vperm.slane %v8355_v31, 5  ;;  %v7553_v5 = vld [vmem:[#allocation11 + $0x2b4] sm:$0xf0] }
 0x26e   :  { %4320 = vmatpush.bf16.msra.mxu3 %v5641_v16  ;;  %v4092_v11 = vpop.f32.mrf.mxu1  ;;  %v6800_v7 = vld [vmem:[#allocation11 + $0xb38] sm:$0xf] }
 0x26f   :  { %4332 = vmatpush.bf16.msrb.mxu0 %v6793_v17  ;;  %4346 = vmatpush.bf16.msrb.mxu1 %v5645_v18  ;;  %v8367_v16 = vadd.f32 %v4077_v54, %v4065_v2  ;;  %v6161_v17 = vor.u32 %v7681_v0, %v6160_v63  ;;  %v7313_v18 = vor.u32 %v7969_v4, %v7312_v1  ;;  %v7873_v54 = vld [vmem:[#allocation11 + $0xcb4] sm:$0xf0] }
 0x270   :  { %4358 = vmatpush.bf16.msrb.mxu2 %v6797_v22  ;;  %v4103_v9 = vpop.f32.mrf.mxu2  ;;  %v7184_v22 = vld [vmem:[#allocation11 + $0xe38] sm:$0xf] }
 0x271   :  { %v8371_v24 = vadd.f32 %v4103_v9, %v4091_v14  ;;  %v5648_v4 = vld [vmem:[#allocation11 + $0x238] sm:$0xf]  ;;  %v7825_v14 = vld [vmem:[#allocation11 + $0xb3c] sm:$0xf] }
 0x272   :  { %4321 = vmatpush.bf16.msra.mxu3 %v5513_v29  ;;  %v4079_v28 = vpop.f32.mrf.mxu0  ;;  %v7921_v29 = vld [vmem:[#allocation11 + $0xe3c] sm:$0xf]  ;;  %v7841_v11 = vld [vmem:[#allocation11 + $0xbb4] sm:$0xf0]  ;;  %v5649_v9 = vor.u32 %v7553_v5, %v5648_v4  ;;  %v7682_v4 = vld [vmem:[#allocation11 + $0x6bc] sm:$0xf0] }
 0x273   :  { %4333 = vmatpush.bf16.msrb.mxu0 %v6665_v33  ;;  %4347 = vmatpush.bf16.msrb.mxu1 %v5517_v34  ;;  %v6033_v33 = vor.u32 %v7649_v21, %v6032_v20  ;;  %v7185_v34 = vor.u32 %v7937_v25, %v7184_v22  ;;  %v7189_v39 = vor.u32 %v7921_v29, %v7186_v32  ;;  %v7521_v25 = vld [vmem:[#allocation11 + $0x1b4] sm:$0xf0]  ;;  %v7505_v32 = vld [vmem:[#allocation11 + $0x13c] sm:$0xf]  ;;  %v7320_v5 = vld [vmem:[#allocation11 + $0xf40] sm:$0xf] }
 0x274   :  { %4359 = vmatpush.bf16.msrb.mxu2 %v6669_v38  ;;  %v4066_v35 = vpop.f32.mrf.mxu3  ;;  %v7056_v38 = vld [vmem:[#allocation11 + $0xd38] sm:$0xf]  ;;  %v6801_v21 = vor.u32 %v7841_v11, %v6800_v7  ;;  %v5653_v22 = vor.u32 %v7537_v12, %v5650_v13  ;;  %v7970_v7 = vld [vmem:[#allocation11 + $0xfbc] sm:$0xf0]  ;;  %v7954_v12 = vld [vmem:[#allocation11 + $0xf44] sm:$0xf] }
 0x275   :  { %v7057_v48 = vor.u32 %v7905_v40, %v7056_v38  ;;  %v7809_v29 = vld [vmem:[#allocation11 + $0xab4] sm:$0xf0]  ;;  %v7793_v35 = vld [vmem:[#allocation11 + $0xa3c] sm:$0xf]  ;;  %v7322_v13 = vld [vmem:[#allocation11 + $0xfc0] sm:$0xf0] }
 0x276   :  { %4322 = vmatpush.bf16.msra.mxu3 %v5385_v46  ;;  %v5905_v46 = vor.u32 %v7617_v37, %v5904_v36  ;;  %v6674_v36 = vld [vmem:[#allocation11 + $0xab8] sm:$0xf0]  ;;  %v5392_v38 = vld [vmem:[#allocation11 + $0x38] sm:$0xf] }
 0x277   :  { %4334 = vmatpush.bf16.msrb.mxu0 %v6537_v51  ;;  %4348 = vmatpush.bf16.msrb.mxu1 %v5389_v53  ;;  %v7585_v51 = vld [vmem:[#allocation11 + $0x3b4] sm:$0xf0] }
 0x278   :  { %4360 = vmatpush.bf16.msrb.mxu2 %v6541_v56  ;;  %v4105_v50 = vpop.f32.mrf.mxu2  ;;  %v6928_v53 = vld [vmem:[#allocation11 + $0xc38] sm:$0xf]  ;;  %v7569_v56 = vld [vmem:[#allocation11 + $0x33c] sm:$0xf]  ;;  %v5777_v63 = vor.u32 %v7585_v51, %v5776_v47  ;;  %v7714_v51 = vld [vmem:[#allocation11 + $0x7bc] sm:$0xf0] }
 0x279   :  { %4323 = vmatmul.bf16.vlgmr.msra.gmra.mxu3 %v8329_v52  ;;  %v4142_v45 = vpop.f32.mrf.mxu1  ;;  %v6929_v0 = vor.u32 %v7873_v54, %v6928_v53  ;;  %v7489_v42 = vld [vmem:[#allocation11 + $0xb4] sm:$0xf0]  ;;  %v5394_v47 = vld [vmem:[#allocation11 + $0xb8] sm:$0xf0]  ;;  %v6296_v50 = vld [vmem:[#allocation11 + $0x740] sm:$0xf] }
 0x27a   :  { %4367 = vmatpush.bf16.msrb.mxu3 %v6289_v57  ;;  %4349 = vmatmul.bf16.vlgmr.msrb.gmra.mxu1 %v8329_v52  ;;  %v5778_v57 = vld [vmem:[#allocation11 + $0x3b8] sm:$0xf0]  ;;  %v4129_v59 = vpop.f32.mrf.mxu0  ;;  %v4143_v20 = vadd.f32 %v4142_v45, %v1384_v62  ;;  %v7777_v44 = vld [vmem:[#allocation11 + $0x9b4] sm:$0xf0]  ;;  %v6677_v45 = vor.u32 %v7793_v35, %v6674_v36  ;;  %v5393_v53 = vor.u32 %v7489_v42, %v5392_v38  ;;  %v7698_v54 = vld [vmem:[#allocation11 + $0x744] sm:$0xf] }
 0x27b   :  { %4393 = vmatpush.bf16.msra.mxu1 %v6293_v61  ;;  %4335 = vmatpush.bf16.msrb.mxu0 %v6409_v8  ;;  %v6930_v61 = vld [vmem:[#allocation11 + $0xcb8] sm:$0xf0]  ;;  %v5781_v1 = vor.u32 %v7569_v56, %v5778_v57  ;;  %v6545_v56 = vor.u32 %v7777_v44, %v6544_v43  ;;  %v7745_v62 = vld [vmem:[#allocation11 + $0x8b4] sm:$0xf0]  ;;  %v5912_v35 = vld [vmem:[#allocation11 + $0x440] sm:$0xf] }
 0x27c   :  { %4361 = vmatpush.bf16.msrb.mxu2 %v6413_v10  ;;  %v4116_v2 = vpop.f32.mrf.mxu3  ;;  %v6933_v8 = vor.u32 %v7857_v60, %v6930_v61  ;;  %v6297_v60 = vor.u32 %v7714_v51, %v6296_v50  ;;  %v7618_v36 = vld [vmem:[#allocation11 + $0x4bc] sm:$0xf0]  ;;  %v7890_v43 = vld [vmem:[#allocation11 + $0xd44] sm:$0xf] }
 0x27d   :  { %v4117_v10 = vadd.f32 %v4116_v2, %v1383_v58  ;;  %v6416_v58 = vld [vmem:[#allocation11 + $0x838] sm:$0xf]  ;;  %v6168_v2 = vld [vmem:[#allocation11 + $0x640] sm:$0xf]  ;;  %v7066_v44 = vld [vmem:[#allocation11 + $0xdc0] sm:$0xf0] }
 0x27e   :  { %4368 = vmatpush.bf16.msrb.mxu3 %v6161_v17  ;;  %4336 = vmatmul.bf16.vlgmr.msrb.gmra.mxu0 %v8333_v3  ;;  %v6802_v17 = vld [vmem:[#allocation11 + $0xbb8] sm:$0xf0]  ;;  %v6417_v11 = vor.u32 %v7745_v62, %v6416_v58  ;;  %v6936_v50 = vld [vmem:[#allocation11 + $0xc40] sm:$0xf]  ;;  %v7858_v58 = vld [vmem:[#allocation11 + $0xc44] sm:$0xf] }
 0x27f   :  { %4380 = vmatpush.bf16.msra.mxu0 %v7313_v18  ;;  %4394 = vmatpush.bf16.msra.mxu1 %v6165_v19  ;;  %v8377_v18 = vadd.f32 %v4129_v59, %v4117_v10  ;;  %v6805_v27 = vor.u32 %v7825_v14, %v6802_v17  ;;  %v6170_v10 = vld [vmem:[#allocation11 + $0x6c0] sm:$0xf0]  ;;  %v6169_v17 = vor.u32 %v7682_v4, %v6168_v2  ;;  %v7874_v51 = vld [vmem:[#allocation11 + $0xcbc] sm:$0xf0] }
 0x280   :  { %4406 = vmatpush.bf16.msra.mxu2 %v7317_v23  ;;  %v5520_v23 = vld [vmem:[#allocation11 + $0x138] sm:$0xf]  ;;  %v6937_v62 = vor.u32 %v7874_v51, %v6936_v50  ;;  %v7554_v2 = vld [vmem:[#allocation11 + $0x2bc] sm:$0xf0]  ;;  %v7715_v50 = vld [vmem:[#allocation11 + $0x7c4] sm:$0xf0] }
 0x281   :  { %4362 = vmatmul.bf16.vlgmr.msrb.gmra.mxu2 %v8333_v3  ;;  %v4144_v19 = vpop.f32.mrf.mxu1  ;;  %v5521_v37 = vor.u32 %v7521_v25, %v5520_v23  ;;  %v7325_v23 = vor.u32 %v7954_v12, %v7322_v13  ;;  %v7938_v25 = vld [vmem:[#allocation11 + $0xebc] sm:$0xf0]  ;;  %v7826_v13 = vld [vmem:[#allocation11 + $0xb44] sm:$0xf] }
 0x282   :  { %4369 = vmatpush.bf16.msrb.mxu3 %v6033_v33  ;;  %v5522_v33 = vld [vmem:[#allocation11 + $0x1b8] sm:$0xf0]  ;;  %v7321_v19 = vor.u32 %v7970_v7, %v7320_v5  ;;  %v6808_v4 = vld [vmem:[#allocation11 + $0xb40] sm:$0xf] }
 0x283   :  { %4381 = vmatpush.bf16.msra.mxu0 %v7185_v34  ;;  %4395 = vmatpush.bf16.msra.mxu1 %v6037_v30  ;;  %v4155_v28 = vpop.f32.mrf.mxu2  ;;  %v4131_v30 = vpop.f32.mrf.mxu0  ;;  %v5525_v40 = vor.u32 %v7505_v32, %v5522_v33 }
 0x284   :  { %4407 = vmatpush.bf16.msra.mxu2 %v7189_v39  ;;  %v8379_v34 = vadd.f32 %v4155_v28, %v4143_v20  ;;  %v6673_v39 = vor.u32 %v7809_v29, %v6672_v26  ;;  %v4118_v41 = vpop.f32.mrf.mxu3  ;;  %v6040_v20 = vld [vmem:[#allocation11 + $0x540] sm:$0xf]  ;;  %v7634_v26 = vld [vmem:[#allocation11 + $0x544] sm:$0xf] }
 0x285   :  { %v7922_v28 = vld [vmem:[#allocation11 + $0xe44] sm:$0xf] }
 0x286   :  { %4370 = vmatpush.bf16.msrb.mxu3 %v5905_v46  ;;  %v7473_v46 = vld [vmem:[#allocation11 + $0x3c] sm:$0xf]  ;;  %v7194_v29 = vld [vmem:[#allocation11 + $0xec0] sm:$0xf0] }
 0x287   :  { %4382 = vmatpush.bf16.msra.mxu0 %v7057_v48  ;;  %4396 = vmatpush.bf16.msra.mxu1 %v5909_v49  ;;  %v7761_v48 = vld [vmem:[#allocation11 + $0x93c] sm:$0xf]  ;;  %v5397_v57 = vor.u32 %v7473_v46, %v5394_v47  ;;  %v7197_v38 = vor.u32 %v7922_v28, %v7194_v29  ;;  %v5914_v41 = vld [vmem:[#allocation11 + $0x4c0] sm:$0xf0]  ;;  %v5784_v46 = vld [vmem:[#allocation11 + $0x340] sm:$0xf] }
 0x288   :  { %4408 = vmatpush.bf16.msra.mxu2 %v7061_v55  ;;  %v6546_v49 = vld [vmem:[#allocation11 + $0x9b8] sm:$0xf0]  ;;  %v6298_v55 = vld [vmem:[#allocation11 + $0x7c0] sm:$0xf0] }
 0x289   :  { %v6549_v59 = vor.u32 %v7761_v48, %v6546_v49  ;;  %v7586_v49 = vld [vmem:[#allocation11 + $0x3bc] sm:$0xf0]  ;;  %v7506_v28 = vld [vmem:[#allocation11 + $0x144] sm:$0xf] }
 0x28a   :  { %4371 = vmatpush.bf16.msrb.mxu3 %v5777_v63  ;;  %v7729_v63 = vld [vmem:[#allocation11 + $0x83c] sm:$0xf]  ;;  %v5530_v29 = vld [vmem:[#allocation11 + $0x1c0] sm:$0xf0] }
 0x28b   :  { %4383 = vmatpush.bf16.msra.mxu0 %v6929_v0  ;;  %4397 = vmatpush.bf16.msra.mxu1 %v5781_v1  ;;  %v4157_v61 = vpop.f32.mrf.mxu2  ;;  %v6418_v0 = vld [vmem:[#allocation11 + $0x8b8] sm:$0xf0]  ;;  %v6301_v1 = vor.u32 %v7698_v54, %v6298_v55  ;;  %v7570_v54 = vld [vmem:[#allocation11 + $0x344] sm:$0xf] }
 0x28c   :  { %4409 = vmatpush.bf16.msra.mxu2 %v6933_v8  ;;  %v7666_v8 = vld [vmem:[#allocation11 + $0x644] sm:$0xf]  ;;  %v6421_v14 = vor.u32 %v7729_v63, %v6418_v0  ;;  %v5785_v61 = vor.u32 %v7586_v49, %v5784_v46  ;;  %v6304_v49 = vld [vmem:[#allocation11 + $0x748] sm:$0xf] }
 0x28d   :  { %v5786_v55 = vld [vmem:[#allocation11 + $0x3c0] sm:$0xf0] }
 0x28e   :  { %4372 = vmatpush.bf16.msrb.mxu3 %v5649_v9  ;;  %v6173_v9 = vor.u32 %v7666_v8, %v6170_v10  ;;  %v5789_v63 = vor.u32 %v7570_v54, %v5786_v55  ;;  %v7842_v8 = vld [vmem:[#allocation11 + $0xbbc] sm:$0xf0]  ;;  %v7538_v10 = vld [vmem:[#allocation11 + $0x244] sm:$0xf]  ;;  %v6306_v54 = vld [vmem:[#allocation11 + $0x7c8] sm:$0xf0] }
 0x28f   :  { %4384 = vmatpush.bf16.msra.mxu0 %v6801_v21  ;;  %4398 = vmatpush.bf16.msra.mxu1 %v5653_v22  ;;  %v7650_v21 = vld [vmem:[#allocation11 + $0x5bc] sm:$0xf0]  ;;  %v5402_v46 = vld [vmem:[#allocation11 + $0xc0] sm:$0xf0] }
 0x290   :  { %4410 = vmatpush.bf16.msra.mxu2 %v6805_v27  ;;  %v7192_v22 = vld [vmem:[#allocation11 + $0xe40] sm:$0xf]  ;;  %v6042_v27 = vld [vmem:[#allocation11 + $0x5c0] sm:$0xf0]  ;;  %v6041_v32 = vor.u32 %v7650_v21, %v6040_v20 }
 0x291   :  { %v7193_v33 = vor.u32 %v7938_v25, %v7192_v22  ;;  %v6045_v30 = vor.u32 %v7634_v26, %v6042_v27  ;;  %v5528_v21 = vld [vmem:[#allocation11 + $0x140] sm:$0xf] }
 0x292   :  { %4373 = vmatpush.bf16.msrb.mxu3 %v5521_v37  ;;  %v7064_v37 = vld [vmem:[#allocation11 + $0xd40] sm:$0xf] }
 0x293   :  { %4385 = vmatpush.bf16.msra.mxu0 %v6673_v39  ;;  %4399 = vmatpush.bf16.msra.mxu1 %v5525_v40  ;;  %v7906_v39 = vld [vmem:[#allocation11 + $0xdbc] sm:$0xf0]  ;;  %v7602_v40 = vld [vmem:[#allocation11 + $0x444] sm:$0xf] }
 0x294   :  { %4411 = vmatpush.bf16.msra.mxu2 %v6677_v45  ;;  %v5913_v45 = vor.u32 %v7618_v36, %v5912_v35  ;;  %v7065_v47 = vor.u32 %v7906_v39, %v7064_v37  ;;  %v5917_v48 = vor.u32 %v7602_v40, %v5914_v41  ;;  %v7522_v22 = vld [vmem:[#allocation11 + $0x1bc] sm:$0xf0]  ;;  %v6682_v35 = vld [vmem:[#allocation11 + $0xac0] sm:$0xf0]  ;;  %v5533_v39 = vor.u32 %v7506_v28, %v5530_v29  ;;  %v7202_v28 = vld [vmem:[#allocation11 + $0xec8] sm:$0xf0] }
 0x295   :  { %v7810_v27 = vld [vmem:[#allocation11 + $0xabc] sm:$0xf0]  ;;  %v5529_v36 = vor.u32 %v7522_v22, %v5528_v21  ;;  %v7200_v21 = vld [vmem:[#allocation11 + $0xe48] sm:$0xf] }
 0x296   :  { %4374 = vmatpush.bf16.msrb.mxu3 %v5393_v53  ;;  %v7069_v53 = vor.u32 %v7890_v43, %v7066_v44  ;;  %v5400_v37 = vld [vmem:[#allocation11 + $0x40] sm:$0xf] }
 0x297   :  { %4386 = vmatpush.bf16.msra.mxu0 %v6545_v56  ;;  %4400 = vmatpush.bf16.msra.mxu1 %v5397_v57  ;;  %v4194_v42 = vpop.f32.mrf.mxu1  ;;  %v1385_v56 = vperm.slane %v8355_v31, 6  ;;  %v7490_v41 = vld [vmem:[#allocation11 + $0xbc] sm:$0xf0] }
 0x298   :  { %4412 = vmatpush.bf16.msra.mxu2 %v6549_v59  ;;  %v6938_v59 = vld [vmem:[#allocation11 + $0xcc0] sm:$0xf0]  ;;  %v7778_v43 = vld [vmem:[#allocation11 + $0x9bc] sm:$0xf0]  ;;  %v5401_v51 = vor.u32 %v7490_v41, %v5400_v37  ;;  %v7072_v37 = vld [vmem:[#allocation11 + $0xd48] sm:$0xf] }
 0x299   :  { %4375 = vmatmul.bf16.vlgmr.msrb.gmra.mxu3 %v8329_v52  ;;  %v6941_v5 = vor.u32 %v7858_v58, %v6938_v59  ;;  %v5922_v41 = vld [vmem:[#allocation11 + $0x4c8] sm:$0xf0] }
 0x29a   :  { %4419 = vmatpush.bf16.msra.mxu3 %v6297_v60  ;;  %4401 = vmatmul.bf16.vlgmr.msra.gmra.mxu1 %v8329_v52  ;;  %v1386_v60 = vperm.slane %v8355_v31, 7 }
 0x29b   :  { %4445 = vmatpush.bf16.msrb.mxu1 %v6301_v1  ;;  %4387 = vmatpush.bf16.msra.mxu0 %v6417_v11  ;;  %v4181_v57 = vpop.f32.mrf.mxu0  ;;  %v5656_v1 = vld [vmem:[#allocation11 + $0x240] sm:$0xf]  ;;  %v5658_v11 = vld [vmem:[#allocation11 + $0x2c0] sm:$0xf0] }
 0x29c   :  { %4413 = vmatpush.bf16.msra.mxu2 %v6421_v14  ;;  %v4168_v0 = vpop.f32.mrf.mxu3  ;;  %v6810_v14 = vld [vmem:[#allocation11 + $0xbc0] sm:$0xf0]  ;;  %v5661_v20 = vor.u32 %v7538_v10, %v5658_v11  ;;  %v7955_v11 = vld [vmem:[#allocation11 + $0xf4c] sm:$0xf] }
 0x29d   :  { %v4169_v7 = vadd.f32 %v4168_v0, %v1385_v56  ;;  %v6813_v25 = vor.u32 %v7826_v13, %v6810_v14 }
 0x29e   :  { %4420 = vmatpush.bf16.msra.mxu3 %v6169_v17  ;;  %4388 = vmatmul.bf16.vlgmr.msra.gmra.mxu0 %v8333_v3  ;;  %v5657_v17 = vor.u32 %v7554_v2, %v5656_v1  ;;  %v6176_v1 = vld [vmem:[#allocation11 + $0x648] sm:$0xf] }
 0x29f   :  { %4432 = vmatpush.bf16.msrb.mxu0 %v7321_v19  ;;  %4446 = vmatpush.bf16.msrb.mxu1 %v6173_v9  ;;  %v4196_v12 = vpop.f32.mrf.mxu1  ;;  %v8387_v31 = vadd.f32 %v4181_v57, %v4169_v7  ;;  %v4195_v19 = vadd.f32 %v4194_v42, %v1386_v60  ;;  %v6809_v9 = vor.u32 %v7842_v8, %v6808_v4  ;;  %v6552_v42 = vld [vmem:[#allocation11 + $0x940] sm:$0xf]  ;;  %v7683_v2 = vld [vmem:[#allocation11 + $0x6c4] sm:$0xf0]  ;;  %v7667_v7 = vld [vmem:[#allocation11 + $0x64c] sm:$0xf] }
 0x2a0   :  { %4458 = vmatpush.bf16.msrb.mxu2 %v7325_v23  ;;  %v6680_v23 = vld [vmem:[#allocation11 + $0xa40] sm:$0xf]  ;;  %v6553_v55 = vor.u32 %v7778_v43, %v6552_v42  ;;  %v6305_v60 = vor.u32 %v7715_v50, %v6304_v49  ;;  %v7328_v4 = vld [vmem:[#allocation11 + $0xf48] sm:$0xf]  ;;  %v6178_v8 = vld [vmem:[#allocation11 + $0x6c8] sm:$0xf0]  ;;  %v6177_v14 = vor.u32 %v7683_v2, %v6176_v1 }
 0x2a1   :  { %4414 = vmatmul.bf16.vlgmr.msra.gmra.mxu2 %v8333_v3  ;;  %v6424_v57 = vld [vmem:[#allocation11 + $0x840] sm:$0xf]  ;;  %v7330_v12 = vld [vmem:[#allocation11 + $0xfc8] sm:$0xf0]  ;;  %v7587_v50 = vld [vmem:[#allocation11 + $0x3c4] sm:$0xf0] }
 0x2a2   :  { %4421 = vmatpush.bf16.msra.mxu3 %v6041_v32  ;;  %v7333_v22 = vor.u32 %v7955_v11, %v7330_v12  ;;  %v7891_v43 = vld [vmem:[#allocation11 + $0xd4c] sm:$0xf] }
 0x2a3   :  { %4433 = vmatpush.bf16.msrb.mxu0 %v7193_v33  ;;  %4447 = vmatpush.bf16.msrb.mxu1 %v6045_v30  ;;  %v4183_v33 = vpop.f32.mrf.mxu0  ;;  %v7794_v30 = vld [vmem:[#allocation11 + $0xa44] sm:$0xf]  ;;  %v7539_v11 = vld [vmem:[#allocation11 + $0x24c] sm:$0xf] }
 0x2a4   :  { %4459 = vmatpush.bf16.msrb.mxu2 %v7197_v38  ;;  %v4207_v26 = vpop.f32.mrf.mxu2  ;;  %v6681_v38 = vor.u32 %v7810_v27, %v6680_v23  ;;  %v4170_v40 = vpop.f32.mrf.mxu3  ;;  %v6685_v44 = vor.u32 %v7794_v30, %v6682_v35  ;;  %v7939_v23 = vld [vmem:[#allocation11 + $0xec4] sm:$0xf0]  ;;  %v7923_v27 = vld [vmem:[#allocation11 + $0xe4c] sm:$0xf] }
 0x2a5   :  { %v8389_v32 = vadd.f32 %v4207_v26, %v4195_v19  ;;  %v6181_v19 = vor.u32 %v7667_v7, %v6178_v8  ;;  %v6050_v26 = vld [vmem:[#allocation11 + $0x5c8] sm:$0xf0]  ;;  %v7201_v33 = vor.u32 %v7939_v23, %v7200_v21  ;;  %v5920_v35 = vld [vmem:[#allocation11 + $0x448] sm:$0xf] }
 0x2a6   :  { %4422 = vmatpush.bf16.msra.mxu3 %v5913_v45  ;;  %v7474_v45 = vld [vmem:[#allocation11 + $0x44] sm:$0xf]  ;;  %v7603_v40 = vld [vmem:[#allocation11 + $0x44c] sm:$0xf]  ;;  %v6816_v7 = vld [vmem:[#allocation11 + $0xb48] sm:$0xf] }
 0x2a7   :  { %4434 = vmatpush.bf16.msrb.mxu0 %v7065_v47  ;;  %4448 = vmatpush.bf16.msrb.mxu1 %v5917_v48  ;;  %v7762_v47 = vld [vmem:[#allocation11 + $0x944] sm:$0xf]  ;;  %v5405_v56 = vor.u32 %v7474_v45, %v5402_v46  ;;  %v8395_v45 = vld [vmem:[#allocation13 + $0x8] sm:$0xff]  ;;  %v5925_v49 = vor.u32 %v7603_v40, %v5922_v41 }
 0x2a8   :  { %4460 = vmatpush.bf16.msrb.mxu2 %v7069_v53  ;;  %v6554_v48 = vld [vmem:[#allocation11 + $0x9c0] sm:$0xf0]  ;;  %v7699_v53 = vld [vmem:[#allocation11 + $0x74c] sm:$0xf]  ;;  %v5536_v23 = vld [vmem:[#allocation11 + $0x148] sm:$0xf] }
 0x2a9   :  { %v6557_v58 = vor.u32 %v7762_v47, %v6554_v48  ;;  %v6309_v0 = vor.u32 %v7699_v53, %v6306_v54  ;;  %v5792_v47 = vld [vmem:[#allocation11 + $0x348] sm:$0xf]  ;;  %v1387_v53 = vperm.slane %v8395_v45, 0  ;;  %v5666_v12 = vld [vmem:[#allocation11 + $0x2c8] sm:$0xf0] }
 0x2aa   :  { %4423 = vmatpush.bf16.msra.mxu3 %v5785_v61  ;;  %v7746_v61 = vld [vmem:[#allocation11 + $0x8bc] sm:$0xf0]  ;;  %v5408_v41 = vld [vmem:[#allocation11 + $0x48] sm:$0xf] }
 0x2ab   :  { %4435 = vmatpush.bf16.msrb.mxu0 %v6937_v62  ;;  %4449 = vmatpush.bf16.msrb.mxu1 %v5789_v63  ;;  %v7730_v62 = vld [vmem:[#allocation11 + $0x844] sm:$0xf]  ;;  %v6425_v10 = vor.u32 %v7746_v61, %v6424_v57  ;;  %v5794_v57 = vld [vmem:[#allocation11 + $0x3c8] sm:$0xf0]  ;;  %v1388_v61 = vperm.slane %v8395_v45, 1 }
 0x2ac   :  { %4461 = vmatpush.bf16.msrb.mxu2 %v6941_v5  ;;  %v4209_v59 = vpop.f32.mrf.mxu2  ;;  %v6426_v63 = vld [vmem:[#allocation11 + $0x8c0] sm:$0xf0]  ;;  %v7971_v5 = vld [vmem:[#allocation11 + $0xfc4] sm:$0xf0] }
 0x2ad   :  { %v6429_v13 = vor.u32 %v7730_v62, %v6426_v63  ;;  %v7859_v59 = vld [vmem:[#allocation11 + $0xc4c] sm:$0xf]  ;;  %v5793_v62 = vor.u32 %v7587_v50, %v5792_v47  ;;  %v7779_v47 = vld [vmem:[#allocation11 + $0x9c4] sm:$0xf0] }
 0x2ae   :  { %4424 = vmatpush.bf16.msra.mxu3 %v5657_v17  ;;  %v7329_v17 = vor.u32 %v7971_v5, %v7328_v4  ;;  %v5664_v4 = vld [vmem:[#allocation11 + $0x248] sm:$0xf]  ;;  %v5410_v50 = vld [vmem:[#allocation11 + $0xc8] sm:$0xf0] }
 0x2af   :  { %4436 = vmatpush.bf16.msrb.mxu0 %v6809_v9  ;;  %4450 = vmatpush.bf16.msrb.mxu1 %v5661_v20  ;;  %v6048_v9 = vld [vmem:[#allocation11 + $0x548] sm:$0xf] }
 0x2b0   :  { %4462 = vmatpush.bf16.msrb.mxu2 %v6813_v25  ;;  %v7651_v20 = vld [vmem:[#allocation11 + $0x5c4] sm:$0xf0]  ;;  %v7635_v25 = vld [vmem:[#allocation11 + $0x54c] sm:$0xf] }
 0x2b1   :  { %v6049_v29 = vor.u32 %v7651_v20, %v6048_v9  ;;  %v6053_v30 = vor.u32 %v7635_v25, %v6050_v26  ;;  %v7555_v5 = vld [vmem:[#allocation11 + $0x2c4] sm:$0xf0] }
 0x2b2   :  { %4425 = vmatpush.bf16.msra.mxu3 %v5529_v36  ;;  %v7619_v36 = vld [vmem:[#allocation11 + $0x4c4] sm:$0xf0]  ;;  %v5665_v9 = vor.u32 %v7555_v5, %v5664_v4  ;;  %v6434_v4 = vld [vmem:[#allocation11 + $0x8c8] sm:$0xf0] }
 0x2b3   :  { %4437 = vmatpush.bf16.msrb.mxu0 %v6681_v38  ;;  %4451 = vmatpush.bf16.msrb.mxu1 %v5533_v39  ;;  %v7205_v38 = vor.u32 %v7923_v27, %v7202_v28  ;;  %v7907_v39 = vld [vmem:[#allocation11 + $0xdc4] sm:$0xf0]  ;;  %v5921_v46 = vor.u32 %v7619_v36, %v5920_v35 }
 0x2b4   :  { %4463 = vmatpush.bf16.msrb.mxu2 %v6685_v44  ;;  %v7074_v44 = vld [vmem:[#allocation11 + $0xdc8] sm:$0xf0]  ;;  %v7073_v48 = vor.u32 %v7907_v39, %v7072_v37  ;;  %v7523_v25 = vld [vmem:[#allocation11 + $0x1c4] sm:$0xf0] }
 0x2b5   :  { %v7077_v54 = vor.u32 %v7891_v43, %v7074_v44  ;;  %v6688_v26 = vld [vmem:[#allocation11 + $0xa48] sm:$0xf]  ;;  %v7795_v37 = vld [vmem:[#allocation11 + $0xa4c] sm:$0xf]  ;;  %v5537_v39 = vor.u32 %v7523_v25, %v5536_v23  ;;  %v6056_v25 = vld [vmem:[#allocation11 + $0x550] sm:$0xf] }
 0x2b6   :  { %4426 = vmatpush.bf16.msra.mxu3 %v5401_v51  ;;  %v6944_v51 = vld [vmem:[#allocation11 + $0xc48] sm:$0xf] }
 0x2b7   :  { %4438 = vmatpush.bf16.msrb.mxu0 %v6553_v55  ;;  %4452 = vmatpush.bf16.msrb.mxu1 %v5405_v56  ;;  %v4246_v42 = vpop.f32.mrf.mxu1  ;;  %v7875_v55 = vld [vmem:[#allocation11 + $0xcc4] sm:$0xf0]  ;;  %v7571_v56 = vld [vmem:[#allocation11 + $0x34c] sm:$0xf] }
 0x2b8   :  { %4464 = vmatpush.bf16.msrb.mxu2 %v6557_v58  ;;  %v5797_v1 = vor.u32 %v7571_v56, %v5794_v57  ;;  %v4247_v20 = vadd.f32 %v4246_v42, %v1388_v61  ;;  %v7491_v44 = vld [vmem:[#allocation11 + $0xc4] sm:$0xf0]  ;;  %v7700_v57 = vld [vmem:[#allocation11 + $0x754] sm:$0xf] }
 0x2b9   :  { %4427 = vmatmul.bf16.vlgmr.msra.gmra.mxu3 %v8329_v52  ;;  %v5409_v56 = vor.u32 %v7491_v44, %v5408_v41  ;;  %v6432_v61 = vld [vmem:[#allocation11 + $0x848] sm:$0xf]  ;;  %v5928_v41 = vld [vmem:[#allocation11 + $0x450] sm:$0xf] }
 0x2ba   :  { %4471 = vmatpush.bf16.msrb.mxu3 %v6305_v60  ;;  %4453 = vmatmul.bf16.vlgmr.msrb.gmra.mxu1 %v8329_v52  ;;  %v6946_v60 = vld [vmem:[#allocation11 + $0xcc8] sm:$0xf0] }
 0x2bb   :  { %4497 = vmatpush.bf16.msra.mxu1 %v6309_v0  ;;  %4439 = vmatpush.bf16.msrb.mxu0 %v6425_v10  ;;  %v4233_v58 = vpop.f32.mrf.mxu0  ;;  %v6945_v0 = vor.u32 %v7875_v55, %v6944_v51  ;;  %v6949_v8 = vor.u32 %v7859_v59, %v6946_v60  ;;  %v7843_v10 = vld [vmem:[#allocation11 + $0xbc4] sm:$0xf0]  ;;  %v7763_v51 = vld [vmem:[#allocation11 + $0x94c] sm:$0xf]  ;;  %v7716_v55 = vld [vmem:[#allocation11 + $0x7cc] sm:$0xf0] }
 0x2bc   :  { %4465 = vmatpush.bf16.msrb.mxu2 %v6429_v13  ;;  %v4220_v63 = vpop.f32.mrf.mxu3  ;;  %v6817_v21 = vor.u32 %v7843_v10, %v6816_v7  ;;  %v6184_v7 = vld [vmem:[#allocation11 + $0x650] sm:$0xf] }
 0x2bd   :  { %v4221_v2 = vadd.f32 %v4220_v63, %v1387_v53  ;;  %v6562_v53 = vld [vmem:[#allocation11 + $0x9c8] sm:$0xf0]  ;;  %v7336_v10 = vld [vmem:[#allocation11 + $0xf50] sm:$0xf] }
 0x2be   :  { %4472 = vmatpush.bf16.msrb.mxu3 %v6177_v14  ;;  %4440 = vmatmul.bf16.vlgmr.msrb.gmra.mxu0 %v8333_v3 }
 0x2bf   :  { %4484 = vmatpush.bf16.msra.mxu0 %v7329_v17  ;;  %4498 = vmatpush.bf16.msra.mxu1 %v6181_v19  ;;  %v8399_v13 = vadd.f32 %v4233_v58, %v4221_v2  ;;  %v4248_v14 = vpop.f32.mrf.mxu1  ;;  %v7827_v17 = vld [vmem:[#allocation11 + $0xb4c] sm:$0xf]  ;;  %v6314_v58 = vld [vmem:[#allocation11 + $0x7d0] sm:$0xf0] }
 0x2c0   :  { %4510 = vmatpush.bf16.msra.mxu2 %v7333_v22  ;;  %v6818_v19 = vld [vmem:[#allocation11 + $0xbc8] sm:$0xf0]  ;;  %v5669_v22 = vor.u32 %v7539_v11, %v5666_v12  ;;  %v6317_v5 = vor.u32 %v7700_v57, %v6314_v58  ;;  %v7972_v11 = vld [vmem:[#allocation11 + $0xfcc] sm:$0xf0]  ;;  %v7668_v12 = vld [vmem:[#allocation11 + $0x654] sm:$0xf] }
 0x2c1   :  { %4466 = vmatmul.bf16.vlgmr.msrb.gmra.mxu2 %v8333_v3  ;;  %v6821_v27 = vor.u32 %v7827_v17, %v6818_v19  ;;  %v7731_v2 = vld [vmem:[#allocation11 + $0x84c] sm:$0xf]  ;;  %v6186_v14 = vld [vmem:[#allocation11 + $0x6d0] sm:$0xf0]  ;;  %v7588_v57 = vld [vmem:[#allocation11 + $0x3cc] sm:$0xf0] }
 0x2c2   :  { %4473 = vmatpush.bf16.msrb.mxu3 %v6049_v29  ;;  %v7811_v29 = vld [vmem:[#allocation11 + $0xac4] sm:$0xf0]  ;;  %v7956_v19 = vld [vmem:[#allocation11 + $0xf54] sm:$0xf]  ;;  %v6189_v23 = vor.u32 %v7668_v12, %v6186_v14  ;;  %v6952_v58 = vld [vmem:[#allocation11 + $0xc50] sm:$0xf] }
 0x2c3   :  { %4485 = vmatpush.bf16.msra.mxu0 %v7201_v33  ;;  %4499 = vmatpush.bf16.msra.mxu1 %v6053_v30  ;;  %v7507_v33 = vld [vmem:[#allocation11 + $0x14c] sm:$0xf]  ;;  %v4235_v36 = vpop.f32.mrf.mxu0  ;;  %v6689_v42 = vor.u32 %v7811_v29, %v6688_v26  ;;  %v7652_v26 = vld [vmem:[#allocation11 + $0x5cc] sm:$0xf0] }
 0x2c4   :  { %4511 = vmatpush.bf16.msra.mxu2 %v7205_v38  ;;  %v4259_v28 = vpop.f32.mrf.mxu2  ;;  %v5538_v30 = vld [vmem:[#allocation11 + $0x1c8] sm:$0xf0]  ;;  %v4222_v40 = vpop.f32.mrf.mxu3  ;;  %v7940_v29 = vld [vmem:[#allocation11 + $0xecc] sm:$0xf0]  ;;  %v7924_v36 = vld [vmem:[#allocation11 + $0xe54] sm:$0xf] }
 0x2c5   :  { %v8401_v35 = vadd.f32 %v4259_v28, %v4247_v20  ;;  %v6690_v38 = vld [vmem:[#allocation11 + $0xac8] sm:$0xf0]  ;;  %v5541_v43 = vor.u32 %v7507_v33, %v5538_v30  ;;  %v6437_v20 = vor.u32 %v7731_v2, %v6434_v4  ;;  %v7636_v33 = vld [vmem:[#allocation11 + $0x554] sm:$0xf]  ;;  %v1390_v4 = vperm.slane %v8395_v45, 3 }
 0x2c6   :  { %4474 = vmatpush.bf16.msrb.mxu3 %v5921_v46  ;;  %v6560_v46 = vld [vmem:[#allocation11 + $0x948] sm:$0xf]  ;;  %v6058_v30 = vld [vmem:[#allocation11 + $0x5d0] sm:$0xf0]  ;;  %v5672_v12 = vld [vmem:[#allocation11 + $0x250] sm:$0xf] }
 0x2c7   :  { %4486 = vmatpush.bf16.msra.mxu0 %v7073_v48  ;;  %4500 = vmatpush.bf16.msra.mxu1 %v5925_v49  ;;  %v6693_v48 = vor.u32 %v7795_v37, %v6690_v38  ;;  %v7475_v49 = vld [vmem:[#allocation11 + $0x4c] sm:$0xf]  ;;  %v6561_v59 = vor.u32 %v7779_v47, %v6560_v46  ;;  %v7210_v37 = vld [vmem:[#allocation11 + $0xed0] sm:$0xf0]  ;;  %v6057_v38 = vor.u32 %v7652_v26, %v6056_v25  ;;  %v7908_v46 = vld [vmem:[#allocation11 + $0xdcc] sm:$0xf0] }
 0x2c8   :  { %4512 = vmatpush.bf16.msra.mxu2 %v7077_v54  ;;  %v6312_v54 = vld [vmem:[#allocation11 + $0x750] sm:$0xf]  ;;  %v5413_v60 = vor.u32 %v7475_v49, %v5410_v50  ;;  %v6061_v40 = vor.u32 %v7636_v33, %v6058_v30  ;;  %v7213_v44 = vor.u32 %v7924_v36, %v7210_v37  ;;  %v7604_v47 = vld [vmem:[#allocation11 + $0x454] sm:$0xf] }
 0x2c9   :  { %v7892_v50 = vld [vmem:[#allocation11 + $0xd54] sm:$0xf]  ;;  %v7556_v14 = vld [vmem:[#allocation11 + $0x2cc] sm:$0xf0] }
 0x2ca   :  { %4475 = vmatpush.bf16.msrb.mxu3 %v5793_v62  ;;  %v6565_v62 = vor.u32 %v7763_v51, %v6562_v53  ;;  %v7082_v51 = vld [vmem:[#allocation11 + $0xdd0] sm:$0xf0]  ;;  %v5544_v30 = vld [vmem:[#allocation11 + $0x150] sm:$0xf] }
 0x2cb   :  { %4487 = vmatpush.bf16.msra.mxu0 %v6945_v0  ;;  %4501 = vmatpush.bf16.msra.mxu1 %v5797_v1  ;;  %v6313_v0 = vor.u32 %v7716_v55, %v6312_v54  ;;  %v7747_v1 = vld [vmem:[#allocation11 + $0x8c4] sm:$0xf0]  ;;  %v5800_v54 = vld [vmem:[#allocation11 + $0x350] sm:$0xf]  ;;  %v6954_v2 = vld [vmem:[#allocation11 + $0xcd0] sm:$0xf0] }
 0x2cc   :  { %4513 = vmatpush.bf16.msra.mxu2 %v6949_v8  ;;  %v4261_v63 = vpop.f32.mrf.mxu2  ;;  %v7684_v8 = vld [vmem:[#allocation11 + $0x6cc] sm:$0xf0]  ;;  %v6433_v17 = vor.u32 %v7747_v1, %v6432_v61  ;;  %v7860_v1 = vld [vmem:[#allocation11 + $0xc54] sm:$0xf] }
 0x2cd   :  { %v7876_v61 = vld [vmem:[#allocation11 + $0xccc] sm:$0xf0]  ;;  %v5802_v63 = vld [vmem:[#allocation11 + $0x3d0] sm:$0xf0] }
 0x2ce   :  { %4476 = vmatpush.bf16.msrb.mxu3 %v5665_v9  ;;  %v7338_v9 = vld [vmem:[#allocation11 + $0xfd0] sm:$0xf0]  ;;  %v7524_v36 = vld [vmem:[#allocation11 + $0x1cc] sm:$0xf0] }
 0x2cf   :  { %4488 = vmatpush.bf16.msra.mxu0 %v6817_v21  ;;  %4502 = vmatpush.bf16.msra.mxu1 %v5669_v22  ;;  %v6185_v21 = vor.u32 %v7684_v8, %v6184_v7  ;;  %v7337_v22 = vor.u32 %v7972_v11, %v7336_v10  ;;  %v7341_v28 = vor.u32 %v7956_v19, %v7338_v9  ;;  %v7844_v9 = vld [vmem:[#allocation11 + $0xbcc] sm:$0xf0]  ;;  %v7828_v25 = vld [vmem:[#allocation11 + $0xb54] sm:$0xf] }
 0x2d0   :  { %4514 = vmatpush.bf16.msra.mxu2 %v6821_v27  ;;  %v7208_v27 = vld [vmem:[#allocation11 + $0xe50] sm:$0xf]  ;;  %v6953_v8 = vor.u32 %v7876_v61, %v6952_v58  ;;  %v6957_v19 = vor.u32 %v7860_v1, %v6954_v2  ;;  %v6826_v26 = vld [vmem:[#allocation11 + $0xbd0] sm:$0xf0]  ;;  %v7701_v1 = vld [vmem:[#allocation11 + $0x75c] sm:$0xf] }
 0x2d1   :  { %v6696_v37 = vld [vmem:[#allocation11 + $0xa50] sm:$0xf]  ;;  %v7476_v58 = vld [vmem:[#allocation11 + $0x54] sm:$0xf]  ;;  %v6322_v2 = vld [vmem:[#allocation11 + $0x7d8] sm:$0xf0] }
 0x2d2   :  { %4477 = vmatpush.bf16.msrb.mxu3 %v5537_v39  ;;  %v7209_v39 = vor.u32 %v7940_v29, %v7208_v27  ;;  %v5673_v27 = vor.u32 %v7556_v14, %v5672_v12  ;;  %v6570_v61 = vld [vmem:[#allocation11 + $0x9d0] sm:$0xf0]  ;;  %v7748_v12 = vld [vmem:[#allocation11 + $0x8cc] sm:$0xf0] }
 0x2d3   :  { %4489 = vmatpush.bf16.msra.mxu0 %v6689_v42  ;;  %4503 = vmatpush.bf16.msra.mxu1 %v5541_v43  ;;  %v7620_v42 = vld [vmem:[#allocation11 + $0x4cc] sm:$0xf0]  ;;  %v7732_v14 = vld [vmem:[#allocation11 + $0x854] sm:$0xf] }
 0x2d4   :  { %4515 = vmatpush.bf16.msra.mxu2 %v6693_v48  ;;  %v7080_v43 = vld [vmem:[#allocation11 + $0xd50] sm:$0xf]  ;;  %v5930_v48 = vld [vmem:[#allocation11 + $0x4d0] sm:$0xf0]  ;;  %v5929_v53 = vor.u32 %v7620_v42, %v5928_v41 }
 0x2d5   :  { %v7081_v55 = vor.u32 %v7908_v46, %v7080_v43  ;;  %v7508_v41 = vld [vmem:[#allocation11 + $0x154] sm:$0xf] }
 0x2d6   :  { %4478 = vmatpush.bf16.msrb.mxu3 %v5409_v56  ;;  %v5933_v56 = vor.u32 %v7604_v47, %v5930_v48  ;;  %v5546_v42 = vld [vmem:[#allocation11 + $0x1d0] sm:$0xf0]  ;;  %v5545_v48 = vor.u32 %v7524_v36, %v5544_v30 }
 0x2d7   :  { %4490 = vmatpush.bf16.msra.mxu0 %v6561_v59  ;;  %4504 = vmatpush.bf16.msra.mxu1 %v5413_v60  ;;  %v4298_v49 = vpop.f32.mrf.mxu1  ;;  %v1389_v59 = vperm.slane %v8395_v45, 2  ;;  %v7085_v60 = vor.u32 %v7892_v50, %v7082_v51  ;;  %v7796_v46 = vld [vmem:[#allocation11 + $0xa54] sm:$0xf]  ;;  %v5416_v50 = vld [vmem:[#allocation11 + $0x50] sm:$0xf] }
 0x2d8   :  { %4516 = vmatpush.bf16.msra.mxu2 %v6565_v62  ;;  %v7572_v62 = vld [vmem:[#allocation11 + $0x354] sm:$0xf] }
 0x2d9   :  { %4479 = vmatmul.bf16.vlgmr.msrb.gmra.mxu3 %v8329_v52  ;;  %v5805_v10 = vor.u32 %v7572_v62, %v5802_v63  ;;  %v6698_v47 = vld [vmem:[#allocation11 + $0xad0] sm:$0xf0]  ;;  %v6320_v62 = vld [vmem:[#allocation11 + $0x758] sm:$0xf] }
 0x2da   :  { %4523 = vmatpush.bf16.msra.mxu3 %v6313_v0  ;;  %4505 = vmatmul.bf16.vlgmr.msra.gmra.mxu1 %v8329_v52  ;;  %v7717_v63 = vld [vmem:[#allocation11 + $0x7d4] sm:$0xf0] }
 0x2db   :  { %4549 = vmatpush.bf16.msrb.mxu1 %v6317_v5  ;;  %4491 = vmatpush.bf16.msra.mxu0 %v6433_v17  ;;  %v4285_v0 = vpop.f32.mrf.mxu0  ;;  %v5801_v5 = vor.u32 %v7588_v57, %v5800_v54  ;;  %v6824_v17 = vld [vmem:[#allocation11 + $0xb50] sm:$0xf]  ;;  %v6701_v57 = vor.u32 %v7796_v46, %v6698_v47  ;;  %v6066_v46 = vld [vmem:[#allocation11 + $0x5d8] sm:$0xf0] }
 0x2dc   :  { %4517 = vmatpush.bf16.msra.mxu2 %v6437_v20  ;;  %v4272_v7 = vpop.f32.mrf.mxu3  ;;  %v7540_v20 = vld [vmem:[#allocation11 + $0x254] sm:$0xf]  ;;  %v6825_v29 = vor.u32 %v7844_v9, %v6824_v17  ;;  %v7492_v54 = vld [vmem:[#allocation11 + $0xcc] sm:$0xf0]  ;;  %v6192_v9 = vld [vmem:[#allocation11 + $0x658] sm:$0xf] }
 0x2dd   :  { %v4273_v11 = vadd.f32 %v4272_v7, %v1389_v59  ;;  %v5418_v59 = vld [vmem:[#allocation11 + $0xd0] sm:$0xf0]  ;;  %v6440_v7 = vld [vmem:[#allocation11 + $0x850] sm:$0xf]  ;;  %v7925_v47 = vld [vmem:[#allocation11 + $0xe5c] sm:$0xf] }
 0x2de   :  { %4524 = vmatpush.bf16.msra.mxu3 %v6185_v21  ;;  %4492 = vmatmul.bf16.vlgmr.msra.gmra.mxu0 %v8333_v3  ;;  %v5674_v21 = vld [vmem:[#allocation11 + $0x2d0] sm:$0xf0] }
 0x2df   :  { %4536 = vmatpush.bf16.msrb.mxu0 %v7337_v22  ;;  %4550 = vmatpush.bf16.msrb.mxu1 %v6189_v23  ;;  %v8409_v22 = vadd.f32 %v4285_v0, %v4273_v11  ;;  %v4300_v23 = vpop.f32.mrf.mxu1  ;;  %v5677_v33 = vor.u32 %v7540_v20, %v5674_v21  ;;  %v5417_v0 = vor.u32 %v7492_v54, %v5416_v50  ;;  %v6442_v17 = vld [vmem:[#allocation11 + $0x8d0] sm:$0xf0]  ;;  %v7685_v20 = vld [vmem:[#allocation11 + $0x6d4] sm:$0xf0] }
 0x2e0   :  { %4562 = vmatpush.bf16.msrb.mxu2 %v7341_v28  ;;  %v4299_v28 = vadd.f32 %v4298_v49, %v1390_v4  ;;  %v6321_v11 = vor.u32 %v7717_v63, %v6320_v62  ;;  %v7344_v21 = vld [vmem:[#allocation11 + $0xf58] sm:$0xf]  ;;  %v6193_v30 = vor.u32 %v7685_v20, %v6192_v9  ;;  %v7090_v62 = vld [vmem:[#allocation11 + $0xdd8] sm:$0xf0]  ;;  %v1392_v9 = vperm.slane %v8395_v45, 5 }
 0x2e1   :  { %4518 = vmatmul.bf16.vlgmr.msra.gmra.mxu2 %v8333_v3  ;;  %v7973_v23 = vld [vmem:[#allocation11 + $0xfd4] sm:$0xf0] }
 0x2e2   :  { %4525 = vmatpush.bf16.msra.mxu3 %v6057_v38  ;;  %v6829_v38 = vor.u32 %v7828_v25, %v6826_v26  ;;  %v7669_v25 = vld [vmem:[#allocation11 + $0x65c] sm:$0xf]  ;;  %v7345_v36 = vor.u32 %v7973_v23, %v7344_v21  ;;  %v7621_v54 = vld [vmem:[#allocation11 + $0x4d4] sm:$0xf0] }
 0x2e3   :  { %4537 = vmatpush.bf16.msrb.mxu0 %v7209_v39  ;;  %4551 = vmatpush.bf16.msrb.mxu1 %v6061_v40  ;;  %v7812_v40 = vld [vmem:[#allocation11 + $0xacc] sm:$0xf0]  ;;  %v6194_v26 = vld [vmem:[#allocation11 + $0x6d8] sm:$0xf0] }
 0x2e4   :  { %4563 = vmatpush.bf16.msrb.mxu2 %v7213_v44  ;;  %v4311_v39 = vpop.f32.mrf.mxu2  ;;  %v4287_v44 = vpop.f32.mrf.mxu0  ;;  %v6697_v51 = vor.u32 %v7812_v40, %v6696_v37  ;;  %v6197_v37 = vor.u32 %v7669_v25, %v6194_v26  ;;  %v7216_v40 = vld [vmem:[#allocation11 + $0xe58] sm:$0xf] }
 0x2e5   :  { %v8411_v43 = vadd.f32 %v4311_v39, %v4299_v28  ;;  %v4274_v49 = vpop.f32.mrf.mxu3  ;;  %v7957_v28 = vld [vmem:[#allocation11 + $0xf5c] sm:$0xf]  ;;  %v7653_v39 = vld [vmem:[#allocation11 + $0x5d4] sm:$0xf0] }
 0x2e6   :  { %4526 = vmatpush.bf16.msra.mxu3 %v5929_v53  ;;  %v5549_v53 = vor.u32 %v7508_v41, %v5546_v42  ;;  %v7941_v42 = vld [vmem:[#allocation11 + $0xed4] sm:$0xf0]  ;;  %v7637_v44 = vld [vmem:[#allocation11 + $0x55c] sm:$0xf] }
 0x2e7   :  { %4538 = vmatpush.bf16.msrb.mxu0 %v7081_v55  ;;  %4552 = vmatpush.bf16.msrb.mxu1 %v5933_v56  ;;  %v6568_v55 = vld [vmem:[#allocation11 + $0x950] sm:$0xf]  ;;  %v7217_v50 = vor.u32 %v7941_v42, %v7216_v40  ;;  %v7829_v40 = vld [vmem:[#allocation11 + $0xb5c] sm:$0xf] }
 0x2e8   :  { %4564 = vmatpush.bf16.msrb.mxu2 %v7085_v60  ;;  %v7780_v56 = vld [vmem:[#allocation11 + $0x9cc] sm:$0xf0]  ;;  %v7764_v60 = vld [vmem:[#allocation11 + $0x954] sm:$0xf] }
 0x2e9   :  { %v6569_v4 = vor.u32 %v7780_v56, %v6568_v55  ;;  %v7088_v55 = vld [vmem:[#allocation11 + $0xd58] sm:$0xf] }
 0x2ea   :  { %4527 = vmatpush.bf16.msra.mxu3 %v5801_v5  ;;  %v5421_v5 = vor.u32 %v7476_v58, %v5418_v59  ;;  %v7605_v58 = vld [vmem:[#allocation11 + $0x45c] sm:$0xf] }
 0x2eb   :  { %4539 = vmatpush.bf16.msrb.mxu0 %v6953_v8  ;;  %4553 = vmatpush.bf16.msrb.mxu1 %v5805_v10  ;;  %v6573_v8 = vor.u32 %v7764_v60, %v6570_v61  ;;  %v5938_v59 = vld [vmem:[#allocation11 + $0x4d8] sm:$0xf0] }
 0x2ec   :  { %4565 = vmatpush.bf16.msrb.mxu2 %v6957_v19  ;;  %v4313_v10 = vpop.f32.mrf.mxu2  ;;  %v6325_v19 = vor.u32 %v7701_v1, %v6322_v2  ;;  %v7893_v61 = vld [vmem:[#allocation11 + $0xd5c] sm:$0xf]  ;;  %v5941_v2 = vor.u32 %v7605_v58, %v5938_v59 }
 0x2ed   :  { %v7877_v10 = vld [vmem:[#allocation11 + $0xcd4] sm:$0xf0]  ;;  %v7797_v59 = vld [vmem:[#allocation11 + $0xa5c] sm:$0xf] }
 0x2ee   :  { %4528 = vmatpush.bf16.msra.mxu3 %v5673_v27  ;;  %v6441_v27 = vor.u32 %v7748_v12, %v6440_v7  ;;  %v1391_v7 = vperm.slane %v8395_v45, 4  ;;  %v5810_v12 = vld [vmem:[#allocation11 + $0x3d8] sm:$0xf0] }
 0x2ef   :  { %4540 = vmatpush.bf16.msrb.mxu0 %v6825_v29  ;;  %4554 = vmatpush.bf16.msrb.mxu1 %v5677_v33  ;;  %v7346_v29 = vld [vmem:[#allocation11 + $0xfd8] sm:$0xf0]  ;;  %v6445_v33 = vor.u32 %v7732_v14, %v6442_v17 }
 0x2f0   :  { %4566 = vmatpush.bf16.msrb.mxu2 %v6829_v38  ;;  %v6064_v38 = vld [vmem:[#allocation11 + $0x558] sm:$0xf]  ;;  %v7349_v41 = vor.u32 %v7957_v28, %v7346_v29  ;;  %v7861_v17 = vld [vmem:[#allocation11 + $0xc5c] sm:$0xf] }
 0x2f1   :  { %v6065_v49 = vor.u32 %v7653_v39, %v6064_v38  ;;  %v7557_v28 = vld [vmem:[#allocation11 + $0x2d4] sm:$0xf0] }
 0x2f2   :  { %4529 = vmatpush.bf16.msra.mxu3 %v5545_v48  ;;  %v7218_v48 = vld [vmem:[#allocation11 + $0xed8] sm:$0xf0]  ;;  %v6832_v29 = vld [vmem:[#allocation11 + $0xb58] sm:$0xf] }
 0x2f3   :  { %4541 = vmatpush.bf16.msrb.mxu0 %v6697_v51  ;;  %4555 = vmatpush.bf16.msrb.mxu1 %v5549_v53  ;;  %v6069_v51 = vor.u32 %v7637_v44, %v6066_v46  ;;  %v5936_v53 = vld [vmem:[#allocation11 + $0x458] sm:$0xf]  ;;  %v7221_v56 = vor.u32 %v7925_v47, %v7218_v48 }
 0x2f4   :  { %4567 = vmatpush.bf16.msrb.mxu2 %v6701_v57  ;;  %v7909_v57 = vld [vmem:[#allocation11 + $0xdd4] sm:$0xf0]  ;;  %v5937_v63 = vor.u32 %v7621_v54, %v5936_v53 }
 0x2f5   :  { %v7089_v1 = vor.u32 %v7909_v57, %v7088_v55  ;;  %v5552_v48 = vld [vmem:[#allocation11 + $0x158] sm:$0xf]  ;;  %v7509_v55 = vld [vmem:[#allocation11 + $0x15c] sm:$0xf] }
 0x2f6   :  { %4530 = vmatpush.bf16.msra.mxu3 %v5417_v0  ;;  %v5808_v0 = vld [vmem:[#allocation11 + $0x358] sm:$0xf] }
 0x2f7   :  { %4542 = vmatpush.bf16.msrb.mxu0 %v6569_v4  ;;  %4556 = vmatpush.bf16.msrb.mxu1 %v5421_v5  ;;  %v4350_v60 = vpop.f32.mrf.mxu1  ;;  %v7589_v4 = vld [vmem:[#allocation11 + $0x3d4] sm:$0xf0] }
 0x2f8   :  { %4568 = vmatpush.bf16.msrb.mxu2 %v6573_v8  ;;  %v6960_v5 = vld [vmem:[#allocation11 + $0xc58] sm:$0xf]  ;;  %v7093_v8 = vor.u32 %v7893_v61, %v7090_v62  ;;  %v5809_v20 = vor.u32 %v7589_v4, %v5808_v0  ;;  %v4351_v44 = vadd.f32 %v4350_v60, %v1392_v9  ;;  %v6706_v61 = vld [vmem:[#allocation11 + $0xad8] sm:$0xf0]  ;;  %v7702_v9 = vld [vmem:[#allocation11 + $0x764] sm:$0xf] }
 0x2f9   :  { %4531 = vmatmul.bf16.vlgmr.msra.gmra.mxu3 %v8329_v52  ;;  %v6961_v23 = vor.u32 %v7877_v10, %v6960_v5  ;;  %v7813_v54 = vld [vmem:[#allocation11 + $0xad4] sm:$0xf0]  ;;  %v5426_v10 = vld [vmem:[#allocation11 + $0xd8] sm:$0xf0] }
 0x2fa   :  { %4575 = vmatpush.bf16.msrb.mxu3 %v6321_v11  ;;  %4557 = vmatmul.bf16.vlgmr.msrb.gmra.mxu1 %v8329_v52  ;;  %v7573_v11 = vld [vmem:[#allocation11 + $0x35c] sm:$0xf]  ;;  %v6576_v4 = vld [vmem:[#allocation11 + $0x958] sm:$0xf] }
 0x2fb   :  { %4601 = vmatpush.bf16.msra.mxu1 %v6325_v19  ;;  %4543 = vmatpush.bf16.msrb.mxu0 %v6441_v27  ;;  %v4337_v14 = vpop.f32.mrf.mxu0  ;;  %v6962_v19 = vld [vmem:[#allocation11 + $0xcd8] sm:$0xf0]  ;;  %v5813_v25 = vor.u32 %v7573_v11, %v5810_v12  ;;  %v5680_v27 = vld [vmem:[#allocation11 + $0x258] sm:$0xf] }
 0x2fc   :  { %4569 = vmatpush.bf16.msrb.mxu2 %v6445_v33  ;;  %v4324_v21 = vpop.f32.mrf.mxu3  ;;  %v6965_v33 = vor.u32 %v7861_v17, %v6962_v19  ;;  %v5681_v42 = vor.u32 %v7557_v28, %v5680_v27  ;;  %v7781_v5 = vld [vmem:[#allocation11 + $0x9d4] sm:$0xf0]  ;;  %v7765_v11 = vld [vmem:[#allocation11 + $0x95c] sm:$0xf]  ;;  %v7718_v17 = vld [vmem:[#allocation11 + $0x7dc] sm:$0xf0] }
 0x2fd   :  { %v4325_v26 = vadd.f32 %v4324_v21, %v1391_v7  ;;  %v6709_v7 = vor.u32 %v7797_v59, %v6706_v61  ;;  %v6578_v12 = vld [vmem:[#allocation11 + $0x9d8] sm:$0xf0]  ;;  %v6577_v21 = vor.u32 %v7781_v5, %v6576_v4  ;;  %v7942_v59 = vld [vmem:[#allocation11 + $0xedc] sm:$0xf0]  ;;  %v7638_v61 = vld [vmem:[#allocation11 + $0x564] sm:$0xf] }
 0x2fe   :  { %4576 = vmatpush.bf16.msrb.mxu3 %v6193_v30  ;;  %4544 = vmatmul.bf16.vlgmr.msrb.gmra.mxu0 %v8333_v3  ;;  %v7845_v30 = vld [vmem:[#allocation11 + $0xbd4] sm:$0xf0]  ;;  %v5944_v4 = vld [vmem:[#allocation11 + $0x460] sm:$0xf] }
 0x2ff   :  { %4588 = vmatpush.bf16.msra.mxu0 %v7345_v36  ;;  %4602 = vmatpush.bf16.msra.mxu1 %v6197_v37  ;;  %v7541_v36 = vld [vmem:[#allocation11 + $0x25c] sm:$0xf]  ;;  %v8419_v38 = vadd.f32 %v4337_v14, %v4325_v26  ;;  %v4352_v39 = vpop.f32.mrf.mxu1  ;;  %v6833_v46 = vor.u32 %v7845_v30, %v6832_v29  ;;  %v6328_v14 = vld [vmem:[#allocation11 + $0x760] sm:$0xf]  ;;  %v6581_v26 = vor.u32 %v7765_v11, %v6578_v12  ;;  %v7749_v29 = vld [vmem:[#allocation11 + $0x8d4] sm:$0xf0] }
 0x300   :  { %4614 = vmatpush.bf16.msra.mxu2 %v7349_v41  ;;  %v5682_v37 = vld [vmem:[#allocation11 + $0x2d8] sm:$0xf0]  ;;  %v6329_v28 = vor.u32 %v7718_v17, %v6328_v14  ;;  %v7686_v39 = vld [vmem:[#allocation11 + $0x6dc] sm:$0xf0]  ;;  %v7606_v11 = vld [vmem:[#allocation11 + $0x464] sm:$0xf] }
 0x301   :  { %4570 = vmatmul.bf16.vlgmr.msrb.gmra.mxu2 %v8333_v3  ;;  %v6834_v41 = vld [vmem:[#allocation11 + $0xbd8] sm:$0xf0]  ;;  %v5685_v47 = vor.u32 %v7541_v36, %v5682_v37  ;;  %v6200_v37 = vld [vmem:[#allocation11 + $0x660] sm:$0xf]  ;;  %v5946_v12 = vld [vmem:[#allocation11 + $0x4e0] sm:$0xf0] }
 0x302   :  { %4577 = vmatpush.bf16.msrb.mxu3 %v6065_v49  ;;  %v7525_v49 = vld [vmem:[#allocation11 + $0x1d4] sm:$0xf0]  ;;  %v6450_v30 = vld [vmem:[#allocation11 + $0x8d8] sm:$0xf0]  ;;  %v7622_v5 = vld [vmem:[#allocation11 + $0x4dc] sm:$0xf0] }
 0x303   :  { %4589 = vmatpush.bf16.msra.mxu0 %v7217_v50  ;;  %4603 = vmatpush.bf16.msra.mxu1 %v6069_v51  ;;  %v6704_v50 = vld [vmem:[#allocation11 + $0xa58] sm:$0xf]  ;;  %v6837_v51 = vor.u32 %v7829_v40, %v6834_v41  ;;  %v4339_v58 = vpop.f32.mrf.mxu0  ;;  %v5553_v60 = vor.u32 %v7525_v49, %v5552_v48  ;;  %v7352_v40 = vld [vmem:[#allocation11 + $0xf60] sm:$0xf]  ;;  %v7354_v48 = vld [vmem:[#allocation11 + $0xfe0] sm:$0xf0] }
 0x304   :  { %4615 = vmatpush.bf16.msra.mxu2 %v7221_v56  ;;  %v4363_v53 = vpop.f32.mrf.mxu2  ;;  %v5554_v56 = vld [vmem:[#allocation11 + $0x1d8] sm:$0xf0]  ;;  %v4326_v62 = vpop.f32.mrf.mxu3  ;;  %v6705_v0 = vor.u32 %v7813_v54, %v6704_v50  ;;  %v7974_v41 = vld [vmem:[#allocation11 + $0xfdc] sm:$0xf0]  ;;  %v6201_v50 = vor.u32 %v7686_v39, %v6200_v37  ;;  %v7894_v17 = vld [vmem:[#allocation11 + $0xd64] sm:$0xf] }
 0x305   :  { %v8421_v57 = vadd.f32 %v4363_v53, %v4351_v44  ;;  %v6202_v44 = vld [vmem:[#allocation11 + $0x6e0] sm:$0xf0]  ;;  %v6072_v54 = vld [vmem:[#allocation11 + $0x560] sm:$0xf] }
 0x306   :  { %4578 = vmatpush.bf16.msrb.mxu3 %v5937_v63  ;;  %v5424_v63 = vld [vmem:[#allocation11 + $0x58] sm:$0xf]  ;;  %v7926_v62 = vld [vmem:[#allocation11 + $0xe64] sm:$0xf] }
 0x307   :  { %4590 = vmatpush.bf16.msra.mxu0 %v7089_v1  ;;  %4604 = vmatpush.bf16.msra.mxu1 %v5941_v2  ;;  %v5557_v1 = vor.u32 %v7509_v55, %v5554_v56  ;;  %v7493_v2 = vld [vmem:[#allocation11 + $0xd4] sm:$0xf0]  ;;  %v7654_v55 = vld [vmem:[#allocation11 + $0x5dc] sm:$0xf0]  ;;  %v7862_v37 = vld [vmem:[#allocation11 + $0xc64] sm:$0xf] }
 0x308   :  { %4616 = vmatpush.bf16.msra.mxu2 %v7093_v8  ;;  %v7477_v8 = vld [vmem:[#allocation11 + $0x5c] sm:$0xf]  ;;  %v5425_v19 = vor.u32 %v7493_v2, %v5424_v63  ;;  %v7224_v56 = vld [vmem:[#allocation11 + $0xe60] sm:$0xf]  ;;  %v7226_v63 = vld [vmem:[#allocation11 + $0xee0] sm:$0xf0] }
 0x309   :  { %v6970_v39 = vld [vmem:[#allocation11 + $0xce0] sm:$0xf0] }
 0x30a   :  { %4579 = vmatpush.bf16.msrb.mxu3 %v5809_v20  ;;  %v6330_v20 = vld [vmem:[#allocation11 + $0x7e0] sm:$0xf0] }
 0x30b   :  { %4591 = vmatpush.bf16.msra.mxu0 %v6961_v23  ;;  %4605 = vmatpush.bf16.msra.mxu1 %v5813_v25  ;;  %v5429_v23 = vor.u32 %v7477_v8, %v5426_v10  ;;  %v6448_v25 = vld [vmem:[#allocation11 + $0x858] sm:$0xf]  ;;  %v6333_v36 = vor.u32 %v7702_v9, %v6330_v20  ;;  %v7229_v8 = vor.u32 %v7926_v62, %v7226_v63  ;;  %v7910_v10 = vld [vmem:[#allocation11 + $0xddc] sm:$0xf0] }
 0x30c   :  { %4617 = vmatpush.bf16.msra.mxu2 %v6965_v33  ;;  %v4365_v27 = vpop.f32.mrf.mxu2  ;;  %v7733_v33 = vld [vmem:[#allocation11 + $0x85c] sm:$0xf]  ;;  %v5945_v9 = vor.u32 %v7622_v5, %v5944_v4  ;;  %v5816_v20 = vld [vmem:[#allocation11 + $0x360] sm:$0xf] }
 0x30d   :  { %v6453_v49 = vor.u32 %v7733_v33, %v6450_v30  ;;  %v1393_v27 = vperm.slane %v8395_v45, 6  ;;  %v7574_v33 = vld [vmem:[#allocation11 + $0x364] sm:$0xf] }
 0x30e   :  { %4580 = vmatpush.bf16.msrb.mxu3 %v5681_v42  ;;  %v7670_v42 = vld [vmem:[#allocation11 + $0x664] sm:$0xf] }
 0x30f   :  { %4592 = vmatpush.bf16.msra.mxu0 %v6833_v46  ;;  %4606 = vmatpush.bf16.msra.mxu1 %v5685_v47  ;;  %v6449_v46 = vor.u32 %v7749_v29, %v6448_v25  ;;  %v7958_v47 = vld [vmem:[#allocation11 + $0xf64] sm:$0xf]  ;;  %v6205_v53 = vor.u32 %v7670_v42, %v6202_v44  ;;  %v7590_v25 = vld [vmem:[#allocation11 + $0x3dc] sm:$0xf0] }
 0x310   :  { %4618 = vmatpush.bf16.msra.mxu2 %v6837_v51  ;;  %v7353_v51 = vor.u32 %v7974_v41, %v7352_v40  ;;  %v7357_v58 = vor.u32 %v7958_v47, %v7354_v48  ;;  %v7878_v29 = vld [vmem:[#allocation11 + $0xcdc] sm:$0xf0]  ;;  %v5818_v30 = vld [vmem:[#allocation11 + $0x3e0] sm:$0xf0]  ;;  %v1394_v40 = vperm.slane %v8395_v45, 7  ;;  %v5817_v41 = vor.u32 %v7590_v25, %v5816_v20 }
 0x311   :  { %v5688_v48 = vld [vmem:[#allocation11 + $0x260] sm:$0xf]  ;;  %v7830_v45 = vld [vmem:[#allocation11 + $0xb64] sm:$0xf] }
 0x312   :  { %4581 = vmatpush.bf16.msrb.mxu3 %v5553_v60  ;;  %v6074_v60 = vld [vmem:[#allocation11 + $0x5e0] sm:$0xf0]  ;;  %v5432_v20 = vld [vmem:[#allocation11 + $0x60] sm:$0xf] }
 0x313   :  { %4593 = vmatpush.bf16.msra.mxu0 %v6705_v0  ;;  %4607 = vmatpush.bf16.msra.mxu1 %v5557_v1  ;;  %v6073_v0 = vor.u32 %v7654_v55, %v6072_v54  ;;  %v7225_v1 = vor.u32 %v7942_v59, %v7224_v56  ;;  %v6077_v2 = vor.u32 %v7638_v61, %v6074_v60  ;;  %v7542_v54 = vld [vmem:[#allocation11 + $0x264] sm:$0xf]  ;;  %v7494_v25 = vld [vmem:[#allocation11 + $0xdc] sm:$0xf0] }
 0x314   :  { %4619 = vmatpush.bf16.msra.mxu2 %v6709_v7  ;;  %v7096_v7 = vld [vmem:[#allocation11 + $0xd60] sm:$0xf]  ;;  %v5690_v55 = vld [vmem:[#allocation11 + $0x2e0] sm:$0xf0] }
 0x315   :  { %v6842_v59 = vld [vmem:[#allocation11 + $0xbe0] sm:$0xf0]  ;;  %v5693_v63 = vor.u32 %v7542_v54, %v5690_v55 }
 0x316   :  { %4582 = vmatpush.bf16.msrb.mxu3 %v5425_v19  ;;  %v7098_v19 = vld [vmem:[#allocation11 + $0xde0] sm:$0xf0]  ;;  %v6845_v4 = vor.u32 %v7830_v45, %v6842_v59  ;;  %v7687_v45 = vld [vmem:[#allocation11 + $0x6e4] sm:$0xf0] }
 0x317   :  { %4594 = vmatpush.bf16.msra.mxu0 %v6577_v21  ;;  %4608 = vmatpush.bf16.msra.mxu1 %v5429_v23  ;;  %v4402_v14 = vpop.f32.mrf.mxu1  ;;  %v7097_v21 = vor.u32 %v7910_v10, %v7096_v7  ;;  %v5949_v23 = vor.u32 %v7606_v11, %v5946_v12  ;;  %v7814_v7 = vld [vmem:[#allocation11 + $0xadc] sm:$0xf0]  ;;  %v5562_v10 = vld [vmem:[#allocation11 + $0x1e0] sm:$0xf0]  ;;  %v7360_v59 = vld [vmem:[#allocation11 + $0xf68] sm:$0xf] }
 0x318   :  { %4620 = vmatpush.bf16.msra.mxu2 %v6581_v26  ;;  %v6968_v26 = vld [vmem:[#allocation11 + $0xc60] sm:$0xf]  ;;  %v4403_v60 = vadd.f32 %v4402_v14, %v1394_v40  ;;  %v5433_v40 = vor.u32 %v7494_v25, %v5432_v20  ;;  %v6458_v54 = vld [vmem:[#allocation11 + $0x8e0] sm:$0xf0]  ;;  %v7927_v20 = vld [vmem:[#allocation11 + $0xe6c] sm:$0xf] }
 0x319   :  { %4583 = vmatmul.bf16.vlgmr.msrb.gmra.mxu3 %v8329_v52  ;;  %v6969_v44 = vor.u32 %v7878_v29, %v6968_v26  ;;  %v6584_v26 = vld [vmem:[#allocation11 + $0x960] sm:$0xf]  ;;  %v7478_v29 = vld [vmem:[#allocation11 + $0x64] sm:$0xf] }
 0x31a   :  { %4627 = vmatpush.bf16.msra.mxu3 %v6329_v28  ;;  %4609 = vmatmul.bf16.vlgmr.msra.gmra.mxu1 %v8329_v52  ;;  %v7101_v28 = vor.u32 %v7894_v17, %v7098_v19  ;;  %v7798_v17 = vld [vmem:[#allocation11 + $0xa64] sm:$0xf] }
 0x31b   :  { %4653 = vmatpush.bf16.msrb.mxu1 %v6333_v36  ;;  %4595 = vmatpush.bf16.msra.mxu0 %v6449_v46  ;;  %v4389_v36 = vpop.f32.mrf.mxu0  ;;  %v5821_v46 = vor.u32 %v7574_v33, %v5818_v30  ;;  %v6714_v19 = vld [vmem:[#allocation11 + $0xae0] sm:$0xf0] }
 0x31c   :  { %4621 = vmatpush.bf16.msra.mxu2 %v6453_v49  ;;  %v4376_v42 = vpop.f32.mrf.mxu3  ;;  %v7558_v49 = vld [vmem:[#allocation11 + $0x2dc] sm:$0xf0]  ;;  %v5434_v33 = vld [vmem:[#allocation11 + $0xe0] sm:$0xf0] }
 0x31d   :  { %v4377_v47 = vadd.f32 %v4376_v42, %v1393_v27  ;;  %v5689_v61 = vor.u32 %v7558_v49, %v5688_v48  ;;  %v7782_v27 = vld [vmem:[#allocation11 + $0x9dc] sm:$0xf0]  ;;  %v7766_v30 = vld [vmem:[#allocation11 + $0x964] sm:$0xf]  ;;  %v6338_v42 = vld [vmem:[#allocation11 + $0x7e8] sm:$0xf0] }
 0x31e   :  { %4628 = vmatpush.bf16.msra.mxu3 %v6201_v50  ;;  %4596 = vmatmul.bf16.vlgmr.msra.gmra.mxu0 %v8333_v3  ;;  %v6840_v50 = vld [vmem:[#allocation11 + $0xb60] sm:$0xf] }
 0x31f   :  { %4640 = vmatpush.bf16.msrb.mxu0 %v7353_v51  ;;  %4654 = vmatpush.bf16.msrb.mxu1 %v6205_v53  ;;  %v6973_v51 = vor.u32 %v7862_v37, %v6970_v39  ;;  %v7846_v53 = vld [vmem:[#allocation11 + $0xbdc] sm:$0xf0]  ;;  %v8429_v56 = vadd.f32 %v4389_v36, %v4377_v47  ;;  %v6586_v36 = vld [vmem:[#allocation11 + $0x9e0] sm:$0xf0]  ;;  %v6336_v37 = vld [vmem:[#allocation11 + $0x768] sm:$0xf] }
 0x320   :  { %4666 = vmatpush.bf16.msrb.mxu2 %v7357_v58  ;;  %v4404_v58 = vpop.f32.mrf.mxu1  ;;  %v6841_v62 = vor.u32 %v7846_v53, %v6840_v50  ;;  %v7719_v39 = vld [vmem:[#allocation11 + $0x7e4] sm:$0xf0]  ;;  %v6456_v47 = vld [vmem:[#allocation11 + $0x860] sm:$0xf]  ;;  %v6589_v48 = vor.u32 %v7766_v30, %v6586_v36  ;;  %v7734_v53 = vld [vmem:[#allocation11 + $0x864] sm:$0xf] }
 0x321   :  { %4622 = vmatmul.bf16.vlgmr.msra.gmra.mxu2 %v8333_v3  ;;  %v6337_v50 = vor.u32 %v7719_v39, %v6336_v37  ;;  %v6208_v58 = vld [vmem:[#allocation11 + $0x668] sm:$0xf]  ;;  %v7607_v36 = vld [vmem:[#allocation11 + $0x46c] sm:$0xf] }
 0x322   :  { %4629 = vmatpush.bf16.msra.mxu3 %v6073_v0  ;;  %v5560_v0 = vld [vmem:[#allocation11 + $0x160] sm:$0xf]  ;;  %v7911_v30 = vld [vmem:[#allocation11 + $0xde4] sm:$0xf0]  ;;  %v5954_v37 = vld [vmem:[#allocation11 + $0x4e8] sm:$0xf0] }
 0x323   :  { %4641 = vmatpush.bf16.msrb.mxu0 %v7225_v1  ;;  %4655 = vmatpush.bf16.msrb.mxu1 %v6077_v2  ;;  %v7526_v1 = vld [vmem:[#allocation11 + $0x1dc] sm:$0xf0]  ;;  %v4391_v12 = vpop.f32.mrf.mxu0 }
 0x324   :  { %4667 = vmatpush.bf16.msrb.mxu2 %v7229_v8  ;;  %v6712_v2 = vld [vmem:[#allocation11 + $0xa60] sm:$0xf]  ;;  %v4415_v5 = vpop.f32.mrf.mxu2  ;;  %v7510_v8 = vld [vmem:[#allocation11 + $0x164] sm:$0xf]  ;;  %v5561_v14 = vor.u32 %v7526_v1, %v5560_v0  ;;  %v7959_v0 = vld [vmem:[#allocation11 + $0xf6c] sm:$0xf] }
 0x325   :  { %v8431_v11 = vadd.f32 %v4415_v5, %v4403_v60  ;;  %v7671_v60 = vld [vmem:[#allocation11 + $0x66c] sm:$0xf]  ;;  %v7232_v12 = vld [vmem:[#allocation11 + $0xe68] sm:$0xf] }
 0x326   :  { %4630 = vmatpush.bf16.msra.mxu3 %v5945_v9  ;;  %v4378_v9 = vpop.f32.mrf.mxu3  ;;  %v7362_v1 = vld [vmem:[#allocation11 + $0xfe8] sm:$0xf0] }
 0x327   :  { %4642 = vmatpush.bf16.msrb.mxu0 %v7097_v21  ;;  %4656 = vmatpush.bf16.msrb.mxu1 %v5949_v23  ;;  %v6713_v21 = vor.u32 %v7814_v7, %v6712_v2  ;;  %v5565_v23 = vor.u32 %v7510_v8, %v5562_v10  ;;  %v6461_v2 = vor.u32 %v7734_v53, %v6458_v54  ;;  %v6080_v8 = vld [vmem:[#allocation11 + $0x568] sm:$0xf]  ;;  %v6082_v9 = vld [vmem:[#allocation11 + $0x5e8] sm:$0xf0] }
 0x328   :  { %4668 = vmatpush.bf16.msrb.mxu2 %v7101_v28  ;;  %v6717_v28 = vor.u32 %v7798_v17, %v6714_v19  ;;  %v7655_v10 = vld [vmem:[#allocation11 + $0x5e4] sm:$0xf0]  ;;  %v7365_v17 = vor.u32 %v7959_v0, %v7362_v1 }
 0x329   :  { %v7943_v19 = vld [vmem:[#allocation11 + $0xee4] sm:$0xf0] }
 0x32a   :  { %4631 = vmatpush.bf16.msra.mxu3 %v5817_v41  ;;  %v7703_v41 = vld [vmem:[#allocation11 + $0x76c] sm:$0xf]  ;;  %v7233_v25 = vor.u32 %v7943_v19, %v7232_v12  ;;  %v7879_v54 = vld [vmem:[#allocation11 + $0xce4] sm:$0xf0] }
 0x32b   :  { %4643 = vmatpush.bf16.msrb.mxu0 %v6969_v44  ;;  %4657 = vmatpush.bf16.msrb.mxu1 %v5821_v46  ;;  %v6585_v44 = vor.u32 %v7782_v27, %v6584_v26  ;;  %v5437_v46 = vor.u32 %v7478_v29, %v5434_v33  ;;  %v6341_v55 = vor.u32 %v7703_v41, %v6338_v42  ;;  %v5952_v27 = vld [vmem:[#allocation11 + $0x468] sm:$0xf]  ;;  %v7106_v41 = vld [vmem:[#allocation11 + $0xde8] sm:$0xf0]  ;;  %v8437_v42 = vld [vmem:[#allocation13 + $0x10] sm:$0xff] }
 0x32c   :  { %4669 = vmatpush.bf16.msrb.mxu2 %v6973_v51  ;;  %v4417_v49 = vpop.f32.mrf.mxu2  ;;  %v7750_v51 = vld [vmem:[#allocation11 + $0x8dc] sm:$0xf0]  ;;  %v7104_v29 = vld [vmem:[#allocation11 + $0xd68] sm:$0xf]  ;;  %v7543_v12 = vld [vmem:[#allocation11 + $0x26c] sm:$0xf] }
 0x32d   :  { %v7591_v49 = vld [vmem:[#allocation11 + $0x3e4] sm:$0xf0] }
 0x32e   :  { %4632 = vmatpush.bf16.msra.mxu3 %v5689_v61  ;;  %v7975_v61 = vld [vmem:[#allocation11 + $0xfe4] sm:$0xf0] }
 0x32f   :  { %4644 = vmatpush.bf16.msrb.mxu0 %v6841_v62  ;;  %4658 = vmatpush.bf16.msrb.mxu1 %v5693_v63  ;;  %v6210_v62 = vld [vmem:[#allocation11 + $0x6e8] sm:$0xf0]  ;;  %v6457_v63 = vor.u32 %v7750_v51, %v6456_v47  ;;  %v7361_v5 = vor.u32 %v7975_v61, %v7360_v59  ;;  %v7105_v47 = vor.u32 %v7911_v30, %v7104_v29  ;;  %v1395_v51 = vperm.slane %v8437_v42, 0  ;;  %v6720_v29 = vld [vmem:[#allocation11 + $0xa68] sm:$0xf] }
 0x330   :  { %4670 = vmatpush.bf16.msrb.mxu2 %v6845_v4  ;;  %v6209_v4 = vor.u32 %v7687_v45, %v6208_v58  ;;  %v6213_v7 = vor.u32 %v7671_v60, %v6210_v62  ;;  %v5826_v58 = vld [vmem:[#allocation11 + $0x3e8] sm:$0xf0]  ;;  %v1396_v60 = vperm.slane %v8437_v42, 1 }
 0x331   :  { %v7863_v59 = vld [vmem:[#allocation11 + $0xc6c] sm:$0xf] }
 0x332   :  { %4633 = vmatpush.bf16.msra.mxu3 %v5561_v14  ;;  %v7639_v14 = vld [vmem:[#allocation11 + $0x56c] sm:$0xf] }
 0x333   :  { %4645 = vmatpush.bf16.msrb.mxu0 %v6713_v21  ;;  %4659 = vmatpush.bf16.msrb.mxu1 %v5565_v23  ;;  %v7234_v21 = vld [vmem:[#allocation11 + $0xee8] sm:$0xf0]  ;;  %v6081_v23 = vor.u32 %v7655_v10, %v6080_v8  ;;  %v6085_v26 = vor.u32 %v7639_v14, %v6082_v9  ;;  %v7847_v10 = vld [vmem:[#allocation11 + $0xbe4] sm:$0xf0] }
 0x334   :  { %4671 = vmatpush.bf16.msrb.mxu2 %v6717_v28  ;;  %v7623_v28 = vld [vmem:[#allocation11 + $0x4e4] sm:$0xf0]  ;;  %v7237_v33 = vor.u32 %v7927_v20, %v7234_v21  ;;  %v6978_v61 = vld [vmem:[#allocation11 + $0xce8] sm:$0xf0] }
 0x335   :  { %v6981_v8 = vor.u32 %v7863_v59, %v6978_v61  ;;  %v7831_v9 = vld [vmem:[#allocation11 + $0xb6c] sm:$0xf] }
 0x336   :  { %4634 = vmatpush.bf16.msra.mxu3 %v5433_v40  ;;  %v7895_v40 = vld [vmem:[#allocation11 + $0xd6c] sm:$0xf] }
 0x337   :  { %4646 = vmatpush.bf16.msrb.mxu0 %v6585_v44  ;;  %4660 = vmatpush.bf16.msrb.mxu1 %v5437_v46  ;;  %v4454_v39 = vpop.f32.mrf.mxu1  ;;  %v5953_v44 = vor.u32 %v7623_v28, %v5952_v27  ;;  %v5824_v46 = vld [vmem:[#allocation11 + $0x368] sm:$0xf]  ;;  %v7109_v53 = vor.u32 %v7895_v40, %v7106_v41  ;;  %v6850_v20 = vld [vmem:[#allocation11 + $0xbe8] sm:$0xf0] }
 0x338   :  { %4672 = vmatpush.bf16.msrb.mxu2 %v6589_v48  ;;  %v5957_v48 = vor.u32 %v7607_v36, %v5954_v37  ;;  %v5825_v62 = vor.u32 %v7591_v49, %v5824_v46  ;;  %v5568_v27 = vld [vmem:[#allocation11 + $0x168] sm:$0xf]  ;;  %v7511_v37 = vld [vmem:[#allocation11 + $0x16c] sm:$0xf] }
 0x339   :  { %4635 = vmatmul.bf16.vlgmr.msra.gmra.mxu3 %v8329_v52  ;;  %v7527_v28 = vld [vmem:[#allocation11 + $0x1e4] sm:$0xf0]  ;;  %v5570_v40 = vld [vmem:[#allocation11 + $0x1e8] sm:$0xf0] }
 0x33a   :  { %4679 = vmatpush.bf16.msrb.mxu3 %v6337_v50  ;;  %4661 = vmatmul.bf16.vlgmr.msrb.gmra.mxu1 %v8329_v52  ;;  %v6976_v50 = vld [vmem:[#allocation11 + $0xc68] sm:$0xf]  ;;  %v7799_v46 = vld [vmem:[#allocation11 + $0xa6c] sm:$0xf] }
 0x33b   :  { %4705 = vmatpush.bf16.msra.mxu1 %v6341_v55  ;;  %4647 = vmatpush.bf16.msrb.mxu0 %v6457_v63  ;;  %v7575_v55 = vld [vmem:[#allocation11 + $0x36c] sm:$0xf]  ;;  %v4441_v45 = vpop.f32.mrf.mxu0  ;;  %v6977_v0 = vor.u32 %v7879_v54, %v6976_v50  ;;  %v7815_v36 = vld [vmem:[#allocation11 + $0xae4] sm:$0xf0] }
 0x33c   :  { %4673 = vmatpush.bf16.msrb.mxu2 %v6461_v2  ;;  %v4428_v63 = vpop.f32.mrf.mxu3  ;;  %v5829_v1 = vor.u32 %v7575_v55, %v5826_v58  ;;  %v5440_v49 = vld [vmem:[#allocation11 + $0x68] sm:$0xf]  ;;  %v6721_v50 = vor.u32 %v7815_v36, %v6720_v29  ;;  %v5442_v59 = vld [vmem:[#allocation11 + $0xe8] sm:$0xf0] }
 0x33d   :  { %v4429_v2 = vadd.f32 %v4428_v63, %v1395_v51  ;;  %v5573_v51 = vor.u32 %v7511_v37, %v5570_v40  ;;  %v6592_v54 = vld [vmem:[#allocation11 + $0x968] sm:$0xf]  ;;  %v7767_v61 = vld [vmem:[#allocation11 + $0x96c] sm:$0xf]  ;;  %v7720_v63 = vld [vmem:[#allocation11 + $0x7ec] sm:$0xf0] }
 0x33e   :  { %4680 = vmatpush.bf16.msrb.mxu3 %v6209_v4  ;;  %4648 = vmatmul.bf16.vlgmr.msrb.gmra.mxu0 %v8333_v3  ;;  %v5696_v4 = vld [vmem:[#allocation11 + $0x268] sm:$0xf] }
 0x33f   :  { %4692 = vmatpush.bf16.msra.mxu0 %v7361_v5  ;;  %4706 = vmatpush.bf16.msra.mxu1 %v6213_v7  ;;  %v7559_v5 = vld [vmem:[#allocation11 + $0x2e4] sm:$0xf0]  ;;  %v8441_v19 = vadd.f32 %v4441_v45, %v4429_v2  ;;  %v4456_v14 = vpop.f32.mrf.mxu1  ;;  %v7479_v45 = vld [vmem:[#allocation11 + $0x6c] sm:$0xf]  ;;  %v6346_v2 = vld [vmem:[#allocation11 + $0x7f0] sm:$0xf0] }
 0x340   :  { %4718 = vmatpush.bf16.msra.mxu2 %v7365_v17  ;;  %v6848_v7 = vld [vmem:[#allocation11 + $0xb68] sm:$0xf]  ;;  %v5698_v17 = vld [vmem:[#allocation11 + $0x2e8] sm:$0xf0]  ;;  %v5697_v21 = vor.u32 %v7559_v5, %v5696_v4  ;;  %v5445_v5 = vor.u32 %v7479_v45, %v5442_v59  ;;  %v5960_v59 = vld [vmem:[#allocation11 + $0x470] sm:$0xf] }
 0x341   :  { %4674 = vmatmul.bf16.vlgmr.msrb.gmra.mxu2 %v8333_v3  ;;  %v7783_v55 = vld [vmem:[#allocation11 + $0x9e4] sm:$0xf0]  ;;  %v7735_v14 = vld [vmem:[#allocation11 + $0x86c] sm:$0xf] }
 0x342   :  { %4681 = vmatpush.bf16.msrb.mxu3 %v6081_v23  ;;  %v4455_v23 = vadd.f32 %v4454_v39, %v1396_v60  ;;  %v5569_v39 = vor.u32 %v7527_v28, %v5568_v27  ;;  %v6594_v60 = vld [vmem:[#allocation11 + $0x9e8] sm:$0xf0]  ;;  %v6593_v4 = vor.u32 %v7783_v55, %v6592_v54  ;;  %v7672_v27 = vld [vmem:[#allocation11 + $0x674] sm:$0xf] }
 0x343   :  { %4693 = vmatpush.bf16.msra.mxu0 %v7233_v25  ;;  %4707 = vmatpush.bf16.msra.mxu1 %v6085_v26  ;;  %v6849_v25 = vor.u32 %v7847_v10, %v6848_v7  ;;  %v5701_v26 = vor.u32 %v7543_v12, %v5698_v17  ;;  %v6464_v7 = vld [vmem:[#allocation11 + $0x868] sm:$0xf]  ;;  %v6218_v28 = vld [vmem:[#allocation11 + $0x6f0] sm:$0xf0] }
 0x344   :  { %4719 = vmatpush.bf16.msra.mxu2 %v7237_v33  ;;  %v6853_v33 = vor.u32 %v7831_v9, %v6850_v20  ;;  %v4467_v30 = vpop.f32.mrf.mxu2  ;;  %v7751_v17 = vld [vmem:[#allocation11 + $0x8e4] sm:$0xf0]  ;;  %v6466_v9 = vld [vmem:[#allocation11 + $0x8e8] sm:$0xf0]  ;;  %v7242_v54 = vld [vmem:[#allocation11 + $0xef0] sm:$0xf0] }
 0x345   :  { %v8443_v41 = vadd.f32 %v4467_v30, %v4455_v23  ;;  %v7688_v23 = vld [vmem:[#allocation11 + $0x6ec] sm:$0xf0]  ;;  %v6465_v29 = vor.u32 %v7751_v17, %v6464_v7  ;;  %v7370_v30 = vld [vmem:[#allocation11 + $0xff0] sm:$0xf0]  ;;  %v6469_v36 = vor.u32 %v7735_v14, %v6466_v9  ;;  %v1397_v9 = vperm.slane %v8437_v42, 2 }
 0x346   :  { %4682 = vmatpush.bf16.msrb.mxu3 %v5953_v44  ;;  %v4443_v44 = vpop.f32.mrf.mxu0  ;;  %v7592_v17 = vld [vmem:[#allocation11 + $0x3ec] sm:$0xf0] }
 0x347   :  { %4694 = vmatpush.bf16.msra.mxu0 %v7105_v47  ;;  %4708 = vmatpush.bf16.msra.mxu1 %v5957_v48  ;;  %v6722_v47 = vld [vmem:[#allocation11 + $0xae8] sm:$0xf0]  ;;  %v4430_v48 = vpop.f32.mrf.mxu3  ;;  %v6221_v44 = vor.u32 %v7672_v27, %v6218_v28  ;;  %v6984_v14 = vld [vmem:[#allocation11 + $0xc70] sm:$0xf]  ;;  %v7864_v27 = vld [vmem:[#allocation11 + $0xc74] sm:$0xf] }
 0x348   :  { %4720 = vmatpush.bf16.msra.mxu2 %v7109_v53  ;;  %v7495_v53 = vld [vmem:[#allocation11 + $0xe4] sm:$0xf0]  ;;  %v6725_v58 = vor.u32 %v7799_v46, %v6722_v47  ;;  %v6088_v46 = vld [vmem:[#allocation11 + $0x570] sm:$0xf]  ;;  %v6986_v28 = vld [vmem:[#allocation11 + $0xcf0] sm:$0xf0] }
 0x349   :  { %v7656_v47 = vld [vmem:[#allocation11 + $0x5ec] sm:$0xf0] }
 0x34a   :  { %4683 = vmatpush.bf16.msrb.mxu3 %v5825_v62  ;;  %v6344_v62 = vld [vmem:[#allocation11 + $0x770] sm:$0xf]  ;;  %v6089_v55 = vor.u32 %v7656_v47, %v6088_v46 }
 0x34b   :  { %4695 = vmatpush.bf16.msra.mxu0 %v6977_v0  ;;  %4709 = vmatpush.bf16.msra.mxu1 %v5829_v1  ;;  %v5441_v0 = vor.u32 %v7495_v53, %v5440_v49  ;;  %v7704_v1 = vld [vmem:[#allocation11 + $0x774] sm:$0xf]  ;;  %v6345_v12 = vor.u32 %v7720_v63, %v6344_v62  ;;  %v7944_v49 = vld [vmem:[#allocation11 + $0xeec] sm:$0xf0] }
 0x34c   :  { %4721 = vmatpush.bf16.msra.mxu2 %v6981_v8  ;;  %v6597_v8 = vor.u32 %v7767_v61, %v6594_v60  ;;  %v4469_v10 = vpop.f32.mrf.mxu2  ;;  %v6349_v20 = vor.u32 %v7704_v1, %v6346_v2  ;;  %v7928_v53 = vld [vmem:[#allocation11 + $0xe74] sm:$0xf]  ;;  %v7624_v61 = vld [vmem:[#allocation11 + $0x4ec] sm:$0xf0] }
 0x34d   :  { %v7112_v60 = vld [vmem:[#allocation11 + $0xd70] sm:$0xf]  ;;  %v7245_v62 = vor.u32 %v7928_v53, %v7242_v54  ;;  %v5962_v1 = vld [vmem:[#allocation11 + $0x4f0] sm:$0xf0]  ;;  %v5961_v7 = vor.u32 %v7624_v61, %v5960_v59 }
 0x34e   :  { %4684 = vmatpush.bf16.msrb.mxu3 %v5697_v21  ;;  %v6216_v21 = vld [vmem:[#allocation11 + $0x670] sm:$0xf]  ;;  %v7832_v54 = vld [vmem:[#allocation11 + $0xb74] sm:$0xf] }
 0x34f   :  { %4696 = vmatpush.bf16.msra.mxu0 %v6849_v25  ;;  %4710 = vmatpush.bf16.msra.mxu1 %v5701_v26  ;;  %v7368_v25 = vld [vmem:[#allocation11 + $0xf70] sm:$0xf]  ;;  %v6217_v37 = vor.u32 %v7688_v23, %v6216_v21  ;;  %v7576_v23 = vld [vmem:[#allocation11 + $0x374] sm:$0xf] }
 0x350   :  { %4722 = vmatpush.bf16.msra.mxu2 %v6853_v33  ;;  %v7976_v26 = vld [vmem:[#allocation11 + $0xfec] sm:$0xf0]  ;;  %v7960_v33 = vld [vmem:[#allocation11 + $0xf74] sm:$0xf] }
 0x351   :  { %v7369_v40 = vor.u32 %v7976_v26, %v7368_v25  ;;  %v7373_v48 = vor.u32 %v7960_v33, %v7370_v30  ;;  %v7912_v63 = vld [vmem:[#allocation11 + $0xdec] sm:$0xf0]  ;;  %v5834_v25 = vld [vmem:[#allocation11 + $0x3f0] sm:$0xf0] }
 0x352   :  { %4685 = vmatpush.bf16.msrb.mxu3 %v5569_v39  ;;  %v7240_v39 = vld [vmem:[#allocation11 + $0xe70] sm:$0xf]  ;;  %v7113_v10 = vor.u32 %v7912_v63, %v7112_v60 }
 0x353   :  { %4697 = vmatpush.bf16.msra.mxu0 %v6721_v50  ;;  %4711 = vmatpush.bf16.msra.mxu1 %v5573_v51  ;;  %v7640_v50 = vld [vmem:[#allocation11 + $0x574] sm:$0xf]  ;;  %v7880_v21 = vld [vmem:[#allocation11 + $0xcec] sm:$0xf0] }
 0x354   :  { %4723 = vmatpush.bf16.msra.mxu2 %v6725_v58  ;;  %v6090_v51 = vld [vmem:[#allocation11 + $0x5f0] sm:$0xf0]  ;;  %v7241_v58 = vor.u32 %v7944_v49, %v7240_v39  ;;  %v7560_v46 = vld [vmem:[#allocation11 + $0x2ec] sm:$0xf0]  ;;  %v6989_v39 = vor.u32 %v7864_v27, %v6986_v28 }
 0x355   :  { %v6093_v45 = vor.u32 %v7640_v50, %v6090_v51  ;;  %v6856_v47 = vld [vmem:[#allocation11 + $0xb70] sm:$0xf]  ;;  %v7544_v49 = vld [vmem:[#allocation11 + $0x274] sm:$0xf] }
 0x356   :  { %4686 = vmatpush.bf16.msrb.mxu3 %v5441_v0  ;;  %v7608_v0 = vld [vmem:[#allocation11 + $0x474] sm:$0xf]  ;;  %v5576_v60 = vld [vmem:[#allocation11 + $0x170] sm:$0xf] }
 0x357   :  { %4698 = vmatpush.bf16.msra.mxu0 %v6593_v4  ;;  %4712 = vmatpush.bf16.msra.mxu1 %v5445_v5  ;;  %v4506_v2 = vpop.f32.mrf.mxu1  ;;  %v7896_v4 = vld [vmem:[#allocation11 + $0xd74] sm:$0xf]  ;;  %v6728_v63 = vld [vmem:[#allocation11 + $0xa70] sm:$0xf] }
 0x358   :  { %4724 = vmatpush.bf16.msra.mxu2 %v6597_v8  ;;  %v7114_v5 = vld [vmem:[#allocation11 + $0xdf0] sm:$0xf0]  ;;  %v5832_v8 = vld [vmem:[#allocation11 + $0x370] sm:$0xf] }
 0x359   :  { %4687 = vmatmul.bf16.vlgmr.msrb.gmra.mxu3 %v8329_v52  ;;  %v5833_v33 = vor.u32 %v7592_v17, %v5832_v8  ;;  %v5706_v50 = vld [vmem:[#allocation11 + $0x2f0] sm:$0xf0] }
 0x35a   :  { %4731 = vmatpush.bf16.msra.mxu3 %v6345_v12  ;;  %4713 = vmatmul.bf16.vlgmr.msra.gmra.mxu1 %v8329_v52  ;;  %v5965_v12 = vor.u32 %v7608_v0, %v5962_v1  ;;  %v5709_v61 = vor.u32 %v7544_v49, %v5706_v50  ;;  %v6730_v17 = vld [vmem:[#allocation11 + $0xaf0] sm:$0xf0] }
 0x35b   :  { %4757 = vmatpush.bf16.msrb.mxu1 %v6349_v20  ;;  %4699 = vmatpush.bf16.msra.mxu0 %v6465_v29  ;;  %v7117_v20 = vor.u32 %v7896_v4, %v7114_v5  ;;  %v4493_v26 = vpop.f32.mrf.mxu0  ;;  %v1398_v29 = vperm.slane %v8437_v42, 3  ;;  %v7816_v4 = vld [vmem:[#allocation11 + $0xaec] sm:$0xf0]  ;;  %v7512_v5 = vld [vmem:[#allocation11 + $0x174] sm:$0xf] }
 0x35c   :  { %4725 = vmatpush.bf16.msra.mxu2 %v6469_v36  ;;  %v4480_v30 = vpop.f32.mrf.mxu3  ;;  %v6985_v36 = vor.u32 %v7880_v21, %v6984_v14  ;;  %v7480_v28 = vld [vmem:[#allocation11 + $0x74] sm:$0xf] }
 0x35e   :  { %4732 = vmatpush.bf16.msra.mxu3 %v6217_v37  ;;  %4700 = vmatmul.bf16.vlgmr.msra.gmra.mxu0 %v8333_v3  ;;  %v5837_v37 = vor.u32 %v7576_v23, %v5834_v25  ;;  %v7496_v23 = vld [vmem:[#allocation11 + $0xec] sm:$0xf0] }
 0x35f   :  { %4744 = vmatpush.bf16.msrb.mxu0 %v7369_v40  ;;  %4758 = vmatpush.bf16.msrb.mxu1 %v6221_v44  ;;  %v4481_v40 = vadd.f32 %v4480_v30, %v1397_v9  ;;  %v5704_v44 = vld [vmem:[#allocation11 + $0x270] sm:$0xf]  ;;  %v4508_v53 = vpop.f32.mrf.mxu1  ;;  %v6602_v30 = vld [vmem:[#allocation11 + $0x9f0] sm:$0xf0] }
 0x360   :  { %4770 = vmatpush.bf16.msrb.mxu2 %v7373_v48  ;;  %v7848_v48 = vld [vmem:[#allocation11 + $0xbec] sm:$0xf0] }
 0x361   :  { %4726 = vmatmul.bf16.vlgmr.msra.gmra.mxu2 %v8333_v3  ;;  %v8451_v51 = vadd.f32 %v4493_v26, %v4481_v40  ;;  %v6857_v59 = vor.u32 %v7848_v48, %v6856_v47  ;;  %v5448_v9 = vld [vmem:[#allocation11 + $0x70] sm:$0xf] }
 0x362   :  { %4733 = vmatpush.bf16.msra.mxu3 %v6089_v55  ;;  %v6858_v55 = vld [vmem:[#allocation11 + $0xbf0] sm:$0xf0]  ;;  %v6600_v25 = vld [vmem:[#allocation11 + $0x970] sm:$0xf]  ;;  %v5449_v40 = vor.u32 %v7496_v23, %v5448_v9  ;;  %v7248_v9 = vld [vmem:[#allocation11 + $0xe78] sm:$0xf] }
 0x363   :  { %4745 = vmatpush.bf16.msrb.mxu0 %v7241_v58  ;;  %4759 = vmatpush.bf16.msrb.mxu1 %v6093_v45  ;;  %v5705_v58 = vor.u32 %v7560_v46, %v5704_v44  ;;  %v4507_v45 = vadd.f32 %v4506_v2, %v1398_v29  ;;  %v6861_v0 = vor.u32 %v7832_v54, %v6858_v55  ;;  %v7784_v26 = vld [vmem:[#allocation11 + $0x9ec] sm:$0xf0]  ;;  %v5450_v29 = vld [vmem:[#allocation11 + $0xf0] sm:$0xf0]  ;;  %v7705_v44 = vld [vmem:[#allocation11 + $0x77c] sm:$0xf] }
 0x364   :  { %4771 = vmatpush.bf16.msrb.mxu2 %v7245_v62  ;;  %v7528_v62 = vld [vmem:[#allocation11 + $0x1ec] sm:$0xf0]  ;;  %v4519_v1 = vpop.f32.mrf.mxu2  ;;  %v4482_v14 = vpop.f32.mrf.mxu3  ;;  %v6354_v46 = vld [vmem:[#allocation11 + $0x7f8] sm:$0xf0]  ;;  %v6601_v47 = vor.u32 %v7784_v26, %v6600_v25  ;;  %v7736_v55 = vld [vmem:[#allocation11 + $0x874] sm:$0xf] }
 0x365   :  { %v8453_v8 = vadd.f32 %v4519_v1, %v4507_v45  ;;  %v5577_v2 = vor.u32 %v7528_v62, %v5576_v60  ;;  %v6472_v48 = vld [vmem:[#allocation11 + $0x870] sm:$0xf]  ;;  %v6357_v45 = vor.u32 %v7705_v44, %v6354_v46  ;;  %v7376_v60 = vld [vmem:[#allocation11 + $0xf78] sm:$0xf]  ;;  %v7641_v23 = vld [vmem:[#allocation11 + $0x57c] sm:$0xf] }
 0x366   :  { %4734 = vmatpush.bf16.msra.mxu3 %v5961_v7  ;;  %v5578_v7 = vld [vmem:[#allocation11 + $0x1f0] sm:$0xf0]  ;;  %v7752_v54 = vld [vmem:[#allocation11 + $0x8ec] sm:$0xf0]  ;;  %v7977_v62 = vld [vmem:[#allocation11 + $0xff4] sm:$0xf0] }
 0x367   :  { %4746 = vmatpush.bf16.msrb.mxu0 %v7113_v10  ;;  %4760 = vmatpush.bf16.msrb.mxu1 %v5965_v12  ;;  %v4495_v10 = vpop.f32.mrf.mxu0  ;;  %v7800_v12 = vld [vmem:[#allocation11 + $0xa74] sm:$0xf]  ;;  %v5581_v21 = vor.u32 %v7512_v5, %v5578_v7  ;;  %v6473_v1 = vor.u32 %v7752_v54, %v6472_v48  ;;  %v7378_v5 = vld [vmem:[#allocation11 + $0xff8] sm:$0xf0]  ;;  %v7657_v14 = vld [vmem:[#allocation11 + $0x5f4] sm:$0xf0] }
 0x368   :  { %4772 = vmatpush.bf16.msrb.mxu2 %v7117_v20  ;;  %v6729_v20 = vor.u32 %v7816_v4, %v6728_v63  ;;  %v6733_v27 = vor.u32 %v7800_v12, %v6730_v17  ;;  %v7673_v63 = vld [vmem:[#allocation11 + $0x67c] sm:$0xf]  ;;  %v7377_v12 = vor.u32 %v7977_v62, %v7376_v60  ;;  %v7913_v44 = vld [vmem:[#allocation11 + $0xdf4] sm:$0xf0] }
 0x369   :  { %v7961_v4 = vld [vmem:[#allocation11 + $0xf7c] sm:$0xf]  ;;  %v7881_v60 = vld [vmem:[#allocation11 + $0xcf4] sm:$0xf0] }
 0x36a   :  { %4735 = vmatpush.bf16.msra.mxu3 %v5833_v33  ;;  %v7768_v33 = vld [vmem:[#allocation11 + $0x974] sm:$0xf]  ;;  %v6098_v25 = vld [vmem:[#allocation11 + $0x5f8] sm:$0xf0] }
 0x36b   :  { %4747 = vmatpush.bf16.msrb.mxu0 %v6985_v36  ;;  %4761 = vmatpush.bf16.msrb.mxu1 %v5837_v37  ;;  %v6352_v36 = vld [vmem:[#allocation11 + $0x778] sm:$0xf]  ;;  %v6605_v49 = vor.u32 %v7768_v33, %v6602_v30  ;;  %v7929_v26 = vld [vmem:[#allocation11 + $0xe7c] sm:$0xf]  ;;  %v6101_v33 = vor.u32 %v7641_v23, %v6098_v25 }
 0x36c   :  { %4773 = vmatpush.bf16.msrb.mxu2 %v6989_v39  ;;  %v7721_v37 = vld [vmem:[#allocation11 + $0x7f4] sm:$0xf0]  ;;  %v5453_v39 = vor.u32 %v7480_v28, %v5450_v29  ;;  %v4521_v50 = vpop.f32.mrf.mxu2  ;;  %v7609_v46 = vld [vmem:[#allocation11 + $0x47c] sm:$0xf] }
 0x36d   :  { %v6353_v53 = vor.u32 %v7721_v37, %v6352_v36  ;;  %v5968_v30 = vld [vmem:[#allocation11 + $0x478] sm:$0xf]  ;;  %v7897_v48 = vld [vmem:[#allocation11 + $0xd7c] sm:$0xf] }
 0x36e   :  { %4736 = vmatpush.bf16.msra.mxu3 %v5705_v58  ;;  %v6474_v58 = vld [vmem:[#allocation11 + $0x8f0] sm:$0xf0]  ;;  %v7625_v36 = vld [vmem:[#allocation11 + $0x4f4] sm:$0xf0]  ;;  %v7577_v62 = vld [vmem:[#allocation11 + $0x37c] sm:$0xf] }
 0x36f   :  { %4748 = vmatpush.bf16.msrb.mxu0 %v6857_v59  ;;  %4762 = vmatpush.bf16.msrb.mxu1 %v5709_v61  ;;  %v6224_v59 = vld [vmem:[#allocation11 + $0x678] sm:$0xf]  ;;  %v6477_v7 = vor.u32 %v7736_v55, %v6474_v58  ;;  %v5969_v50 = vor.u32 %v7625_v36, %v5968_v30  ;;  %v7545_v25 = vld [vmem:[#allocation11 + $0x27c] sm:$0xf] }
 0x370   :  { %4774 = vmatpush.bf16.msrb.mxu2 %v6861_v0  ;;  %v7689_v61 = vld [vmem:[#allocation11 + $0x6f4] sm:$0xf0]  ;;  %v6226_v0 = vld [vmem:[#allocation11 + $0x6f8] sm:$0xf0] }
 0x371   :  { %v6225_v10 = vor.u32 %v7689_v61, %v6224_v59  ;;  %v6229_v17 = vor.u32 %v7673_v63, %v6226_v0  ;;  %v7120_v37 = vld [vmem:[#allocation11 + $0xd78] sm:$0xf]  ;;  %v1399_v59 = vperm.slane %v8437_v42, 4  ;;  %v5842_v63 = vld [vmem:[#allocation11 + $0x3f8] sm:$0xf0] }
 0x372   :  { %4737 = vmatpush.bf16.msra.mxu3 %v5577_v2  ;;  %v6096_v2 = vld [vmem:[#allocation11 + $0x578] sm:$0xf]  ;;  %v7121_v54 = vor.u32 %v7913_v44, %v7120_v37 }
 0x373   :  { %4749 = vmatpush.bf16.msrb.mxu0 %v6729_v20  ;;  %4763 = vmatpush.bf16.msrb.mxu1 %v5581_v21  ;;  %v7381_v20 = vor.u32 %v7961_v4, %v7378_v5  ;;  %v7945_v21 = vld [vmem:[#allocation11 + $0xef4] sm:$0xf0]  ;;  %v6097_v28 = vor.u32 %v7657_v14, %v6096_v2  ;;  %v6994_v4 = vld [vmem:[#allocation11 + $0xcf8] sm:$0xf0]  ;;  %v1400_v5 = vperm.slane %v8437_v42, 5 }
 0x374   :  { %4775 = vmatpush.bf16.msrb.mxu2 %v6733_v27  ;;  %v7250_v27 = vld [vmem:[#allocation11 + $0xef8] sm:$0xf0]  ;;  %v7249_v29 = vor.u32 %v7945_v21, %v7248_v9  ;;  %v7593_v58 = vld [vmem:[#allocation11 + $0x3f4] sm:$0xf0] }
 0x375   :  { %v5712_v14 = vld [vmem:[#allocation11 + $0x278] sm:$0xf] }
 0x376   :  { %4738 = vmatpush.bf16.msra.mxu3 %v5449_v40  ;;  %v7253_v40 = vor.u32 %v7929_v26, %v7250_v27  ;;  %v7561_v9 = vld [vmem:[#allocation11 + $0x2f4] sm:$0xf0]  ;;  %v5714_v26 = vld [vmem:[#allocation11 + $0x2f8] sm:$0xf0] }
 0x377   :  { %4750 = vmatpush.bf16.msrb.mxu0 %v6601_v47  ;;  %4764 = vmatpush.bf16.msrb.mxu1 %v5453_v39  ;;  %v5970_v47 = vld [vmem:[#allocation11 + $0x4f8] sm:$0xf0]  ;;  %v4558_v39 = vpop.f32.mrf.mxu1  ;;  %v7849_v23 = vld [vmem:[#allocation11 + $0xbf4] sm:$0xf0]  ;;  %v5713_v30 = vor.u32 %v7561_v9, %v5712_v14 }
 0x378   :  { %4776 = vmatpush.bf16.msrb.mxu2 %v6605_v49  ;;  %v7122_v49 = vld [vmem:[#allocation11 + $0xdf8] sm:$0xf0]  ;;  %v5973_v55 = vor.u32 %v7609_v46, %v5970_v47  ;;  %v4559_v36 = vadd.f32 %v4558_v39, %v1400_v5  ;;  %v5584_v44 = vld [vmem:[#allocation11 + $0x178] sm:$0xf] }
 0x379   :  { %4739 = vmatmul.bf16.vlgmr.msra.gmra.mxu3 %v8329_v52  ;;  %v7125_v61 = vor.u32 %v7897_v48, %v7122_v49  ;;  %v7529_v46 = vld [vmem:[#allocation11 + $0x1f4] sm:$0xf0] }
 0x37a   :  { %4783 = vmatpush.bf16.msrb.mxu3 %v6353_v53  ;;  %4765 = vmatmul.bf16.vlgmr.msrb.gmra.mxu1 %v8329_v52  ;;  %v5840_v53 = vld [vmem:[#allocation11 + $0x378] sm:$0xf]  ;;  %v5585_v39 = vor.u32 %v7529_v46, %v5584_v44  ;;  %v1402_v44 = vperm.slane %v8437_v42, 7 }
 0x37b   :  { %4809 = vmatpush.bf16.msra.mxu1 %v6357_v45  ;;  %4751 = vmatpush.bf16.msrb.mxu0 %v6473_v1  ;;  %v6992_v45 = vld [vmem:[#allocation11 + $0xc78] sm:$0xf]  ;;  %v4545_v0 = vpop.f32.mrf.mxu0  ;;  %v7865_v1 = vld [vmem:[#allocation11 + $0xc7c] sm:$0xf] }
 0x37c   :  { %4777 = vmatpush.bf16.msrb.mxu2 %v6477_v7  ;;  %v5841_v7 = vor.u32 %v7593_v58, %v5840_v53  ;;  %v6997_v21 = vor.u32 %v7865_v1, %v6994_v4  ;;  %v6736_v47 = vld [vmem:[#allocation11 + $0xa78] sm:$0xf]  ;;  %v7513_v53 = vld [vmem:[#allocation11 + $0x17c] sm:$0xf] }
 0x37d   :  { %v6608_v1 = vld [vmem:[#allocation11 + $0x978] sm:$0xf] }
 0x37e   :  { %4784 = vmatpush.bf16.msrb.mxu3 %v6225_v10  ;;  %4752 = vmatmul.bf16.vlgmr.msrb.gmra.mxu0 %v8333_v3  ;;  %v4532_v10 = vpop.f32.mrf.mxu3  ;;  %v7785_v5 = vld [vmem:[#allocation11 + $0x9f4] sm:$0xf0] }
 0x37f   :  { %4796 = vmatpush.bf16.msra.mxu0 %v7377_v12  ;;  %4810 = vmatpush.bf16.msra.mxu1 %v6229_v17  ;;  %v6993_v12 = vor.u32 %v7881_v60, %v6992_v45  ;;  %v5845_v17 = vor.u32 %v7577_v62, %v5842_v63  ;;  %v4533_v2 = vadd.f32 %v4532_v10, %v1399_v59  ;;  %v7801_v45 = vld [vmem:[#allocation11 + $0xa7c] sm:$0xf]  ;;  %v5456_v63 = vld [vmem:[#allocation11 + $0x78] sm:$0xf] }
 0x380   :  { %4822 = vmatpush.bf16.msra.mxu2 %v7381_v20  ;;  %v6864_v20 = vld [vmem:[#allocation11 + $0xb78] sm:$0xf]  ;;  %v6738_v59 = vld [vmem:[#allocation11 + $0xaf8] sm:$0xf0]  ;;  %v6609_v14 = vor.u32 %v7785_v5, %v6608_v1 }
 0x381   :  { %4778 = vmatmul.bf16.vlgmr.msrb.gmra.mxu2 %v8333_v3  ;;  %v8461_v27 = vadd.f32 %v4545_v0, %v4533_v2  ;;  %v6865_v37 = vor.u32 %v7849_v23, %v6864_v20  ;;  %v7497_v0 = vld [vmem:[#allocation11 + $0xf4] sm:$0xf0]  ;;  %v6741_v4 = vor.u32 %v7801_v45, %v6738_v59  ;;  %v5458_v10 = vld [vmem:[#allocation11 + $0xf8] sm:$0xf0] }
 0x382   :  { %4785 = vmatpush.bf16.msrb.mxu3 %v6097_v28  ;;  %v4560_v28 = vpop.f32.mrf.mxu1  ;;  %v5457_v2 = vor.u32 %v7497_v0, %v5456_v63  ;;  %v6480_v23 = vld [vmem:[#allocation11 + $0x878] sm:$0xf] }
 0x383   :  { %4797 = vmatpush.bf16.msra.mxu0 %v7249_v29  ;;  %4811 = vmatpush.bf16.msra.mxu1 %v6101_v33  ;;  %v7833_v29 = vld [vmem:[#allocation11 + $0xb7c] sm:$0xf]  ;;  %v4547_v58 = vpop.f32.mrf.mxu0 }
 0x384   :  { %4823 = vmatpush.bf16.msra.mxu2 %v7253_v40  ;;  %v6866_v33 = vld [vmem:[#allocation11 + $0xbf8] sm:$0xf0]  ;;  %v5717_v40 = vor.u32 %v7545_v25, %v5714_v26  ;;  %v4571_v49 = vpop.f32.mrf.mxu2  ;;  %v7753_v25 = vld [vmem:[#allocation11 + $0x8f4] sm:$0xf0] }
 0x385   :  { %v6869_v48 = vor.u32 %v7833_v29, %v6866_v33  ;;  %v7737_v26 = vld [vmem:[#allocation11 + $0x87c] sm:$0xf]  ;;  %v6481_v29 = vor.u32 %v7753_v25, %v6480_v23 }
 0x386   :  { %4786 = vmatpush.bf16.msrb.mxu3 %v5969_v50  ;;  %v7817_v50 = vld [vmem:[#allocation11 + $0xaf4] sm:$0xf0]  ;;  %v6482_v28 = vld [vmem:[#allocation11 + $0x8f8] sm:$0xf0] }
 0x387   :  { %4798 = vmatpush.bf16.msra.mxu0 %v7121_v54  ;;  %4812 = vmatpush.bf16.msra.mxu1 %v5973_v55  ;;  %v5586_v54 = vld [vmem:[#allocation11 + $0x1f8] sm:$0xf0]  ;;  %v8463_v55 = vadd.f32 %v4571_v49, %v4559_v36  ;;  %v6737_v60 = vor.u32 %v7817_v50, %v6736_v47  ;;  %v6485_v33 = vor.u32 %v7737_v26, %v6482_v28  ;;  %v1401_v36 = vperm.slane %v8437_v42, 6 }
 0x388   :  { %4824 = vmatpush.bf16.msra.mxu2 %v7125_v61  ;;  %v4534_v61 = vpop.f32.mrf.mxu3  ;;  %v5589_v62 = vor.u32 %v7513_v53, %v5586_v54 }
 0x38a   :  { %4787 = vmatpush.bf16.msrb.mxu3 %v5841_v7  ;;  %v7481_v7 = vld [vmem:[#allocation11 + $0x7c] sm:$0xf] }
 0x38b   :  { %4799 = vmatpush.bf16.msra.mxu0 %v6993_v12  ;;  %4813 = vmatpush.bf16.msra.mxu1 %v5845_v17  ;;  %v7769_v12 = vld [vmem:[#allocation11 + $0x97c] sm:$0xf]  ;;  %v5461_v9 = vor.u32 %v7481_v7, %v5458_v10  ;;  %v4835_v10 = vadd.f32 %v8363_v15, %v8361_v6 }
 0x38c   :  { %4825 = vmatpush.bf16.msra.mxu2 %v6997_v21  ;;  %v6610_v17 = vld [vmem:[#allocation11 + $0x9f8] sm:$0xf0]  ;;  %v4573_v21 = vpop.f32.mrf.mxu2 }
 0x38d   :  { %v6613_v20 = vor.u32 %v7769_v12, %v6610_v17  ;;  %v4836_v12 = vadd.f32 %v4835_v10, %v8367_v16 }
 0x38e   :  { %4788 = vmatpush.bf16.msrb.mxu3 %v5713_v30 }
 0x38f   :  { %4800 = vmatpush.bf16.msra.mxu0 %v6865_v37  ;;  %4814 = vmatpush.bf16.msra.mxu1 %v5717_v40 }
 0x390   :  { %4826 = vmatpush.bf16.msra.mxu2 %v6869_v48 }
 0x392   :  { %4789 = vmatpush.bf16.msrb.mxu3 %v5585_v39 }
 0x393   :  { %4801 = vmatpush.bf16.msra.mxu0 %v6737_v60  ;;  %4815 = vmatpush.bf16.msra.mxu1 %v5589_v62 }
 0x394   :  { %4827 = vmatpush.bf16.msra.mxu2 %v6741_v4 }
 0x396   :  { %4790 = vmatpush.bf16.msrb.mxu3 %v5457_v2  ;;  %v4837_v2 = vadd.f32 %v4836_v12, %v8371_v24 }
 0x397   :  { %4802 = vmatpush.bf16.msra.mxu0 %v6609_v14  ;;  %4816 = vmatpush.bf16.msra.mxu1 %v5461_v9  ;;  %v4610_v30 = vpop.f32.mrf.mxu1 }
 0x398   :  { %4828 = vmatpush.bf16.msra.mxu2 %v6613_v20  ;;  %v4611_v49 = vadd.f32 %v4610_v30, %v1402_v44  ;;  %v4838_v14 = vadd.f32 %v4837_v2, %v8377_v18 }
 0x399   :  { %4791 = vmatmul.bf16.vlgmr.msrb.gmra.mxu3 %v8329_v52 }
 0x39a   :  { %4817 = vmatmul.bf16.vlgmr.msra.gmra.mxu1 %v8329_v52  ;;  %v4839_v9 = vadd.f32 %v4838_v14, %v8379_v34 }
 0x39b   :  { %4803 = vmatpush.bf16.msra.mxu0 %v6481_v29  ;;  %v4597_v37 = vpop.f32.mrf.mxu0 }
 0x39c   :  { %4829 = vmatpush.bf16.msra.mxu2 %v6485_v33  ;;  %v4584_v40 = vpop.f32.mrf.mxu3  ;;  %v4840_v20 = vadd.f32 %v4839_v9, %v8387_v31 }
 0x39d   :  { %v4585_v46 = vadd.f32 %v4584_v40, %v1401_v36 }
 0x39e   :  { %4804 = vmatmul.bf16.vlgmr.msra.gmra.mxu0 %v8333_v3  ;;  %v4841_v23 = vadd.f32 %v4840_v20, %v8389_v32 }
 0x39f   :  { %4830 = vmatmul.bf16.vlgmr.msra.gmra.mxu2 %v8333_v3  ;;  %v8471_v47 = vadd.f32 %v4597_v37, %v4585_v46  ;;  %v4612_v48 = vpop.f32.mrf.mxu1  ;;  %v8475_v3 = vld [vmem:[#allocation13 + $0x18] sm:$0xff] }
 0x3a0   :  { %v1403_v59 = vperm.slane %v8475_v3, 0  ;;  %v1404_v42 = vperm.slane %v8475_v3, 1  ;;  %v4842_v25 = vadd.f32 %v4841_v23, %v8399_v13  ;;  %v1405_v12 = vperm.slane %v8475_v3, 2 }
 0x3a1   :  { %v1406_v20 = vperm.slane %v8475_v3, 3  ;;  %v1407_v23 = vperm.slane %v8475_v3, 4 }
 0x3a2   :  { %v4843_v29 = vadd.f32 %v4842_v25, %v8401_v35 }
 0x3a3   :  { %v4599_v53 = vpop.f32.mrf.mxu0 }
 0x3a4   :  { %v4623_v50 = vpop.f32.mrf.mxu2  ;;  %v4586_v54 = vpop.f32.mrf.mxu3  ;;  %v4844_v30 = vadd.f32 %v4843_v29, %v8409_v22 }
 0x3a5   :  { %v8473_v52 = vadd.f32 %v4623_v50, %v4611_v49 }
 0x3a6   :  { %v4845_v44 = vadd.f32 %v4844_v30, %v8411_v43 }
 0x3a8   :  { %v4846_v46 = vadd.f32 %v4845_v44, %v8419_v38  ;;  %v1408_v44 = vperm.slane %v8475_v3, 5 }
 0x3aa   :  { %v4847_v49 = vadd.f32 %v4846_v46, %v8421_v57 }
 0x3ac   :  { %v4625_v58 = vpop.f32.mrf.mxu2  ;;  %v4848_v50 = vadd.f32 %v4847_v49, %v8429_v56 }
 0x3ae   :  { %v4849_v53 = vadd.f32 %v4848_v50, %v8431_v11  ;;  %v1409_v50 = vperm.slane %v8475_v3, 6 }
 0x3b0   :  { %v4850_v54 = vadd.f32 %v4849_v53, %v8441_v19 }
 0x3b7   :  { %v4662_v45 = vpop.f32.mrf.mxu1 }
 0x3b8   :  { %v4663_v0 = vadd.f32 %v4662_v45, %v1404_v42  ;;  %v4851_v45 = vadd.f32 %v4850_v54, %v8443_v41 }
 0x3bb   :  { %v4649_v39 = vpop.f32.mrf.mxu0 }
 0x3bc   :  { %v4636_v61 = vpop.f32.mrf.mxu3 }
 0x3bd   :  { %v4637_v60 = vadd.f32 %v4636_v61, %v1403_v59  ;;  %v4852_v59 = vadd.f32 %v4851_v45, %v8451_v51 }
 0x3bf   :  { %v8479_v62 = vadd.f32 %v4649_v39, %v4637_v60  ;;  %v4664_v63 = vpop.f32.mrf.mxu1  ;;  %v4853_v42 = vadd.f32 %v4852_v59, %v8453_v8 }
 0x3c1   :  { %v4854_v63 = vadd.f32 %v4853_v42, %v8461_v27 }
 0x3c3   :  { %v4651_v5 = vpop.f32.mrf.mxu0 }
 0x3c4   :  { %v4675_v1 = vpop.f32.mrf.mxu2  ;;  %v4638_v7 = vpop.f32.mrf.mxu3 }
 0x3c5   :  { %v8481_v4 = vadd.f32 %v4675_v1, %v4663_v0  ;;  %v4855_v7 = vadd.f32 %v4854_v63, %v8463_v55 }
 0x3c7   :  { %v4856_v10 = vadd.f32 %v4855_v7, %v8471_v47 }
 0x3c9   :  { %v4857_v2 = vadd.f32 %v4856_v10, %v8473_v52 }
 0x3cb   :  { %v4858_v9 = vadd.f32 %v4857_v2, %v8479_v62 }
 0x3cc   :  { %v4677_v17 = vpop.f32.mrf.mxu2 }
 0x3cd   :  { %v4859_v29 = vadd.f32 %v4858_v9, %v8481_v4 }
 0x3d7   :  { %v4714_v21 = vpop.f32.mrf.mxu1 }
 0x3db   :  { %v4701_v26 = vpop.f32.mrf.mxu0 }
 0x3dc   :  { %v4688_v28 = vpop.f32.mrf.mxu3 }
 0x3dd   :  { %v4689_v14 = vadd.f32 %v4688_v28, %v1405_v12 }
 0x3df   :  { %v4716_v33 = vpop.f32.mrf.mxu1  ;;  %v8511_v25 = vadd.f32 %v4701_v26, %v4689_v14 }
 0x3e0   :  { %v4715_v33 = vadd.f32 %v4714_v21, %v1406_v20 }
 0x3e3   :  { %v4703_v37 = vpop.f32.mrf.mxu0 }
 0x3e4   :  { %v4727_v36 = vpop.f32.mrf.mxu2  ;;  %v4690_v40 = vpop.f32.mrf.mxu3 }
 0x3e5   :  { %v8514_v37 = vadd.f32 %v4727_v36, %v4715_v33  ;;  %v4860_v40 = vadd.f32 %v4859_v29, %v8511_v25  ;;  %v1410_v36 = vperm.slane %v8475_v3, 7 }
 0x3ec   :  { %v4729_v48 = vpop.f32.mrf.mxu2 }
 0x3ed   :  { %v4861_v48 = vadd.f32 %v4860_v40, %v8514_v37 }
 0x3f7   :  { %v4766_v58 = vpop.f32.mrf.mxu1 }
 0x3f8   :  { %v4767_v49 = vadd.f32 %v4766_v58, %v1408_v44  ;;  %v8545_v44 = vpop.permute.xlu1 %4909 }
 0x3fb   :  { %v4753_v39 = vpop.f32.mrf.mxu0 }
 0x3fc   :  { %v4740_v61 = vpop.f32.mrf.mxu3 }
 0x3fd   :  { %v4741_v30 = vadd.f32 %v4740_v61, %v1407_v23 }
 0x3ff   :  { %v4768_v60 = vpop.f32.mrf.mxu1  ;;  %v8518_v46 = vadd.f32 %v4753_v39, %v4741_v30 }
 0x401   :  { %v4862_v53 = vadd.f32 %v4861_v48, %v8518_v46 }
 0x403   :  { %v4755_v1 = vpop.f32.mrf.mxu0 }
 0x404   :  { %v4779_v0 = vpop.f32.mrf.mxu2  ;;  %v4742_v5 = vpop.f32.mrf.mxu3 }
 0x405   :  { %v8522_v26 = vadd.f32 %v4779_v0, %v4767_v49 }
 0x407   :  { %v4863_v59 = vadd.f32 %v4862_v53, %v8522_v26 }
 0x40c   :  { %v4781_v17 = vpop.f32.mrf.mxu2 }
 0x417   :  { %v4818_v28 = vpop.f32.mrf.mxu1 }
 0x418   :  { %v4819_v42 = vadd.f32 %v4818_v28, %v1410_v36 }
 0x41b   :  { %v4805_v21 = vpop.f32.mrf.mxu0 }
 0x41c   :  { %v4792_v54 = vpop.f32.mrf.mxu3 }
 0x41d   :  { %v4793_v45 = vadd.f32 %v4792_v54, %v1409_v50 }
 0x41f   :  { %v8527_v61 = vadd.f32 %v4805_v21, %v4793_v45  ;;  %v4820_v39 = vpop.f32.mrf.mxu1 }
 0x421   :  { %v4864_v60 = vadd.f32 %v4863_v59, %v8527_v61 }
 0x422   :  { %v4831_v58 = vpop.f32.mrf.mxu2 }
 0x423   :  { %v8530_v63 = vadd.f32 %v4831_v58, %v4819_v42  ;;  %v4807_v0 = vpop.f32.mrf.mxu0 }
 0x424   :  { %v4794_v1 = vpop.f32.mrf.mxu3 }
 0x425   :  { %v4865_v5 = vadd.f32 %v4864_v60, %v8530_v63 }
 0x427   :  { %4866 = vadd.xlane.f32.xlu0 %v4865_v5 }
 0x42a   :  { %v4833_v7 = vpop.f32.mrf.mxu2 }
 0x49a   :  { %v4867_v10 = vpop.xlane.xlu0 %4866 }
 0x49b   :  { %v4868_v3 = vrot.slane %v4867_v10, 4 }
 0x49d   :  { %v4869_v12 = vadd.f32 %v4868_v3, %v4867_v10 }
 0x49f   :  { %v4870_v17 = vrot.slane %v4869_v12, 2 }
 0x4a1   :  { %v4871_v2 = vadd.f32 %v4870_v17, %v4869_v12 }
 0x4a3   :  { %v4872_v14 = vrot.slane %v4871_v2, 1 }
 0x4a5   :  { %v4873_v9 = vadd.f32 %v4872_v14, %v4871_v2 }
 0x4a7   :  { %v8533_v20 = vmul.f32 3.0517578e-05, %v4873_v9 }
 0x4a9   :  { %v4875_v23 = vsub.f32 %v8361_v6, %v8533_v20  ;;  %v4876_v29 = vsub.f32 %v8363_v15, %v8533_v20  ;;  %v4877_v33 = vsub.f32 %v8367_v16, %v8533_v20  ;;  %v4878_v30 = vsub.f32 %v8371_v24, %v8533_v20 }
 0x4aa   :  { %v4879_v40 = vsub.f32 %v8377_v18, %v8533_v20  ;;  %v4880_v28 = vsub.f32 %v8379_v34, %v8533_v20  ;;  %v4881_v6 = vsub.f32 %v8387_v31, %v8533_v20  ;;  %v4882_v24 = vsub.f32 %v8389_v32, %v8533_v20 }
 0x4ab   :  { %v4912_v48 = vadd.f32 %v8545_v44, %v4875_v23  ;;  %v4913_v15 = vadd.f32 %v8545_v44, %v4876_v29  ;;  %v4914_v16 = vadd.f32 %v8545_v44, %v4877_v33  ;;  %v4915_v49 = vadd.f32 %v8545_v44, %v4878_v30 }
 0x4ac   :  { %v4883_v18 = vsub.f32 %v8399_v13, %v8533_v20  ;;  %v4916_v50 = vadd.f32 %v8545_v44, %v4879_v40  ;;  %v4884_v34 = vsub.f32 %v8401_v35, %v8533_v20  ;;  %v4917_v31 = vadd.f32 %v8545_v44, %v4880_v28 }
 0x4ad   :  { %4944 = vst [vmem:[#allocation16] sm:$0xff] %v4912_v48  ;;  %v4885_v53 = vsub.f32 %v8409_v22, %v8533_v20  ;;  %v4918_v21 = vadd.f32 %v8545_v44, %v4881_v6  ;;  %v4886_v32 = vsub.f32 %v8411_v43, %v8533_v20  ;;  %v4919_v13 = vadd.f32 %v8545_v44, %v4882_v24 }
 0x4ae   :  { %4945 = vst [vmem:[#allocation16 + $0x8] sm:$0xff] %v4913_v15  ;;  %v4887_v54 = vsub.f32 %v8419_v38, %v8533_v20  ;;  %v4920_v35 = vadd.f32 %v8545_v44, %v4883_v18  ;;  %v4888_v36 = vsub.f32 %v8421_v57, %v8533_v20  ;;  %v4921_v22 = vadd.f32 %v8545_v44, %v4884_v34 }
 0x4af   :  { %4946 = vst [vmem:[#allocation16 + $0x10] sm:$0xff] %v4914_v16  ;;  %v4889_v45 = vsub.f32 %v8429_v56, %v8533_v20  ;;  %v4922_v43 = vadd.f32 %v8545_v44, %v4885_v53  ;;  %v4890_v59 = vsub.f32 %v8431_v11, %v8533_v20  ;;  %v4923_v38 = vadd.f32 %v8545_v44, %v4886_v32 }
 0x4b0   :  { %4947 = vst [vmem:[#allocation16 + $0x18] sm:$0xff] %v4915_v49  ;;  %v4891_v39 = vsub.f32 %v8441_v19, %v8533_v20  ;;  %v4924_v57 = vadd.f32 %v8545_v44, %v4887_v54  ;;  %v4892_v42 = vsub.f32 %v8443_v41, %v8533_v20  ;;  %v4925_v56 = vadd.f32 %v8545_v44, %v4888_v36 }
 0x4b1   :  { %4948 = vst [vmem:[#allocation16 + $0x20] sm:$0xff] %v4916_v50  ;;  %v4893_v60 = vsub.f32 %v8451_v51, %v8533_v20  ;;  %v4926_v11 = vadd.f32 %v8545_v44, %v4889_v45  ;;  %v4894_v58 = vsub.f32 %v8453_v8, %v8533_v20  ;;  %v4927_v19 = vadd.f32 %v8545_v44, %v4890_v59 }
 0x4b2   :  { %4949 = vst [vmem:[#allocation16 + $0x28] sm:$0xff] %v4917_v31  ;;  %v4895_v0 = vsub.f32 %v8461_v27, %v8533_v20  ;;  %v4928_v41 = vadd.f32 %v8545_v44, %v4891_v39  ;;  %v4896_v1 = vsub.f32 %v8463_v55, %v8533_v20  ;;  %v4929_v51 = vadd.f32 %v8545_v44, %v4892_v42 }
 0x4b3   :  { %4950 = vst [vmem:[#allocation16 + $0x30] sm:$0xff] %v4918_v21  ;;  %v4897_v5 = vsub.f32 %v8471_v47, %v8533_v20  ;;  %v4930_v8 = vadd.f32 %v8545_v44, %v4893_v60  ;;  %v4898_v7 = vsub.f32 %v8473_v52, %v8533_v20  ;;  %v4931_v27 = vadd.f32 %v8545_v44, %v4894_v58 }
 0x4b4   :  { %4951 = vst [vmem:[#allocation16 + $0x38] sm:$0xff] %v4919_v13  ;;  %v4899_v10 = vsub.f32 %v8479_v62, %v8533_v20  ;;  %v4932_v55 = vadd.f32 %v8545_v44, %v4895_v0  ;;  %v4900_v3 = vsub.f32 %v8481_v4, %v8533_v20  ;;  %v4933_v47 = vadd.f32 %v8545_v44, %v4896_v1 }
 0x4b5   :  { %4952 = vst [vmem:[#allocation16 + $0x40] sm:$0xff] %v4920_v35  ;;  %v4901_v12 = vsub.f32 %v8511_v25, %v8533_v20  ;;  %v4934_v52 = vadd.f32 %v8545_v44, %v4897_v5  ;;  %v4902_v17 = vsub.f32 %v8514_v37, %v8533_v20  ;;  %v4935_v62 = vadd.f32 %v8545_v44, %v4898_v7 }
 0x4b6   :  { %4953 = vst [vmem:[#allocation16 + $0x48] sm:$0xff] %v4921_v22  ;;  %v4903_v2 = vsub.f32 %v8518_v46, %v8533_v20  ;;  %v4936_v4 = vadd.f32 %v8545_v44, %v4899_v10  ;;  %v4904_v14 = vsub.f32 %v8522_v26, %v8533_v20  ;;  %v4937_v25 = vadd.f32 %v8545_v44, %v4900_v3 }
 0x4b7   :  { %4954 = vst [vmem:[#allocation16 + $0x50] sm:$0xff] %v4922_v43  ;;  %v4905_v9 = vsub.f32 %v8527_v61, %v8533_v20  ;;  %v4938_v37 = vadd.f32 %v8545_v44, %v4901_v12  ;;  %v4906_v23 = vsub.f32 %v8530_v63, %v8533_v20  ;;  %v4939_v46 = vadd.f32 %v8545_v44, %v4902_v17 }
 0x4b8   :  { %4955 = vst [vmem:[#allocation16 + $0x58] sm:$0xff] %v4923_v38  ;;  %v4940_v29 = vadd.f32 %v8545_v44, %v4903_v2  ;;  %v4941_v26 = vadd.f32 %v8545_v44, %v4904_v14 }
 0x4b9   :  { %4956 = vst [vmem:[#allocation16 + $0x60] sm:$0xff] %v4924_v57  ;;  %v4942_v33 = vadd.f32 %v8545_v44, %v4905_v9  ;;  %v4943_v61 = vadd.f32 %v8545_v44, %v4906_v23 }
 0x4ba   :  { %4957 = vst [vmem:[#allocation16 + $0x68] sm:$0xff] %v4925_v56 }
 0x4bb   :  { %4958 = vst [vmem:[#allocation16 + $0x70] sm:$0xff] %v4926_v11 }
 0x4bc   :  { %4959 = vst [vmem:[#allocation16 + $0x78] sm:$0xff] %v4927_v19 }
 0x4bd   :  { %4960 = vst [vmem:[#allocation16 + $0x80] sm:$0xff] %v4928_v41 }
 0x4be   :  { %4961 = vst [vmem:[#allocation16 + $0x88] sm:$0xff] %v4929_v51 }
 0x4bf   :  { %4962 = vst [vmem:[#allocation16 + $0x90] sm:$0xff] %v4930_v8 }
 0x4c0   :  { %4963 = vst [vmem:[#allocation16 + $0x98] sm:$0xff] %v4931_v27 }
 0x4c1   :  { %4964 = vst [vmem:[#allocation16 + $0xa0] sm:$0xff] %v4932_v55 }
 0x4c2   :  { %4965 = vst [vmem:[#allocation16 + $0xa8] sm:$0xff] %v4933_v47 }
 0x4c3   :  { %4966 = vst [vmem:[#allocation16 + $0xb0] sm:$0xff] %v4934_v52 }
 0x4c4   :  { %4967 = vst [vmem:[#allocation16 + $0xb8] sm:$0xff] %v4935_v62 }
 0x4c5   :  { %4968 = vst [vmem:[#allocation16 + $0xc0] sm:$0xff] %v4936_v4 }
 0x4c6   :  { %4969 = vst [vmem:[#allocation16 + $0xc8] sm:$0xff] %v4937_v25 }
 0x4c7   :  { %4970 = vst [vmem:[#allocation16 + $0xd0] sm:$0xff] %v4938_v37 }
 0x4c8   :  { %4971 = vst [vmem:[#allocation16 + $0xd8] sm:$0xff] %v4939_v46 }
 0x4c9   :  { %4972 = vst [vmem:[#allocation16 + $0xe0] sm:$0xff] %v4940_v29 }
 0x4ca   :  { %4973 = vst [vmem:[#allocation16 + $0xe8] sm:$0xff] %v4941_v26 }
 0x4cb   :  { %4974 = vst [vmem:[#allocation16 + $0xf0] sm:$0xff] %v4942_v33 }
 0x4cc   :  { %4975 = vst [vmem:[#allocation16 + $0xf8] sm:$0xff] %v4943_v61 }
 0x4cd   :  { %4986 = dma.vmem_to_hbm [thread:$0]  %s4982_s7, 4096, %s4984_s23, [#allocation4]  }
 0x4ce   :  { %8221 = dma.done.wait [#allocation4], 4096  }
 0x4cf   :  { %8222 = vsyncadd [#allocation4], 4294963200 }
 0x4d0   :  { %4991 = vsyncpa [#allocation3], 1 }
 0x4d1   :  { %4992 = vsyncpa [#allocation6], 1 }
 0x4d2   :  { %4993 = vsyncpa [#allocation9], 1 }
 0x4d3   :  { %4994 = vsyncpa [#allocation12], 1 }
 0x4d4   :  { %4995 = vsyncpa [#allocation15], 1 }
 0x4d5   :  { %4996 = vsyncpa [#allocation4], 1 }

</bundles_post_ra>
